<compile_context>
chip_gen: v7x
topology: tpu7x:2x2x1
jax: 0.10.0
libtpu: 0.0.40
codegen_flags: <defaults>
</compile_context>

<pallas_src>
import functools

import jax
import jax.numpy as jnp
from jax.experimental import pallas as pl
from jax.experimental.pallas import tpu as pltpu


def _dgcnn_kernel(x_ref,
                  w1_ref, b1_ref, w2_ref, b2_ref, w3_ref, b3_ref,
                  w4_ref, b4_ref, w5_ref, b5_ref,
                  out_ref, *, k_nbrs):
    """Fused DGCNN forward for one (batch, point-tile) grid step.

    Layout: channels on sublanes, points on lanes.
      x_ref   : (K, 3, TN)    f32 relative coordinates
      wX_ref  : (Cout, Cin)   bf16 1x1-conv weights with BN scale folded
      bX_ref  : (Cout, 1)     f32 folded BN shift
      w5_ref  : (emb, 256)    bf16
      out_ref : (emb, TN)     f32 output tile (already [emb, points])
    """
    K = k_nbrs

    def layer(hs, w_ref, b_ref):
        # hs: list of K (Cin, TN) bf16 slabs.
        # Returns (K new (Cout, TN) bf16 slabs, elementwise max over K).
        w = w_ref[...]          # (Cout, Cin) bf16, loaded once per layer
        b = b_ref[...]          # (Cout, 1)   f32,  loaded once per layer
        outs = []
        for h_k in hs:
            # MXU: (Cout, Cin) @ (Cin, TN) -> (Cout, TN); f32 accumulate;
            # bias+ReLU in f32; store bf16 for the next layer.
            y = jnp.dot(w, h_k, preferred_element_type=jnp.float32)
            outs.append(jnp.maximum(y + b, 0.0).astype(jnp.bfloat16))
        # Max over K: pure VPU elementwise max over K aligned (Cout, TN) slabs.
        x_max = outs[0]
        for o in outs[1:]:
            x_max = jnp.maximum(x_max, o)
        return outs, x_max

    xs = [x_ref[k].astype(jnp.bfloat16) for k in range(K)]   # K x (3, TN)

    h1, x1 = layer(xs, w1_ref, b1_ref)     # x1: (32,  TN)
    h2, x2 = layer(h1, w2_ref, b2_ref)     # x2: (32,  TN)
    h3, x3 = layer(h2, w3_ref, b3_ref)     # x3: (64,  TN)
    _,  x4 = layer(h3, w4_ref, b4_ref)     # x4: (128, TN)

    # Sublane-axis concat at offsets 0/32/64/128 (no lane shuffles), then one
    # full-contraction (256) x full-lane (TN) dot — fully occupies the MXU.
    feat = jnp.concatenate([x1, x2, x3, x4], axis=0)          # (256, TN) bf16
    y5 = jnp.dot(w5_ref[...], feat, preferred_element_type=jnp.float32)
    out_ref[...] = jnp.maximum(y5 + b5_ref[...], 0.0).astype(out_ref.dtype)


def dgcnn_forward(x_nchw, params, emb_dims, *, tile_n=None,
                  vmem_limit_bytes=32 * 1024 * 1024,
                  core_parallel_batch=False):
    """x_nchw: [B, 3, N, K] float32 -> [B, emb_dims, N] float32."""
    B, C_in, N, K = x_nchw.shape
    assert C_in == 3

    # [B, 3, N, K] -> [B, K, 3, N]: channels on sublanes, points on lanes.
    x = jnp.transpose(x_nchw, (0, 3, 1, 2))

    # Pad N to a multiple of 128 so output stores are lane-dense / unmasked.
    # Points are independent (1x1 convs + max over K), so padding is exact.
    n_pad = (-N) % 128
    if n_pad:
        x = jnp.pad(x, ((0, 0), (0, 0), (0, 0), (0, n_pad)))
    Np = N + n_pad

    if tile_n is None:
        tile_n = 256 if Np % 256 == 0 else 128
    assert Np % tile_n == 0 and tile_n % 128 == 0

    (w1, b1), (w2, b2), (w3, b3), (w4, b4), (w5, b5) = params

    kernel = functools.partial(_dgcnn_kernel, k_nbrs=K)

    def w_spec(arr):
        # Weights / biases: constant block index -> stay resident in VMEM.
        nd = arr.ndim
        return pl.BlockSpec(arr.shape, lambda b, n, _nd=nd: (0,) * _nd)

    # On v7x, set core_parallel_batch=True to shard batch steps across the
    # 2 TensorCores; plain "parallel" is kept as the safe default elsewhere.
    batch_sem = pltpu.CORE_PARALLEL if core_parallel_batch else "parallel"

    out = pl.pallas_call(
        kernel,
        out_shape=jax.ShapeDtypeStruct((B, emb_dims, Np), jnp.float32),
        grid_spec=pltpu.PrefetchScalarGridSpec(
            num_scalar_prefetch=0,
            grid=(B, Np // tile_n),
            in_specs=[
                pl.BlockSpec((None, K, 3, tile_n), lambda b, n: (b, 0, 0, n)),
                w_spec(w1), w_spec(b1),
                w_spec(w2), w_spec(b2),
                w_spec(w3), w_spec(b3),
                w_spec(w4), w_spec(b4),
                w_spec(w5), w_spec(b5),
            ],
            out_specs=pl.BlockSpec((None, emb_dims, tile_n),
                                   lambda b, n: (b, 0, n)),
        ),
        compiler_params=pltpu.CompilerParams(
            dimension_semantics=(batch_sem, "parallel"),
            vmem_limit_bytes=vmem_limit_bytes),
    )(x, w1, b1, w2, b2, w3, b3, w4, b4, w5, b5)

    return out[:, :, :N] if n_pad else out


def make_params(key, emb_dims):
    """Deterministic synthetic parameters.

    Conv weights are (Cout, Cin) (PyTorch's squeezed (Cout, Cin, 1, 1)).
    Eval-mode BatchNorm (running_mean=0, running_var=1) is folded in:
    scale = gamma/sqrt(1+eps), shift = beta.  Weights are bf16 (MXU fast
    path); biases stay f32 and are shaped (Cout, 1) for the channels-on-
    sublanes layout.
    """
    eps = 1e-5
    layer_dims = [(3, 32), (32, 32), (32, 64), (64, 128), (256, emb_dims)]
    params = []
    for i, (cin, cout) in enumerate(layer_dims):
        kw, kg, kb = jax.random.split(jax.random.fold_in(key, i), 3)
        w = 0.1 * jax.random.normal(kw, (cout, cin), dtype=jnp.float32)
        gamma = 1.0 + 0.1 * jax.random.normal(kg, (cout,), dtype=jnp.float32)
        beta = 0.1 * jax.random.normal(kb, (cout,), dtype=jnp.float32)
        scale = gamma / jnp.sqrt(1.0 + eps)
        w_folded = (w * scale[:, None]).astype(jnp.bfloat16)
        b_folded = beta.reshape(cout, 1).astype(jnp.float32)
        params.append((w_folded, b_folded))
    return params


def dgcnn_reference(x_nchw, params):
    """Plain-JAX reference of the same (BN-folded, eval-mode, bf16) forward."""
    (w1, b1), (w2, b2), (w3, b3), (w4, b4), (w5, b5) = params
    h = jnp.transpose(x_nchw, (0, 3, 1, 2)).astype(jnp.bfloat16)   # [B,K,3,N]

    def cbr(h, w, b):
        y = jnp.einsum('oc,bkcn->bkon', w, h,
                       preferred_element_type=jnp.float32)
        return jnp.maximum(y + b, 0.0).astype(jnp.bfloat16)

    h1 = cbr(h, w1, b1);  x1 = jnp.max(h1, axis=1)
    h2 = cbr(h1, w2, b2); x2 = jnp.max(h2, axis=1)
    h3 = cbr(h2, w3, b3); x3 = jnp.max(h3, axis=1)
    h4 = cbr(h3, w4, b4); x4 = jnp.max(h4, axis=1)
    feat = jnp.concatenate([x1, x2, x3, x4], axis=1)                # [B,256,N]
    y = jnp.einsum('oc,bcn->bon', w5, feat,
                   preferred_element_type=jnp.float32)
    return jnp.maximum(y + b5, 0.0)                                  # [B,emb,N]


if __name__ == "__main__":
    B, N, K = 2, 16, 8            # batch, points, neighbors (small demo)
    EMB = 256                     # module default emb_dims

    key = jax.random.PRNGKey(0)
    kx, kp = jax.random.split(key)
    x = jax.random.normal(kx, (B, 3, N, K), dtype=jnp.float32)
    params = make_params(kp, EMB)

    out = jax.block_until_ready(dgcnn_forward(x, params, EMB))
    assert out.shape == (B, EMB, N), out.shape

    ref = jax.block_until_ready(dgcnn_reference(x, params))
    # bf16 intermediates are quantized identically in kernel and reference;
    # residual differences come only from f32 accumulation order in the dots.
    assert jnp.allclose(out, ref, atol=2e-3, rtol=2e-3), \
        float(jnp.max(jnp.abs(out - ref)))

    print("KERNEL_OK")
</pallas_src>

<mosaic_0001>
module attributes {stable_mosaic.version = 11 : i64} {
  func.func @_dgcnn_kernel(%arg0: i32, %arg1: i32, %arg2: memref<1x8x3x128xf32, #tpu.memory_space<vmem>>, %arg3: memref<32x3xbf16, #tpu.memory_space<vmem>>, %arg4: memref<32x1xf32, #tpu.memory_space<vmem>>, %arg5: memref<32x32xbf16, #tpu.memory_space<vmem>>, %arg6: memref<32x1xf32, #tpu.memory_space<vmem>>, %arg7: memref<64x32xbf16, #tpu.memory_space<vmem>>, %arg8: memref<64x1xf32, #tpu.memory_space<vmem>>, %arg9: memref<128x64xbf16, #tpu.memory_space<vmem>>, %arg10: memref<128x1xf32, #tpu.memory_space<vmem>>, %arg11: memref<256x256xbf16, #tpu.memory_space<vmem>>, %arg12: memref<256x1xf32, #tpu.memory_space<vmem>>, %arg13: memref<1x256x128xf32, #tpu.memory_space<vmem>>) attributes {dimension_semantics = [#tpu.dimension_semantics<parallel>, #tpu.dimension_semantics<parallel>], iteration_bounds = array<i64: 2, 1>, scalar_prefetch = 0 : i64, scratch_operands = 0 : i64, tpu.core_type = #tpu.core_type<tc>, window_params = [{transform_indices = @transform_0, window_bounds = array<i64: 1, 8, 3, 128>}, {pipeline_mode = #tpu.pipeline_mode<synchronous>, transform_indices = @transform_1, window_bounds = array<i64: 32, 3>}, {pipeline_mode = #tpu.pipeline_mode<synchronous>, transform_indices = @transform_2, window_bounds = array<i64: 32, 1>}, {pipeline_mode = #tpu.pipeline_mode<synchronous>, transform_indices = @transform_3, window_bounds = array<i64: 32, 32>}, {pipeline_mode = #tpu.pipeline_mode<synchronous>, transform_indices = @transform_4, window_bounds = array<i64: 32, 1>}, {pipeline_mode = #tpu.pipeline_mode<synchronous>, transform_indices = @transform_5, window_bounds = array<i64: 64, 32>}, {pipeline_mode = #tpu.pipeline_mode<synchronous>, transform_indices = @transform_6, window_bounds = array<i64: 64, 1>}, {pipeline_mode = #tpu.pipeline_mode<synchronous>, transform_indices = @transform_7, window_bounds = array<i64: 128, 64>}, {pipeline_mode = #tpu.pipeline_mode<synchronous>, transform_indices = @transform_8, window_bounds = array<i64: 128, 1>}, {pipeline_mode = #tpu.pipeline_mode<synchronous>, transform_indices = @transform_9, window_bounds = array<i64: 256, 256>}, {pipeline_mode = #tpu.pipeline_mode<synchronous>, transform_indices = @transform_10, window_bounds = array<i64: 256, 1>}, {transform_indices = @transform_11, window_bounds = array<i64: 1, 256, 128>}]} {
    %c0 = arith.constant 0 : index
    %c0_0 = arith.constant 0 : index
    %c0_1 = arith.constant 0 : index
    %c0_2 = arith.constant 0 : index
    %0 = vector.load %arg2[%c0, %c0_0, %c0_1, %c0_2] : memref<1x8x3x128xf32, #tpu.memory_space<vmem>>, vector<1x1x3x128xf32>
    %1 = vector.shape_cast %0 : vector<1x1x3x128xf32> to vector<3x128xf32>
    %2 = arith.truncf %1 : vector<3x128xf32> to vector<3x128xbf16>
    %c0_3 = arith.constant 0 : index
    %c1 = arith.constant 1 : index
    %c0_4 = arith.constant 0 : index
    %c0_5 = arith.constant 0 : index
    %3 = vector.load %arg2[%c0_3, %c1, %c0_4, %c0_5] : memref<1x8x3x128xf32, #tpu.memory_space<vmem>>, vector<1x1x3x128xf32>
    %4 = vector.shape_cast %3 : vector<1x1x3x128xf32> to vector<3x128xf32>
    %5 = arith.truncf %4 : vector<3x128xf32> to vector<3x128xbf16>
    %c0_6 = arith.constant 0 : index
    %c2 = arith.constant 2 : index
    %c0_7 = arith.constant 0 : index
    %c0_8 = arith.constant 0 : index
    %6 = vector.load %arg2[%c0_6, %c2, %c0_7, %c0_8] : memref<1x8x3x128xf32, #tpu.memory_space<vmem>>, vector<1x1x3x128xf32>
    %7 = vector.shape_cast %6 : vector<1x1x3x128xf32> to vector<3x128xf32>
    %8 = arith.truncf %7 : vector<3x128xf32> to vector<3x128xbf16>
    %c0_9 = arith.constant 0 : index
    %c3 = arith.constant 3 : index
    %c0_10 = arith.constant 0 : index
    %c0_11 = arith.constant 0 : index
    %9 = vector.load %arg2[%c0_9, %c3, %c0_10, %c0_11] : memref<1x8x3x128xf32, #tpu.memory_space<vmem>>, vector<1x1x3x128xf32>
    %10 = vector.shape_cast %9 : vector<1x1x3x128xf32> to vector<3x128xf32>
    %11 = arith.truncf %10 : vector<3x128xf32> to vector<3x128xbf16>
    %c0_12 = arith.constant 0 : index
    %c4 = arith.constant 4 : index
    %c0_13 = arith.constant 0 : index
    %c0_14 = arith.constant 0 : index
    %12 = vector.load %arg2[%c0_12, %c4, %c0_13, %c0_14] : memref<1x8x3x128xf32, #tpu.memory_space<vmem>>, vector<1x1x3x128xf32>
    %13 = vector.shape_cast %12 : vector<1x1x3x128xf32> to vector<3x128xf32>
    %14 = arith.truncf %13 : vector<3x128xf32> to vector<3x128xbf16>
    %c0_15 = arith.constant 0 : index
    %c5 = arith.constant 5 : index
    %c0_16 = arith.constant 0 : index
    %c0_17 = arith.constant 0 : index
    %15 = vector.load %arg2[%c0_15, %c5, %c0_16, %c0_17] : memref<1x8x3x128xf32, #tpu.memory_space<vmem>>, vector<1x1x3x128xf32>
    %16 = vector.shape_cast %15 : vector<1x1x3x128xf32> to vector<3x128xf32>
    %17 = arith.truncf %16 : vector<3x128xf32> to vector<3x128xbf16>
    %c0_18 = arith.constant 0 : index
    %c6 = arith.constant 6 : index
    %c0_19 = arith.constant 0 : index
    %c0_20 = arith.constant 0 : index
    %18 = vector.load %arg2[%c0_18, %c6, %c0_19, %c0_20] : memref<1x8x3x128xf32, #tpu.memory_space<vmem>>, vector<1x1x3x128xf32>
    %19 = vector.shape_cast %18 : vector<1x1x3x128xf32> to vector<3x128xf32>
    %20 = arith.truncf %19 : vector<3x128xf32> to vector<3x128xbf16>
    %c0_21 = arith.constant 0 : index
    %c7 = arith.constant 7 : index
    %c0_22 = arith.constant 0 : index
    %c0_23 = arith.constant 0 : index
    %21 = vector.load %arg2[%c0_21, %c7, %c0_22, %c0_23] : memref<1x8x3x128xf32, #tpu.memory_space<vmem>>, vector<1x1x3x128xf32>
    %22 = vector.shape_cast %21 : vector<1x1x3x128xf32> to vector<3x128xf32>
    %23 = arith.truncf %22 : vector<3x128xf32> to vector<3x128xbf16>
    %c0_24 = arith.constant 0 : index
    %c0_25 = arith.constant 0 : index
    %24 = vector.load %arg3[%c0_24, %c0_25] : memref<32x3xbf16, #tpu.memory_space<vmem>>, vector<32x3xbf16>
    %c0_26 = arith.constant 0 : index
    %c0_27 = arith.constant 0 : index
    %25 = vector.load %arg4[%c0_26, %c0_27] : memref<32x1xf32, #tpu.memory_space<vmem>>, vector<32x1xf32>
    %cst = arith.constant dense<0.000000e+00> : vector<32x128xf32>
    %26 = tpu.matmul %24, %2, %cst {dimension_numbers = #tpu.dot_dimension_numbers<[1], [0], [0], [1], [0, 0, 1, 1], [], []>} : vector<32x3xbf16>, vector<3x128xbf16>, vector<32x128xf32> -> vector<32x128xf32>
    %27 = vector.broadcast %25 : vector<32x1xf32> to vector<32x128xf32>
    %28 = arith.addf %26, %27 : vector<32x128xf32>
    %cst_28 = arith.constant 0.000000e+00 : f32
    %29 = vector.broadcast %cst_28 : f32 to vector<32x128xf32>
    %30 = arith.maximumf %28, %29 : vector<32x128xf32>
    %31 = arith.truncf %30 : vector<32x128xf32> to vector<32x128xbf16>
    %cst_29 = arith.constant dense<0.000000e+00> : vector<32x128xf32>
    %32 = tpu.matmul %24, %5, %cst_29 {dimension_numbers = #tpu.dot_dimension_numbers<[1], [0], [0], [1], [0, 0, 1, 1], [], []>} : vector<32x3xbf16>, vector<3x128xbf16>, vector<32x128xf32> -> vector<32x128xf32>
    %33 = vector.broadcast %25 : vector<32x1xf32> to vector<32x128xf32>
    %34 = arith.addf %32, %33 : vector<32x128xf32>
    %cst_30 = arith.constant 0.000000e+00 : f32
    %35 = vector.broadcast %cst_30 : f32 to vector<32x128xf32>
    %36 = arith.maximumf %34, %35 : vector<32x128xf32>
    %37 = arith.truncf %36 : vector<32x128xf32> to vector<32x128xbf16>
    %cst_31 = arith.constant dense<0.000000e+00> : vector<32x128xf32>
    %38 = tpu.matmul %24, %8, %cst_31 {dimension_numbers = #tpu.dot_dimension_numbers<[1], [0], [0], [1], [0, 0, 1, 1], [], []>} : vector<32x3xbf16>, vector<3x128xbf16>, vector<32x128xf32> -> vector<32x128xf32>
    %39 = vector.broadcast %25 : vector<32x1xf32> to vector<32x128xf32>
    %40 = arith.addf %38, %39 : vector<32x128xf32>
    %cst_32 = arith.constant 0.000000e+00 : f32
    %41 = vector.broadcast %cst_32 : f32 to vector<32x128xf32>
    %42 = arith.maximumf %40, %41 : vector<32x128xf32>
    %43 = arith.truncf %42 : vector<32x128xf32> to vector<32x128xbf16>
    %cst_33 = arith.constant dense<0.000000e+00> : vector<32x128xf32>
    %44 = tpu.matmul %24, %11, %cst_33 {dimension_numbers = #tpu.dot_dimension_numbers<[1], [0], [0], [1], [0, 0, 1, 1], [], []>} : vector<32x3xbf16>, vector<3x128xbf16>, vector<32x128xf32> -> vector<32x128xf32>
    %45 = vector.broadcast %25 : vector<32x1xf32> to vector<32x128xf32>
    %46 = arith.addf %44, %45 : vector<32x128xf32>
    %cst_34 = arith.constant 0.000000e+00 : f32
    %47 = vector.broadcast %cst_34 : f32 to vector<32x128xf32>
    %48 = arith.maximumf %46, %47 : vector<32x128xf32>
    %49 = arith.truncf %48 : vector<32x128xf32> to vector<32x128xbf16>
    %cst_35 = arith.constant dense<0.000000e+00> : vector<32x128xf32>
    %50 = tpu.matmul %24, %14, %cst_35 {dimension_numbers = #tpu.dot_dimension_numbers<[1], [0], [0], [1], [0, 0, 1, 1], [], []>} : vector<32x3xbf16>, vector<3x128xbf16>, vector<32x128xf32> -> vector<32x128xf32>
    %51 = vector.broadcast %25 : vector<32x1xf32> to vector<32x128xf32>
    %52 = arith.addf %50, %51 : vector<32x128xf32>
    %cst_36 = arith.constant 0.000000e+00 : f32
    %53 = vector.broadcast %cst_36 : f32 to vector<32x128xf32>
    %54 = arith.maximumf %52, %53 : vector<32x128xf32>
    %55 = arith.truncf %54 : vector<32x128xf32> to vector<32x128xbf16>
    %cst_37 = arith.constant dense<0.000000e+00> : vector<32x128xf32>
    %56 = tpu.matmul %24, %17, %cst_37 {dimension_numbers = #tpu.dot_dimension_numbers<[1], [0], [0], [1], [0, 0, 1, 1], [], []>} : vector<32x3xbf16>, vector<3x128xbf16>, vector<32x128xf32> -> vector<32x128xf32>
    %57 = vector.broadcast %25 : vector<32x1xf32> to vector<32x128xf32>
    %58 = arith.addf %56, %57 : vector<32x128xf32>
    %cst_38 = arith.constant 0.000000e+00 : f32
    %59 = vector.broadcast %cst_38 : f32 to vector<32x128xf32>
    %60 = arith.maximumf %58, %59 : vector<32x128xf32>
    %61 = arith.truncf %60 : vector<32x128xf32> to vector<32x128xbf16>
    %cst_39 = arith.constant dense<0.000000e+00> : vector<32x128xf32>
    %62 = tpu.matmul %24, %20, %cst_39 {dimension_numbers = #tpu.dot_dimension_numbers<[1], [0], [0], [1], [0, 0, 1, 1], [], []>} : vector<32x3xbf16>, vector<3x128xbf16>, vector<32x128xf32> -> vector<32x128xf32>
    %63 = vector.broadcast %25 : vector<32x1xf32> to vector<32x128xf32>
    %64 = arith.addf %62, %63 : vector<32x128xf32>
    %cst_40 = arith.constant 0.000000e+00 : f32
    %65 = vector.broadcast %cst_40 : f32 to vector<32x128xf32>
    %66 = arith.maximumf %64, %65 : vector<32x128xf32>
    %67 = arith.truncf %66 : vector<32x128xf32> to vector<32x128xbf16>
    %cst_41 = arith.constant dense<0.000000e+00> : vector<32x128xf32>
    %68 = tpu.matmul %24, %23, %cst_41 {dimension_numbers = #tpu.dot_dimension_numbers<[1], [0], [0], [1], [0, 0, 1, 1], [], []>} : vector<32x3xbf16>, vector<3x128xbf16>, vector<32x128xf32> -> vector<32x128xf32>
    %69 = vector.broadcast %25 : vector<32x1xf32> to vector<32x128xf32>
    %70 = arith.addf %68, %69 : vector<32x128xf32>
    %cst_42 = arith.constant 0.000000e+00 : f32
    %71 = vector.broadcast %cst_42 : f32 to vector<32x128xf32>
    %72 = arith.maximumf %70, %71 : vector<32x128xf32>
    %73 = arith.truncf %72 : vector<32x128xf32> to vector<32x128xbf16>
    %74 = arith.maximumf %31, %37 : vector<32x128xbf16>
    %75 = arith.maximumf %74, %43 : vector<32x128xbf16>
    %76 = arith.maximumf %75, %49 : vector<32x128xbf16>
    %77 = arith.maximumf %76, %55 : vector<32x128xbf16>
    %78 = arith.maximumf %77, %61 : vector<32x128xbf16>
    %79 = arith.maximumf %78, %67 : vector<32x128xbf16>
    %80 = arith.maximumf %79, %73 : vector<32x128xbf16>
    %c0_43 = arith.constant 0 : index
    %c0_44 = arith.constant 0 : index
    %81 = vector.load %arg5[%c0_43, %c0_44] : memref<32x32xbf16, #tpu.memory_space<vmem>>, vector<32x32xbf16>
    %c0_45 = arith.constant 0 : index
    %c0_46 = arith.constant 0 : index
    %82 = vector.load %arg6[%c0_45, %c0_46] : memref<32x1xf32, #tpu.memory_space<vmem>>, vector<32x1xf32>
    %cst_47 = arith.constant dense<0.000000e+00> : vector<32x128xf32>
    %83 = tpu.matmul %81, %31, %cst_47 {dimension_numbers = #tpu.dot_dimension_numbers<[1], [0], [0], [1], [0, 0, 1, 1], [], []>} : vector<32x32xbf16>, vector<32x128xbf16>, vector<32x128xf32> -> vector<32x128xf32>
    %84 = vector.broadcast %82 : vector<32x1xf32> to vector<32x128xf32>
    %85 = arith.addf %83, %84 : vector<32x128xf32>
    %cst_48 = arith.constant 0.000000e+00 : f32
    %86 = vector.broadcast %cst_48 : f32 to vector<32x128xf32>
    %87 = arith.maximumf %85, %86 : vector<32x128xf32>
    %88 = arith.truncf %87 : vector<32x128xf32> to vector<32x128xbf16>
    %cst_49 = arith.constant dense<0.000000e+00> : vector<32x128xf32>
    %89 = tpu.matmul %81, %37, %cst_49 {dimension_numbers = #tpu.dot_dimension_numbers<[1], [0], [0], [1], [0, 0, 1, 1], [], []>} : vector<32x32xbf16>, vector<32x128xbf16>, vector<32x128xf32> -> vector<32x128xf32>
    %90 = vector.broadcast %82 : vector<32x1xf32> to vector<32x128xf32>
    %91 = arith.addf %89, %90 : vector<32x128xf32>
    %cst_50 = arith.constant 0.000000e+00 : f32
    %92 = vector.broadcast %cst_50 : f32 to vector<32x128xf32>
    %93 = arith.maximumf %91, %92 : vector<32x128xf32>
    %94 = arith.truncf %93 : vector<32x128xf32> to vector<32x128xbf16>
    %cst_51 = arith.constant dense<0.000000e+00> : vector<32x128xf32>
    %95 = tpu.matmul %81, %43, %cst_51 {dimension_numbers = #tpu.dot_dimension_numbers<[1], [0], [0], [1], [0, 0, 1, 1], [], []>} : vector<32x32xbf16>, vector<32x128xbf16>, vector<32x128xf32> -> vector<32x128xf32>
    %96 = vector.broadcast %82 : vector<32x1xf32> to vector<32x128xf32>
    %97 = arith.addf %95, %96 : vector<32x128xf32>
    %cst_52 = arith.constant 0.000000e+00 : f32
    %98 = vector.broadcast %cst_52 : f32 to vector<32x128xf32>
    %99 = arith.maximumf %97, %98 : vector<32x128xf32>
    %100 = arith.truncf %99 : vector<32x128xf32> to vector<32x128xbf16>
    %cst_53 = arith.constant dense<0.000000e+00> : vector<32x128xf32>
    %101 = tpu.matmul %81, %49, %cst_53 {dimension_numbers = #tpu.dot_dimension_numbers<[1], [0], [0], [1], [0, 0, 1, 1], [], []>} : vector<32x32xbf16>, vector<32x128xbf16>, vector<32x128xf32> -> vector<32x128xf32>
    %102 = vector.broadcast %82 : vector<32x1xf32> to vector<32x128xf32>
    %103 = arith.addf %101, %102 : vector<32x128xf32>
    %cst_54 = arith.constant 0.000000e+00 : f32
    %104 = vector.broadcast %cst_54 : f32 to vector<32x128xf32>
    %105 = arith.maximumf %103, %104 : vector<32x128xf32>
    %106 = arith.truncf %105 : vector<32x128xf32> to vector<32x128xbf16>
    %cst_55 = arith.constant dense<0.000000e+00> : vector<32x128xf32>
    %107 = tpu.matmul %81, %55, %cst_55 {dimension_numbers = #tpu.dot_dimension_numbers<[1], [0], [0], [1], [0, 0, 1, 1], [], []>} : vector<32x32xbf16>, vector<32x128xbf16>, vector<32x128xf32> -> vector<32x128xf32>
    %108 = vector.broadcast %82 : vector<32x1xf32> to vector<32x128xf32>
    %109 = arith.addf %107, %108 : vector<32x128xf32>
    %cst_56 = arith.constant 0.000000e+00 : f32
    %110 = vector.broadcast %cst_56 : f32 to vector<32x128xf32>
    %111 = arith.maximumf %109, %110 : vector<32x128xf32>
    %112 = arith.truncf %111 : vector<32x128xf32> to vector<32x128xbf16>
    %cst_57 = arith.constant dense<0.000000e+00> : vector<32x128xf32>
    %113 = tpu.matmul %81, %61, %cst_57 {dimension_numbers = #tpu.dot_dimension_numbers<[1], [0], [0], [1], [0, 0, 1, 1], [], []>} : vector<32x32xbf16>, vector<32x128xbf16>, vector<32x128xf32> -> vector<32x128xf32>
    %114 = vector.broadcast %82 : vector<32x1xf32> to vector<32x128xf32>
    %115 = arith.addf %113, %114 : vector<32x128xf32>
    %cst_58 = arith.constant 0.000000e+00 : f32
    %116 = vector.broadcast %cst_58 : f32 to vector<32x128xf32>
    %117 = arith.maximumf %115, %116 : vector<32x128xf32>
    %118 = arith.truncf %117 : vector<32x128xf32> to vector<32x128xbf16>
    %cst_59 = arith.constant dense<0.000000e+00> : vector<32x128xf32>
    %119 = tpu.matmul %81, %67, %cst_59 {dimension_numbers = #tpu.dot_dimension_numbers<[1], [0], [0], [1], [0, 0, 1, 1], [], []>} : vector<32x32xbf16>, vector<32x128xbf16>, vector<32x128xf32> -> vector<32x128xf32>
    %120 = vector.broadcast %82 : vector<32x1xf32> to vector<32x128xf32>
    %121 = arith.addf %119, %120 : vector<32x128xf32>
    %cst_60 = arith.constant 0.000000e+00 : f32
    %122 = vector.broadcast %cst_60 : f32 to vector<32x128xf32>
    %123 = arith.maximumf %121, %122 : vector<32x128xf32>
    %124 = arith.truncf %123 : vector<32x128xf32> to vector<32x128xbf16>
    %cst_61 = arith.constant dense<0.000000e+00> : vector<32x128xf32>
    %125 = tpu.matmul %81, %73, %cst_61 {dimension_numbers = #tpu.dot_dimension_numbers<[1], [0], [0], [1], [0, 0, 1, 1], [], []>} : vector<32x32xbf16>, vector<32x128xbf16>, vector<32x128xf32> -> vector<32x128xf32>
    %126 = vector.broadcast %82 : vector<32x1xf32> to vector<32x128xf32>
    %127 = arith.addf %125, %126 : vector<32x128xf32>
    %cst_62 = arith.constant 0.000000e+00 : f32
    %128 = vector.broadcast %cst_62 : f32 to vector<32x128xf32>
    %129 = arith.maximumf %127, %128 : vector<32x128xf32>
    %130 = arith.truncf %129 : vector<32x128xf32> to vector<32x128xbf16>
    %131 = arith.maximumf %88, %94 : vector<32x128xbf16>
    %132 = arith.maximumf %131, %100 : vector<32x128xbf16>
    %133 = arith.maximumf %132, %106 : vector<32x128xbf16>
    %134 = arith.maximumf %133, %112 : vector<32x128xbf16>
    %135 = arith.maximumf %134, %118 : vector<32x128xbf16>
    %136 = arith.maximumf %135, %124 : vector<32x128xbf16>
    %137 = arith.maximumf %136, %130 : vector<32x128xbf16>
    %c0_63 = arith.constant 0 : index
    %c0_64 = arith.constant 0 : index
    %138 = vector.load %arg7[%c0_63, %c0_64] : memref<64x32xbf16, #tpu.memory_space<vmem>>, vector<64x32xbf16>
    %c0_65 = arith.constant 0 : index
    %c0_66 = arith.constant 0 : index
    %139 = vector.load %arg8[%c0_65, %c0_66] : memref<64x1xf32, #tpu.memory_space<vmem>>, vector<64x1xf32>
    %cst_67 = arith.constant dense<0.000000e+00> : vector<64x128xf32>
    %140 = tpu.matmul %138, %88, %cst_67 {dimension_numbers = #tpu.dot_dimension_numbers<[1], [0], [0], [1], [0, 0, 1, 1], [], []>} : vector<64x32xbf16>, vector<32x128xbf16>, vector<64x128xf32> -> vector<64x128xf32>
    %141 = vector.broadcast %139 : vector<64x1xf32> to vector<64x128xf32>
    %142 = arith.addf %140, %141 : vector<64x128xf32>
    %cst_68 = arith.constant 0.000000e+00 : f32
    %143 = vector.broadcast %cst_68 : f32 to vector<64x128xf32>
    %144 = arith.maximumf %142, %143 : vector<64x128xf32>
    %145 = arith.truncf %144 : vector<64x128xf32> to vector<64x128xbf16>
    %cst_69 = arith.constant dense<0.000000e+00> : vector<64x128xf32>
    %146 = tpu.matmul %138, %94, %cst_69 {dimension_numbers = #tpu.dot_dimension_numbers<[1], [0], [0], [1], [0, 0, 1, 1], [], []>} : vector<64x32xbf16>, vector<32x128xbf16>, vector<64x128xf32> -> vector<64x128xf32>
    %147 = vector.broadcast %139 : vector<64x1xf32> to vector<64x128xf32>
    %148 = arith.addf %146, %147 : vector<64x128xf32>
    %cst_70 = arith.constant 0.000000e+00 : f32
    %149 = vector.broadcast %cst_70 : f32 to vector<64x128xf32>
    %150 = arith.maximumf %148, %149 : vector<64x128xf32>
    %151 = arith.truncf %150 : vector<64x128xf32> to vector<64x128xbf16>
    %cst_71 = arith.constant dense<0.000000e+00> : vector<64x128xf32>
    %152 = tpu.matmul %138, %100, %cst_71 {dimension_numbers = #tpu.dot_dimension_numbers<[1], [0], [0], [1], [0, 0, 1, 1], [], []>} : vector<64x32xbf16>, vector<32x128xbf16>, vector<64x128xf32> -> vector<64x128xf32>
    %153 = vector.broadcast %139 : vector<64x1xf32> to vector<64x128xf32>
    %154 = arith.addf %152, %153 : vector<64x128xf32>
    %cst_72 = arith.constant 0.000000e+00 : f32
    %155 = vector.broadcast %cst_72 : f32 to vector<64x128xf32>
    %156 = arith.maximumf %154, %155 : vector<64x128xf32>
    %157 = arith.truncf %156 : vector<64x128xf32> to vector<64x128xbf16>
    %cst_73 = arith.constant dense<0.000000e+00> : vector<64x128xf32>
    %158 = tpu.matmul %138, %106, %cst_73 {dimension_numbers = #tpu.dot_dimension_numbers<[1], [0], [0], [1], [0, 0, 1, 1], [], []>} : vector<64x32xbf16>, vector<32x128xbf16>, vector<64x128xf32> -> vector<64x128xf32>
    %159 = vector.broadcast %139 : vector<64x1xf32> to vector<64x128xf32>
    %160 = arith.addf %158, %159 : vector<64x128xf32>
    %cst_74 = arith.constant 0.000000e+00 : f32
    %161 = vector.broadcast %cst_74 : f32 to vector<64x128xf32>
    %162 = arith.maximumf %160, %161 : vector<64x128xf32>
    %163 = arith.truncf %162 : vector<64x128xf32> to vector<64x128xbf16>
    %cst_75 = arith.constant dense<0.000000e+00> : vector<64x128xf32>
    %164 = tpu.matmul %138, %112, %cst_75 {dimension_numbers = #tpu.dot_dimension_numbers<[1], [0], [0], [1], [0, 0, 1, 1], [], []>} : vector<64x32xbf16>, vector<32x128xbf16>, vector<64x128xf32> -> vector<64x128xf32>
    %165 = vector.broadcast %139 : vector<64x1xf32> to vector<64x128xf32>
    %166 = arith.addf %164, %165 : vector<64x128xf32>
    %cst_76 = arith.constant 0.000000e+00 : f32
    %167 = vector.broadcast %cst_76 : f32 to vector<64x128xf32>
    %168 = arith.maximumf %166, %167 : vector<64x128xf32>
    %169 = arith.truncf %168 : vector<64x128xf32> to vector<64x128xbf16>
    %cst_77 = arith.constant dense<0.000000e+00> : vector<64x128xf32>
    %170 = tpu.matmul %138, %118, %cst_77 {dimension_numbers = #tpu.dot_dimension_numbers<[1], [0], [0], [1], [0, 0, 1, 1], [], []>} : vector<64x32xbf16>, vector<32x128xbf16>, vector<64x128xf32> -> vector<64x128xf32>
    %171 = vector.broadcast %139 : vector<64x1xf32> to vector<64x128xf32>
    %172 = arith.addf %170, %171 : vector<64x128xf32>
    %cst_78 = arith.constant 0.000000e+00 : f32
    %173 = vector.broadcast %cst_78 : f32 to vector<64x128xf32>
    %174 = arith.maximumf %172, %173 : vector<64x128xf32>
    %175 = arith.truncf %174 : vector<64x128xf32> to vector<64x128xbf16>
    %cst_79 = arith.constant dense<0.000000e+00> : vector<64x128xf32>
    %176 = tpu.matmul %138, %124, %cst_79 {dimension_numbers = #tpu.dot_dimension_numbers<[1], [0], [0], [1], [0, 0, 1, 1], [], []>} : vector<64x32xbf16>, vector<32x128xbf16>, vector<64x128xf32> -> vector<64x128xf32>
    %177 = vector.broadcast %139 : vector<64x1xf32> to vector<64x128xf32>
    %178 = arith.addf %176, %177 : vector<64x128xf32>
    %cst_80 = arith.constant 0.000000e+00 : f32
    %179 = vector.broadcast %cst_80 : f32 to vector<64x128xf32>
    %180 = arith.maximumf %178, %179 : vector<64x128xf32>
    %181 = arith.truncf %180 : vector<64x128xf32> to vector<64x128xbf16>
    %cst_81 = arith.constant dense<0.000000e+00> : vector<64x128xf32>
    %182 = tpu.matmul %138, %130, %cst_81 {dimension_numbers = #tpu.dot_dimension_numbers<[1], [0], [0], [1], [0, 0, 1, 1], [], []>} : vector<64x32xbf16>, vector<32x128xbf16>, vector<64x128xf32> -> vector<64x128xf32>
    %183 = vector.broadcast %139 : vector<64x1xf32> to vector<64x128xf32>
    %184 = arith.addf %182, %183 : vector<64x128xf32>
    %cst_82 = arith.constant 0.000000e+00 : f32
    %185 = vector.broadcast %cst_82 : f32 to vector<64x128xf32>
    %186 = arith.maximumf %184, %185 : vector<64x128xf32>
    %187 = arith.truncf %186 : vector<64x128xf32> to vector<64x128xbf16>
    %188 = arith.maximumf %145, %151 : vector<64x128xbf16>
    %189 = arith.maximumf %188, %157 : vector<64x128xbf16>
    %190 = arith.maximumf %189, %163 : vector<64x128xbf16>
    %191 = arith.maximumf %190, %169 : vector<64x128xbf16>
    %192 = arith.maximumf %191, %175 : vector<64x128xbf16>
    %193 = arith.maximumf %192, %181 : vector<64x128xbf16>
    %194 = arith.maximumf %193, %187 : vector<64x128xbf16>
    %c0_83 = arith.constant 0 : index
    %c0_84 = arith.constant 0 : index
    %195 = vector.load %arg9[%c0_83, %c0_84] : memref<128x64xbf16, #tpu.memory_space<vmem>>, vector<128x64xbf16>
    %c0_85 = arith.constant 0 : index
    %c0_86 = arith.constant 0 : index
    %196 = vector.load %arg10[%c0_85, %c0_86] : memref<128x1xf32, #tpu.memory_space<vmem>>, vector<128x1xf32>
    %cst_87 = arith.constant dense<0.000000e+00> : vector<128x128xf32>
    %197 = tpu.matmul %195, %145, %cst_87 {dimension_numbers = #tpu.dot_dimension_numbers<[1], [0], [0], [1], [0, 0, 1, 1], [], []>} : vector<128x64xbf16>, vector<64x128xbf16>, vector<128x128xf32> -> vector<128x128xf32>
    %198 = vector.broadcast %196 : vector<128x1xf32> to vector<128x128xf32>
    %199 = arith.addf %197, %198 : vector<128x128xf32>
    %cst_88 = arith.constant 0.000000e+00 : f32
    %200 = vector.broadcast %cst_88 : f32 to vector<128x128xf32>
    %201 = arith.maximumf %199, %200 : vector<128x128xf32>
    %202 = arith.truncf %201 : vector<128x128xf32> to vector<128x128xbf16>
    %cst_89 = arith.constant dense<0.000000e+00> : vector<128x128xf32>
    %203 = tpu.matmul %195, %151, %cst_89 {dimension_numbers = #tpu.dot_dimension_numbers<[1], [0], [0], [1], [0, 0, 1, 1], [], []>} : vector<128x64xbf16>, vector<64x128xbf16>, vector<128x128xf32> -> vector<128x128xf32>
    %204 = vector.broadcast %196 : vector<128x1xf32> to vector<128x128xf32>
    %205 = arith.addf %203, %204 : vector<128x128xf32>
    %cst_90 = arith.constant 0.000000e+00 : f32
    %206 = vector.broadcast %cst_90 : f32 to vector<128x128xf32>
    %207 = arith.maximumf %205, %206 : vector<128x128xf32>
    %208 = arith.truncf %207 : vector<128x128xf32> to vector<128x128xbf16>
    %cst_91 = arith.constant dense<0.000000e+00> : vector<128x128xf32>
    %209 = tpu.matmul %195, %157, %cst_91 {dimension_numbers = #tpu.dot_dimension_numbers<[1], [0], [0], [1], [0, 0, 1, 1], [], []>} : vector<128x64xbf16>, vector<64x128xbf16>, vector<128x128xf32> -> vector<128x128xf32>
    %210 = vector.broadcast %196 : vector<128x1xf32> to vector<128x128xf32>
    %211 = arith.addf %209, %210 : vector<128x128xf32>
    %cst_92 = arith.constant 0.000000e+00 : f32
    %212 = vector.broadcast %cst_92 : f32 to vector<128x128xf32>
    %213 = arith.maximumf %211, %212 : vector<128x128xf32>
    %214 = arith.truncf %213 : vector<128x128xf32> to vector<128x128xbf16>
    %cst_93 = arith.constant dense<0.000000e+00> : vector<128x128xf32>
    %215 = tpu.matmul %195, %163, %cst_93 {dimension_numbers = #tpu.dot_dimension_numbers<[1], [0], [0], [1], [0, 0, 1, 1], [], []>} : vector<128x64xbf16>, vector<64x128xbf16>, vector<128x128xf32> -> vector<128x128xf32>
    %216 = vector.broadcast %196 : vector<128x1xf32> to vector<128x128xf32>
    %217 = arith.addf %215, %216 : vector<128x128xf32>
    %cst_94 = arith.constant 0.000000e+00 : f32
    %218 = vector.broadcast %cst_94 : f32 to vector<128x128xf32>
    %219 = arith.maximumf %217, %218 : vector<128x128xf32>
    %220 = arith.truncf %219 : vector<128x128xf32> to vector<128x128xbf16>
    %cst_95 = arith.constant dense<0.000000e+00> : vector<128x128xf32>
    %221 = tpu.matmul %195, %169, %cst_95 {dimension_numbers = #tpu.dot_dimension_numbers<[1], [0], [0], [1], [0, 0, 1, 1], [], []>} : vector<128x64xbf16>, vector<64x128xbf16>, vector<128x128xf32> -> vector<128x128xf32>
    %222 = vector.broadcast %196 : vector<128x1xf32> to vector<128x128xf32>
    %223 = arith.addf %221, %222 : vector<128x128xf32>
    %cst_96 = arith.constant 0.000000e+00 : f32
    %224 = vector.broadcast %cst_96 : f32 to vector<128x128xf32>
    %225 = arith.maximumf %223, %224 : vector<128x128xf32>
    %226 = arith.truncf %225 : vector<128x128xf32> to vector<128x128xbf16>
    %cst_97 = arith.constant dense<0.000000e+00> : vector<128x128xf32>
    %227 = tpu.matmul %195, %175, %cst_97 {dimension_numbers = #tpu.dot_dimension_numbers<[1], [0], [0], [1], [0, 0, 1, 1], [], []>} : vector<128x64xbf16>, vector<64x128xbf16>, vector<128x128xf32> -> vector<128x128xf32>
    %228 = vector.broadcast %196 : vector<128x1xf32> to vector<128x128xf32>
    %229 = arith.addf %227, %228 : vector<128x128xf32>
    %cst_98 = arith.constant 0.000000e+00 : f32
    %230 = vector.broadcast %cst_98 : f32 to vector<128x128xf32>
    %231 = arith.maximumf %229, %230 : vector<128x128xf32>
    %232 = arith.truncf %231 : vector<128x128xf32> to vector<128x128xbf16>
    %cst_99 = arith.constant dense<0.000000e+00> : vector<128x128xf32>
    %233 = tpu.matmul %195, %181, %cst_99 {dimension_numbers = #tpu.dot_dimension_numbers<[1], [0], [0], [1], [0, 0, 1, 1], [], []>} : vector<128x64xbf16>, vector<64x128xbf16>, vector<128x128xf32> -> vector<128x128xf32>
    %234 = vector.broadcast %196 : vector<128x1xf32> to vector<128x128xf32>
    %235 = arith.addf %233, %234 : vector<128x128xf32>
    %cst_100 = arith.constant 0.000000e+00 : f32
    %236 = vector.broadcast %cst_100 : f32 to vector<128x128xf32>
    %237 = arith.maximumf %235, %236 : vector<128x128xf32>
    %238 = arith.truncf %237 : vector<128x128xf32> to vector<128x128xbf16>
    %cst_101 = arith.constant dense<0.000000e+00> : vector<128x128xf32>
    %239 = tpu.matmul %195, %187, %cst_101 {dimension_numbers = #tpu.dot_dimension_numbers<[1], [0], [0], [1], [0, 0, 1, 1], [], []>} : vector<128x64xbf16>, vector<64x128xbf16>, vector<128x128xf32> -> vector<128x128xf32>
    %240 = vector.broadcast %196 : vector<128x1xf32> to vector<128x128xf32>
    %241 = arith.addf %239, %240 : vector<128x128xf32>
    %cst_102 = arith.constant 0.000000e+00 : f32
    %242 = vector.broadcast %cst_102 : f32 to vector<128x128xf32>
    %243 = arith.maximumf %241, %242 : vector<128x128xf32>
    %244 = arith.truncf %243 : vector<128x128xf32> to vector<128x128xbf16>
    %245 = arith.maximumf %202, %208 : vector<128x128xbf16>
    %246 = arith.maximumf %245, %214 : vector<128x128xbf16>
    %247 = arith.maximumf %246, %220 : vector<128x128xbf16>
    %248 = arith.maximumf %247, %226 : vector<128x128xbf16>
    %249 = arith.maximumf %248, %232 : vector<128x128xbf16>
    %250 = arith.maximumf %249, %238 : vector<128x128xbf16>
    %251 = arith.maximumf %250, %244 : vector<128x128xbf16>
    %252 = tpu.concatenate %80, %137, %194, %251 in 0 : vector<32x128xbf16>, vector<32x128xbf16>, vector<64x128xbf16>, vector<128x128xbf16> -> vector<256x128xbf16>
    %c0_103 = arith.constant 0 : index
    %c0_104 = arith.constant 0 : index
    %253 = vector.load %arg11[%c0_103, %c0_104] : memref<256x256xbf16, #tpu.memory_space<vmem>>, vector<256x256xbf16>
    %cst_105 = arith.constant dense<0.000000e+00> : vector<256x128xf32>
    %254 = tpu.matmul %253, %252, %cst_105 {dimension_numbers = #tpu.dot_dimension_numbers<[1], [0], [0], [1], [0, 0, 1, 1], [], []>} : vector<256x256xbf16>, vector<256x128xbf16>, vector<256x128xf32> -> vector<256x128xf32>
    %c0_106 = arith.constant 0 : index
    %c0_107 = arith.constant 0 : index
    %255 = vector.load %arg12[%c0_106, %c0_107] : memref<256x1xf32, #tpu.memory_space<vmem>>, vector<256x1xf32>
    %256 = vector.broadcast %255 : vector<256x1xf32> to vector<256x128xf32>
    %257 = arith.addf %254, %256 : vector<256x128xf32>
    %cst_108 = arith.constant 0.000000e+00 : f32
    %258 = vector.broadcast %cst_108 : f32 to vector<256x128xf32>
    %259 = arith.maximumf %257, %258 : vector<256x128xf32>
    %c0_109 = arith.constant 0 : index
    %c0_110 = arith.constant 0 : index
    %c0_111 = arith.constant 0 : index
    %260 = vector.load %arg13[%c0_109, %c0_110, %c0_111] : memref<1x256x128xf32, #tpu.memory_space<vmem>>, vector<1x256x128xf32>
    %261 = vector.shape_cast %260 : vector<1x256x128xf32> to vector<256x128xf32>
    %262 = vector.shape_cast %259 : vector<256x128xf32> to vector<1x256x128xf32>
    tpu.vector_store %arg13[%c0_109, %c0_110, %c0_111], %262 {strides = array<i32>} : memref<1x256x128xf32, #tpu.memory_space<vmem>>, vector<1x256x128xf32>,
    return
  }
  func.func @transform_0(%arg0: i32, %arg1: i32) -> (i32, i32, i32, i32) {
    %c0_i32 = arith.constant 0 : i32
    %c0_i32_0 = arith.constant 0 : i32
    %c0_i32_1 = arith.constant 0 : i32
    return %arg0, %c0_i32, %c0_i32_0, %arg1 : i32, i32, i32, i32
  }
  func.func @transform_1(%arg0: i32, %arg1: i32) -> (i32, i32) {
    %c0_i32 = arith.constant 0 : i32
    %c0_i32_0 = arith.constant 0 : i32
    %c0_i32_1 = arith.constant 0 : i32
    return %c0_i32, %c0_i32_0 : i32, i32
  }
  func.func @transform_2(%arg0: i32, %arg1: i32) -> (i32, i32) {
    %c0_i32 = arith.constant 0 : i32
    %c0_i32_0 = arith.constant 0 : i32
    %c0_i32_1 = arith.constant 0 : i32
    return %c0_i32, %c0_i32_0 : i32, i32
  }
  func.func @transform_3(%arg0: i32, %arg1: i32) -> (i32, i32) {
    %c0_i32 = arith.constant 0 : i32
    %c0_i32_0 = arith.constant 0 : i32
    %c0_i32_1 = arith.constant 0 : i32
    return %c0_i32, %c0_i32_0 : i32, i32
  }
  func.func @transform_4(%arg0: i32, %arg1: i32) -> (i32, i32) {
    %c0_i32 = arith.constant 0 : i32
    %c0_i32_0 = arith.constant 0 : i32
    %c0_i32_1 = arith.constant 0 : i32
    return %c0_i32, %c0_i32_0 : i32, i32
  }
  func.func @transform_5(%arg0: i32, %arg1: i32) -> (i32, i32) {
    %c0_i32 = arith.constant 0 : i32
    %c0_i32_0 = arith.constant 0 : i32
    %c0_i32_1 = arith.constant 0 : i32
    return %c0_i32, %c0_i32_0 : i32, i32
  }
  func.func @transform_6(%arg0: i32, %arg1: i32) -> (i32, i32) {
    %c0_i32 = arith.constant 0 : i32
    %c0_i32_0 = arith.constant 0 : i32
    %c0_i32_1 = arith.constant 0 : i32
    return %c0_i32, %c0_i32_0 : i32, i32
  }
  func.func @transform_7(%arg0: i32, %arg1: i32) -> (i32, i32) {
    %c0_i32 = arith.constant 0 : i32
    %c0_i32_0 = arith.constant 0 : i32
    %c0_i32_1 = arith.constant 0 : i32
    return %c0_i32, %c0_i32_0 : i32, i32
  }
  func.func @transform_8(%arg0: i32, %arg1: i32) -> (i32, i32) {
    %c0_i32 = arith.constant 0 : i32
    %c0_i32_0 = arith.constant 0 : i32
    %c0_i32_1 = arith.constant 0 : i32
    return %c0_i32, %c0_i32_0 : i32, i32
  }
  func.func @transform_9(%arg0: i32, %arg1: i32) -> (i32, i32) {
    %c0_i32 = arith.constant 0 : i32
    %c0_i32_0 = arith.constant 0 : i32
    %c0_i32_1 = arith.constant 0 : i32
    return %c0_i32, %c0_i32_0 : i32, i32
  }
  func.func @transform_10(%arg0: i32, %arg1: i32) -> (i32, i32) {
    %c0_i32 = arith.constant 0 : i32
    %c0_i32_0 = arith.constant 0 : i32
    %c0_i32_1 = arith.constant 0 : i32
    return %c0_i32, %c0_i32_0 : i32, i32
  }
  func.func @transform_11(%arg0: i32, %arg1: i32) -> (i32, i32, i32) {
    %c0_i32 = arith.constant 0 : i32
    %c0_i32_0 = arith.constant 0 : i32
    return %arg0, %c0_i32, %arg1 : i32, i32, i32
  }
}

</mosaic_0001>

<bundles_post_ra>
// kernel: tpu_custom_call.1
= control target key start
LH: loop header
LB: loop body
LE: loop exit
PB: predicated region body
PF: predicated region fallthrough
CT: control target
= control target key end

     0   :  { %s6870_s0 = inlined_call_operand.vmem [shape: f32[2,8,3,128], index: 0, kind: input, shape index: {}]   ;;  %s6871_s1 = inlined_call_operand.vmem [shape: bf16[32,3], index: 1, kind: input, shape index: {}]   ;;  %s6872_s2 = inlined_call_operand.vmem [shape: f32[32,1], index: 2, kind: input, shape index: {}]   ;;  %s6873_s3 = inlined_call_operand.vmem [shape: bf16[32,32], index: 3, kind: input, shape index: {}]   ;;  %s6874_s4 = inlined_call_operand.vmem [shape: f32[32,1], index: 4, kind: input, shape index: {}]   ;;  %s6875_s5 = inlined_call_operand.vmem [shape: bf16[64,32], index: 5, kind: input, shape index: {}]   ;;  %s6876_s6 = inlined_call_operand.vmem [shape: f32[64,1], index: 6, kind: input, shape index: {}]   ;;  %s6877_s7 = inlined_call_operand.vmem [shape: bf16[128,64], index: 7, kind: input, shape index: {}]   ;;  %s6878_s8 = inlined_call_operand.vmem [shape: f32[128,1], index: 8, kind: input, shape index: {}]   ;;  %s6879_s9 = inlined_call_operand.vmem [shape: bf16[256,256], index: 9, kind: input, shape index: {}]   ;;  %s6880_s10 = inlined_call_operand.vmem [shape: f32[256,1], index: 10, kind: input, shape index: {}]   ;;  %s6881_s11 = inlined_call_operand.hbm [shape: f32[2,256,128], index: 11, kind: output, shape index: {}]  }
   0x1   :  { %6883 = sst [smem:[#allocation6_spill]] %s6870_s0 }
   0x2   :  { %16 = vsyncpa [#allocation3], 0 }
   0x3   :  { %18 = vsyncpa [#allocation3 + $0x1], 0  ;;  %s5291_s17 = smov 0   ;;  %s5293_s18 = smov 0  }
   0x4   :  { %s5295_s19 = smov 0   ;;  %s5297_s20 = smov 0  }
   0x5   :  { %s5299_s21 = smov 0   ;;  %s5301_s22 = smov 0  }
   0x6 LB: > { %s4095_s23 = sadd.s32 4294967295, %s5224_s22   ;;  %s4096_s24 = sadd.s32 4294967294, %s5224_s22   ;;  %s5224_s22 = sphi %s5301_s22, %s24_s22   ;;  %s5220_s21 = sphi %s5299_s21, %s6914_s21   ;;  %s5216_s20 = sphi %s5297_s20, %s6913_s20   ;;  %s5212_s19 = sphi %s5295_s19, %s6912_s19   ;;  %s5208_s18 = sphi %s5293_s18, %s6911_s18   ;;  %s5204_s17 = sphi %s5291_s17, %s6910_s17  }
   0x7   : > { %s36_s25 = sadd.s32 1, %s5220_s21  ;;  %s283_s26 = sadd.s32 1, %s5212_s19 }
   0x8   : > { %p38_p0 = scmp.ge.s32.totalorder %s36_s25, 2  ;;  %p293_p1 = scmp.ne.s32.totalorder %s5212_s19, %s5208_s18 }
   0x9   : > { %p294_p2 = scmp.eq.s32.totalorder %s4095_s23, 1  ;;  %p299_p3 = scmp.ne.s32.totalorder %s5208_s18, %s5204_s17 }
   0xa   : > { %s6916_s25 = smov (%p38_p0, %s36_s25), 0  ;;  %p300_p5 = scmp.eq.s32.totalorder %s4096_s24, 1 }
   0xb   : > { %p5331_p4 = por %p294_p2, %p293_p1  ;;  %s278_s28 = ssub.s32 %s5220_s21, %s6916_s25 }
   0xc   : > { %p4099_p6 = scmp.ge.s32.totalorder %s5224_s22, 1  ;;  %p281_p7 = scmp.eq.s32.totalorder %s278_s28, 0 }
   0xd   : > { %p5338_p8 = por %p300_p5, %p299_p3  ;;  %p359_p9 = scmp.lt.s32.totalorder %s5224_s22, 3 }
   0xe   : > { %s5344_s30 = scalar_select %p281_p7, %s5212_s19, %s283_s26  }
   0xf   : > { %p360_p10 = pnand %p4099_p6, %p359_p9 }
  0x11   : > { %363 = sbr.rel (%p360_p10) target bundleno = 1381 (0x565), region = 64 }
  0x18   : > { %v440_v0 = vld [vmem:[%s6872_s2 + $0x10] sm:$0xff]  ;;  %v438_v1 = vld [vmem:[%s6872_s2] sm:$0xff]  ;;  %p402_p11 = scmp.lt.s32.totalorder %s5216_s20, 1  ;;  %vm479_vm0 = vcmask 1040384   ;;  %v5226_v2 = vmov 0   ;;  %v441_v3 = vld [vmem:[%s6872_s2 + $0x18] sm:$0xff] }
  0x19   : > { %5081 = vset.pattern.permute.xlu1 %v5226_v2  ;;  %5080 = vset.pattern.permute.xlu0 %v5226_v2  ;;  %v439_v4 = vld [vmem:[%s6872_s2 + $0x8] sm:$0xff]  ;;  %vm480_vm1 = vcmask 1041408   ;;  %v5227_v5 = vmov 65535   ;;  %vm472_vm2 = vcmask 23552   ;;  %v5363_v7 = vld [vmem:[%s6871_s1] sm:$0xff]   ;;  %s6886_s0 = sld [smem:[#allocation6_spill]] }
  0x1a   : > { %454 = vperm.xlu1 %5081, %v440_v0   ;;  %444 = vperm.xlu0 %5080, %v438_v1   ;;  %s403_s28 = scalar_select %p402_p11, %s5216_s20, 1  ;;  %v481_v6 = vsel %vm479_vm0, 4294967295, %v5227_v5  ;;  %v966_v12 = vld [vmem:[%s6874_s4 + $0x8] sm:$0xff]  ;;  %v965_v13 = vld [vmem:[%s6874_s4] sm:$0xff]  ;;  %v968_v25 = vld [vmem:[%s6874_s4 + $0x18] sm:$0xff]  ;;  %vm999_vm3 = vcmask 261120  }
  0x1b   : > { %v5370_v8 = vsel %vm480_vm1, %v481_v6, 0  ;;  %4607 = vmatprep.mubr.msk.bf16.mxu0 %vm472_vm2, %v5363_v7  ;;  %4613 = vmatprep.mubr.msk.bf16.mxu1 %vm472_vm2, %v5363_v7  ;;  %v967_v26 = vld [vmem:[%s6874_s4 + $0x10] sm:$0xff]  ;;  %v5401_v27 = vld [vmem:[%s6871_s1 + $0x8] sm:$0xff]   ;;  %v1468_v31 = vld [vmem:[%s6876_s6] sm:$0xff]  ;;  %vm2344_vm4 = vcmask 523264   ;;  %s399_s26 = sand.u32 1, %s5208_s18  }
  0x1c   : > { %s4291_s14 = sshll.u32 %s403_s28, 5  ;;  %v1469_v30 = vld [vmem:[%s6876_s6 + $0x8] sm:$0xff]  ;;  %v1471_v36 = vld [vmem:[%s6876_s6 + $0x18] sm:$0xff]  ;;  %v1470_v37 = vld [vmem:[%s6876_s6 + $0x10] sm:$0xff]  ;;  %s4292_s12 = sshll.u32 %s5216_s20, 12 }
  0x1d   : > { %v1473_v40 = vld [vmem:[%s6876_s6 + $0x28] sm:$0xff]  ;;  %v1472_v41 = vld [vmem:[%s6876_s6 + $0x20] sm:$0xff]  ;;  %v1475_v44 = vld [vmem:[%s6876_s6 + $0x38] sm:$0xff]  ;;  %s6814_s15 = scalar_lea.hbm %s6881_s11, %s4292_s12  ;;  %s6824_s20 = scalar_lea.sflag [#allocation3], %s399_s26 }
  0x1e   : > { %459 = vperm.xlu1 %5081, %v441_v3   ;;  %449 = vperm.xlu0 %5080, %v439_v4   ;;  %v1474_v45 = vld [vmem:[%s6876_s6 + $0x30] sm:$0xff]  ;;  %v2209_v46 = vld [vmem:[%s6878_s8 + $0x8] sm:$0xff]  ;;  %v2208_v47 = vld [vmem:[%s6878_s8] sm:$0xff]  ;;  %s5228_s24 = smov [#allocation2]  }
  0x1f   : > { %s5368_s23 = scalar_lea.vmem %s6886_s0, %s4291_s14  ;;  %v2211_v48 = vld [vmem:[%s6878_s8 + $0x18] sm:$0xff]  ;;  %v2210_v49 = vld [vmem:[%s6878_s8 + $0x10] sm:$0xff]  ;;  %v2213_v50 = vld [vmem:[%s6878_s8 + $0x28] sm:$0xff] }
  0x20   : > { %v411_v9 = vld [vmem:[%s5368_s23] sm:$0x7]  ;;  %v4103_v10 = vld [vmem:[%s5368_s23 + $0x4] sm:$0x7]  ;;  %v4104_v11 = vld [vmem:[%s5368_s23 + $0x8] sm:$0x7] }
  0x21   : > { %v412_v14 = vpack.c.bf16 %v411_v9, %v411_v9  ;;  %v415_v15 = vpack.c.bf16 %v4103_v10, %v4103_v10  ;;  %v418_v16 = vpack.c.bf16 %v4104_v11, %v4104_v11  ;;  %v4105_v17 = vld [vmem:[%s5368_s23 + $0xc] sm:$0x7]  ;;  %v4106_v19 = vld [vmem:[%s5368_s23 + $0x10] sm:$0x7]  ;;  %v4107_v20 = vld [vmem:[%s5368_s23 + $0x14] sm:$0x7] }
  0x22   : > { %v421_v18 = vpack.c.bf16 %v4105_v17, %v4105_v17  ;;  %976 = vperm.xlu1 %5081, %v966_v12   ;;  %971 = vperm.xlu0 %5080, %v965_v13   ;;  %v424_v28 = vpack.c.bf16 %v4106_v19, %v4106_v19  ;;  %v427_v29 = vpack.c.bf16 %v4107_v20, %v4107_v20  ;;  %v4108_v34 = vld [vmem:[%s5368_s23 + $0x18] sm:$0x7]  ;;  %v4109_v35 = vld [vmem:[%s5368_s23 + $0x1c] sm:$0x7]  ;;  %v2212_v51 = vld [vmem:[%s6878_s8 + $0x20] sm:$0xff]  ;;  %s4100_s23 = sshll.u32 %s399_s26, 8 }
  0x23   : > { %v484_v21 = vand.u32 %v5370_v8, %v412_v14  ;;  %v542_v22 = vand.u32 %v5370_v8, %v415_v15  ;;  %v600_v23 = vand.u32 %v5370_v8, %v418_v16  ;;  %v430_v38 = vpack.c.bf16 %v4108_v34, %v4108_v34  ;;  %v2215_v52 = vld [vmem:[%s6878_s8 + $0x38] sm:$0xff]  ;;  %v2214_v53 = vld [vmem:[%s6878_s8 + $0x30] sm:$0xff]  ;;  %v2217_v54 = vld [vmem:[%s6878_s8 + $0x48] sm:$0xff]  ;;  %s6767_s28 = scalar_lea.vmem [#allocation2], %s4100_s23  ;;  %s5150_s23 = sshll.u32 %s5228_s24, 4  ;;  %s5151_s23 = int_to_ptr.vmem [resolvable:$false] %s5150_s23 }
  0x24   : > { %v658_v24 = vand.u32 %v5370_v8, %v421_v18  ;;  %v716_v32 = vand.u32 %v5370_v8, %v424_v28  ;;  %v774_v33 = vand.u32 %v5370_v8, %v427_v29  ;;  %v433_v39 = vpack.c.bf16 %v4109_v35, %v4109_v35  ;;  %v2216_v55 = vld [vmem:[%s6878_s8 + $0x40] sm:$0xff]  ;;  %v2219_v56 = vld [vmem:[%s6878_s8 + $0x58] sm:$0xff]  ;;  %v2218_v57 = vld [vmem:[%s6878_s8 + $0x50] sm:$0xff]  ;;  %s4017_s13 = sshll.u32 %s6767_s28, 4  ;;  %s5152_s12 = scalar_lea.vmem %s5151_s23, 8192  ;;  %s6816_s13 = int_to_ptr.vmem [resolvable:$true] %s4017_s13 }
  0x25   : > { %4605 = vmatprep.subr.bf16.mxu0 %v484_v21  ;;  %4611 = vmatprep.subr.bf16.mxu1 %v542_v22  ;;  %v832_v42 = vand.u32 %v5370_v8, %v430_v38  ;;  %v2221_v58 = vld [vmem:[%s6878_s8 + $0x68] sm:$0xff]  ;;  %v2220_v59 = vld [vmem:[%s6878_s8 + $0x60] sm:$0xff]  ;;  %v2223_v60 = vld [vmem:[%s6878_s8 + $0x78] sm:$0xff]  ;;  %s5146_s16 = scalar_lea.vmem %s6816_s13, 4096  ;;  %p5153_p1 = scmp.lt.s32.totalorder %s6816_s13, %s5151_s23 }
  0x26   : > { %4606 = vmatpush3.bf16.msra.mxu0 %v484_v21  ;;  %4612 = vmatpush3.bf16.msra.mxu1 %v542_v22  ;;  %v890_v43 = vand.u32 %v5370_v8, %v433_v39  ;;  %v2222_v61 = vld [vmem:[%s6878_s8 + $0x70] sm:$0xff]  ;;  %v3426_v62 = vld [vmem:[%s6880_s10 + $0x8] sm:$0xff]  ;;  %v3425_v63 = vld [vmem:[%s6880_s10] sm:$0xff]  ;;  %p5147_p12 = scmp.ne.s32.totalorder %s6816_s13, %s5146_s16  ;;  %p5154_p2 = scmp.lt.s32.totalorder %s5152_s12, %s5146_s16 }
  0x27   : > { %4617 = vmatprep.subr.bf16.mxu0 %v600_v23  ;;  %4623 = vmatprep.subr.bf16.mxu1 %v658_v24  ;;  %v3428_v0 = vld [vmem:[%s6880_s10 + $0x18] sm:$0xff]  ;;  %v3427_v1 = vld [vmem:[%s6880_s10 + $0x10] sm:$0xff]  ;;  %v3430_v2 = vld [vmem:[%s6880_s10 + $0x28] sm:$0xff] }
  0x28   : > { %986 = vperm.xlu1 %5081, %v968_v25   ;;  %981 = vperm.xlu0 %5080, %v967_v26   ;;  %v3429_v3 = vld [vmem:[%s6880_s10 + $0x20] sm:$0xff]  ;;  %v3432_v4 = vld [vmem:[%s6880_s10 + $0x38] sm:$0xff]  ;;  %v3431_v5 = vld [vmem:[%s6880_s10 + $0x30] sm:$0xff]  ;;  %p5148_p13 = pnand %p5147_p12, %p5331_p4  ;;  %p5155_p3 = por %p5154_p2, %p5153_p1 }
  0x29   : > { %4608 = vmatmul.mubr.msk.bf16.vlgmr.msra.gmra.mrb[0].mxu0 %vm472_vm2, %v5401_v27  ;;  %4614 = vmatmul.mubr.msk.bf16.vlgmr.msra.gmra.mrb[0].mxu1 %vm472_vm2, %v5401_v27  ;;  %v3434_v6 = vld [vmem:[%s6880_s10 + $0x48] sm:$0xff]  ;;  %v3436_v8 = vld [vmem:[%s6880_s10 + $0x58] sm:$0xff]  ;;  %v3435_v9 = vld [vmem:[%s6880_s10 + $0x50] sm:$0xff] }
  0x2a   : > { %4618 = vmatpush3.bf16.msra.mxu0 %v600_v23  ;;  %4624 = vmatpush3.bf16.msra.mxu1 %v658_v24  ;;  %v3438_v10 = vld [vmem:[%s6880_s10 + $0x68] sm:$0xff]  ;;  %v3437_v11 = vld [vmem:[%s6880_s10 + $0x60] sm:$0xff]  ;;  %v3440_v12 = vld [vmem:[%s6880_s10 + $0x78] sm:$0xff]  ;;  %p5149_p0 = pneg %p5148_p13 }
  0x2b   : > { %4619 = vmatprep.mubr.msk.bf16.mxu0 %vm472_vm2, %v5363_v7  ;;  %4625 = vmatprep.mubr.msk.bf16.mxu1 %vm472_vm2, %v5363_v7  ;;  %v3439_v13 = vld [vmem:[%s6880_s10 + $0x70] sm:$0xff]  ;;  %v3442_v14 = vld [vmem:[%s6880_s10 + $0x88] sm:$0xff]  ;;  %v3441_v15 = vld [vmem:[%s6880_s10 + $0x80] sm:$0xff] }
  0x2c   : > { %1483 = vperm.xlu1 %5081, %v1469_v30   ;;  %1478 = vperm.xlu0 %5080, %v1468_v31   ;;  %v3444_v16 = vld [vmem:[%s6880_s10 + $0x98] sm:$0xff]  ;;  %v3443_v17 = vld [vmem:[%s6880_s10 + $0x90] sm:$0xff]  ;;  %v3446_v18 = vld [vmem:[%s6880_s10 + $0xa8] sm:$0xff]  ;;  %p5156_p5 = pnand %p5155_p3, %p5149_p0 }
  0x2d   : > { %4629 = vmatprep.subr.bf16.mxu0 %v716_v32  ;;  %4635 = vmatprep.subr.bf16.mxu1 %v774_v33  ;;  %v3445_v19 = vld [vmem:[%s6880_s10 + $0xa0] sm:$0xff]  ;;  %v3448_v20 = vld [vmem:[%s6880_s10 + $0xb8] sm:$0xff]  ;;  %v3447_v21 = vld [vmem:[%s6880_s10 + $0xb0] sm:$0xff] }
  0x2e   : > { %v3450_v22 = vld [vmem:[%s6880_s10 + $0xc8] sm:$0xff]  ;;  %v3449_v23 = vld [vmem:[%s6880_s10 + $0xc0] sm:$0xff]  ;;  %v3452_v25 = vld [vmem:[%s6880_s10 + $0xd8] sm:$0xff] }
  0x2f   : > { %v5590_v24 = vld [vmem:[%s6873_s3] sm:$0xff]   ;;  %v3451_v26 = vld [vmem:[%s6880_s10 + $0xd0] sm:$0xff]  ;;  %v3456_v29 = vld [vmem:[%s6880_s10 + $0xf8] sm:$0xff] }
  0x30   : > { %1493 = vperm.xlu1 %5081, %v1471_v36   ;;  %1488 = vperm.xlu0 %5080, %v1470_v37   ;;  %v3453_v28 = vld [vmem:[%s6880_s10 + $0xe0] sm:$0xff]  ;;  %v3455_v30 = vld [vmem:[%s6880_s10 + $0xf0] sm:$0xff] }
  0x31   : > { %4620 = vmatmul.mubr.msk.bf16.vlgmr.msra.gmra.mrb[4].mxu0 %vm472_vm2, %v5401_v27  ;;  %4626 = vmatmul.mubr.msk.bf16.vlgmr.msra.gmra.mrb[4].mxu1 %vm472_vm2, %v5401_v27 }
  0x32   : > { %4630 = vmatpush3.bf16.msra.mxu0 %v716_v32  ;;  %4636 = vmatpush3.bf16.msra.mxu1 %v774_v33 }
  0x33   : > { %4631 = vmatprep.mubr.msk.bf16.mxu0 %vm472_vm2, %v5363_v7  ;;  %4637 = vmatprep.mubr.msk.bf16.mxu1 %vm472_vm2, %v5363_v7 }
  0x34   : > { %1503 = vperm.xlu1 %5081, %v1473_v40   ;;  %1498 = vperm.xlu0 %5080, %v1472_v41  }
  0x35   : > { %4641 = vmatprep.subr.bf16.mxu0 %v832_v42  ;;  %4647 = vmatprep.subr.bf16.mxu1 %v890_v43 }
  0x38   : > { %1513 = vperm.xlu1 %5081, %v1475_v44   ;;  %1508 = vperm.xlu0 %5080, %v1474_v45  }
  0x39   : > { %4632 = vmatmul.mubr.msk.bf16.vlgmr.msra.gmra.mrb[8].mxu0 %vm472_vm2, %v5401_v27  ;;  %4638 = vmatmul.mubr.msk.bf16.vlgmr.msra.gmra.mrb[8].mxu1 %vm472_vm2, %v5401_v27 }
  0x3a   : > { %4642 = vmatpush3.bf16.msra.mxu0 %v832_v42  ;;  %4648 = vmatpush3.bf16.msra.mxu1 %v890_v43 }
  0x3b   : > { %4643 = vmatprep.mubr.msk.bf16.mxu0 %vm472_vm2, %v5363_v7  ;;  %4649 = vmatprep.mubr.msk.bf16.mxu1 %vm472_vm2, %v5363_v7  ;;  %v3433_v7 = vld [vmem:[%s6880_s10 + $0x40] sm:$0xff] }
  0x3c   : > { %2231 = vperm.xlu1 %5081, %v2209_v46   ;;  %2226 = vperm.xlu0 %5080, %v2208_v47  }
  0x40   : > { %2241 = vperm.xlu1 %5081, %v2211_v48   ;;  %2236 = vperm.xlu0 %5080, %v2210_v49  }
  0x41   : > { %4644 = vmatmul.mubr.msk.bf16.vlgmr.msra.gmra.mrb[12].mxu0 %vm472_vm2, %v5401_v27  ;;  %4650 = vmatmul.mubr.msk.bf16.vlgmr.msra.gmra.mrb[12].mxu1 %vm472_vm2, %v5401_v27  ;;  %v3454_v27 = vld [vmem:[%s6880_s10 + $0xe8] sm:$0xff] }
  0x42   : > { %4657 = vmatprep.mubr.msk.bf16.mxu0 %vm999_vm3, %v5590_v24  ;;  %4665 = vmatprep.mubr.msk.bf16.mxu1 %vm999_vm3, %v5590_v24 }
  0x44   : > { %2251 = vperm.xlu1 %5081, %v2213_v50   ;;  %2246 = vperm.xlu0 %5080, %v2212_v51  }
  0x48   : > { %2261 = vperm.xlu1 %5081, %v2215_v52   ;;  %2256 = vperm.xlu0 %5080, %v2214_v53  }
  0x4c   : > { %2271 = vperm.xlu1 %5081, %v2217_v54   ;;  %2266 = vperm.xlu0 %5080, %v2216_v55  }
  0x50   : > { %2281 = vperm.xlu1 %5081, %v2219_v56   ;;  %2276 = vperm.xlu0 %5080, %v2218_v57  }
  0x54   : > { %2291 = vperm.xlu1 %5081, %v2221_v58   ;;  %2286 = vperm.xlu0 %5080, %v2220_v59  }
  0x58   : > { %2301 = vperm.xlu1 %5081, %v2223_v60   ;;  %2296 = vperm.xlu0 %5080, %v2222_v61  }
  0x5c   : > { %3464 = vperm.xlu1 %5081, %v3426_v62   ;;  %3459 = vperm.xlu0 %5080, %v3425_v63  }
  0x60   : > { %3474 = vperm.xlu1 %5081, %v3428_v0   ;;  %3469 = vperm.xlu0 %5080, %v3427_v1  }
  0x64   : > { %3484 = vperm.xlu1 %5081, %v3430_v2   ;;  %3479 = vperm.xlu0 %5080, %v3429_v3  }
  0x68   : > { %3494 = vperm.xlu1 %5081, %v3432_v4   ;;  %3489 = vperm.xlu0 %5080, %v3431_v5  }
  0x6c   : > { %3504 = vperm.xlu1 %5081, %v3434_v6   ;;  %3499 = vperm.xlu0 %5080, %v3433_v7  }
  0x70   : > { %3514 = vperm.xlu1 %5081, %v3436_v8   ;;  %3509 = vperm.xlu0 %5080, %v3435_v9  }
  0x74   : > { %3524 = vperm.xlu1 %5081, %v3438_v10   ;;  %3519 = vperm.xlu0 %5080, %v3437_v11  }
  0x78   : > { %3534 = vperm.xlu1 %5081, %v3440_v12   ;;  %3529 = vperm.xlu0 %5080, %v3439_v13  }
  0x7c   : > { %3544 = vperm.xlu1 %5081, %v3442_v14   ;;  %3539 = vperm.xlu0 %5080, %v3441_v15  }
  0x80   : > { %3554 = vperm.xlu1 %5081, %v3444_v16   ;;  %3549 = vperm.xlu0 %5080, %v3443_v17  }
  0x84   : > { %3564 = vperm.xlu1 %5081, %v3446_v18   ;;  %3559 = vperm.xlu0 %5080, %v3445_v19  }
  0x88   : > { %3574 = vperm.xlu1 %5081, %v3448_v20   ;;  %3569 = vperm.xlu0 %5080, %v3447_v21  }
  0x8c   : > { %3584 = vperm.xlu1 %5081, %v3450_v22   ;;  %3579 = vperm.xlu0 %5080, %v3449_v23  }
  0x90   : > { %3594 = vperm.xlu1 %5081, %v3452_v25   ;;  %3589 = vperm.xlu0 %5080, %v3451_v26  }
  0x94   : > { %3604 = vperm.xlu1 %5081, %v3454_v27   ;;  %3599 = vperm.xlu0 %5080, %v3453_v28   ;;  %v5641_v28 = vld [vmem:[%s6873_s3 + $0x8] sm:$0xff]  }
  0x98   : > { %3614 = vperm.xlu1 %5081, %v3456_v29   ;;  %3609 = vperm.xlu0 %5080, %v3455_v30  }
  0x99   : > { %v5614_v31 = vpop.permute.xlu1 %454  ;;  %v5616_v32 = vpop.permute.xlu0 %444 }
  0x9d   : > { %v5618_v33 = vpop.permute.xlu1 %459  ;;  %v5624_v44 = vpop.permute.xlu0 %449 }
  0xfc   : > { %v4609_v34 = vpop.f32.mrb[0].mxu0  ;;  %v4615_v35 = vpop.f32.mrb[0].mxu1 }
  0xfd   : > { %v529_v36 = vadd.f32 %v4609_v34, %v5614_v31  ;;  %v587_v37 = vadd.f32 %v4615_v35, %v5614_v31  ;;  %v520_v38 = vpop.f32.mrb[1].mxu0  ;;  %v578_v39 = vpop.f32.mrb[1].mxu1 }
  0xfe   : > { %v521_v40 = vadd.f32 %v520_v38, %v5616_v32  ;;  %v579_v41 = vadd.f32 %v578_v39, %v5616_v32  ;;  %v4610_v42 = vpop.f32.mrb[2].mxu0  ;;  %v4616_v43 = vpop.f32.mrb[2].mxu1 }
  0xff   : > { %v595_v45 = vmax.f32 %v587_v37, 0.0  ;;  %v532_v46 = vadd.f32 %v4610_v42, %v5618_v33  ;;  %v590_v47 = vadd.f32 %v4616_v43, %v5618_v33  ;;  %v537_v48 = vmax.f32 %v529_v36, 0.0  ;;  %v523_v49 = vpop.f32.mrb[3].mxu0  ;;  %v581_v50 = vpop.f32.mrb[3].mxu1 }
 0x100   : > { %v524_v53 = vadd.f32 %v523_v49, %v5624_v44  ;;  %v582_v54 = vadd.f32 %v581_v50, %v5624_v44  ;;  %v535_v55 = vmax.f32 %v521_v40, 0.0  ;;  %v593_v56 = vmax.f32 %v579_v41, 0.0 }
 0x101   : > { %v538_v51 = vmax.f32 %v532_v46, 0.0  ;;  %v596_v52 = vmax.f32 %v590_v47, 0.0 }
 0x102   : > { %v536_v59 = vmax.f32 %v524_v53, 0.0  ;;  %v594_v60 = vmax.f32 %v582_v54, 0.0 }
 0x103   : > { %v540_v57 = vpack.c.bf16 %v538_v51, %v537_v48  ;;  %v598_v58 = vpack.c.bf16 %v596_v52, %v595_v45 }
 0x104   : > { %v4621_v61 = vpop.f32.mrb[4].mxu0  ;;  %v4627_v62 = vpop.f32.mrb[4].mxu1  ;;  %v539_v0 = vpack.c.bf16 %v536_v59, %v535_v55  ;;  %v597_v1 = vpack.c.bf16 %v594_v60, %v593_v56 }
 0x105   : > { %v948_v63 = vmax.bf16 %v598_v58, %v540_v57  ;;  %v645_v2 = vadd.f32 %v4621_v61, %v5614_v31  ;;  %v636_v3 = vpop.f32.mrb[5].mxu0  ;;  %v694_v4 = vpop.f32.mrb[5].mxu1  ;;  %v703_v5 = vadd.f32 %v4627_v62, %v5614_v31 }
 0x106   : > { %v637_v6 = vadd.f32 %v636_v3, %v5616_v32  ;;  %v695_v7 = vadd.f32 %v694_v4, %v5616_v32  ;;  %v4622_v8 = vpop.f32.mrb[6].mxu0  ;;  %v4628_v9 = vpop.f32.mrb[6].mxu1  ;;  %v947_v10 = vmax.bf16 %v597_v1, %v539_v0  ;;  %4653 = vmatprep.subr.bf16.mxu0 %v539_v0  ;;  %4661 = vmatprep.subr.bf16.mxu1 %v597_v1 }
 0x107   : > { %v648_v11 = vadd.f32 %v4622_v8, %v5618_v33  ;;  %v706_v12 = vadd.f32 %v4628_v9, %v5618_v33  ;;  %v653_v13 = vmax.f32 %v645_v2, 0.0  ;;  %v711_v14 = vmax.f32 %v703_v5, 0.0  ;;  %v639_v15 = vpop.f32.mrb[7].mxu0  ;;  %v697_v16 = vpop.f32.mrb[7].mxu1  ;;  %4654 = vmatpush3.bf16.msra.mxu0 %v539_v0  ;;  %4662 = vmatpush3.bf16.msra.mxu1 %v597_v1 }
 0x108   : > { %v640_v19 = vadd.f32 %v639_v15, %v5624_v44  ;;  %v698_v20 = vadd.f32 %v697_v16, %v5624_v44  ;;  %4655 = vmatprep.subr.bf16.mxu0 %v540_v57  ;;  %4663 = vmatprep.subr.bf16.mxu1 %v598_v58  ;;  %v651_v21 = vmax.f32 %v637_v6, 0.0  ;;  %v709_v22 = vmax.f32 %v695_v7, 0.0 }
 0x109   : > { %v654_v17 = vmax.f32 %v648_v11, 0.0  ;;  %v712_v18 = vmax.f32 %v706_v12, 0.0 }
 0x10a   : > { %v652_v26 = vmax.f32 %v640_v19, 0.0  ;;  %v710_v27 = vmax.f32 %v698_v20, 0.0 }
 0x10b   : > { %v656_v23 = vpack.c.bf16 %v654_v17, %v653_v13  ;;  %v714_v25 = vpack.c.bf16 %v712_v18, %v711_v14  ;;  %4656 = vmatpush3.bf16.msra.mxu0 %v540_v57  ;;  %4664 = vmatpush3.bf16.msra.mxu1 %v598_v58 }
 0x10c   : > { %v4633_v29 = vpop.f32.mrb[8].mxu0  ;;  %v4639_v30 = vpop.f32.mrb[8].mxu1  ;;  %v655_v35 = vpack.c.bf16 %v652_v26, %v651_v21  ;;  %v713_v36 = vpack.c.bf16 %v710_v27, %v709_v22 }
 0x10d   : > { %v950_v34 = vmax.bf16 %v948_v63, %v656_v23  ;;  %v761_v37 = vadd.f32 %v4633_v29, %v5614_v31  ;;  %v752_v38 = vpop.f32.mrb[9].mxu0  ;;  %v810_v39 = vpop.f32.mrb[9].mxu1  ;;  %v819_v40 = vadd.f32 %v4639_v30, %v5614_v31 }
 0x10e   : > { %v753_v41 = vadd.f32 %v752_v38, %v5616_v32  ;;  %v811_v42 = vadd.f32 %v810_v39, %v5616_v32  ;;  %v4634_v43 = vpop.f32.mrb[10].mxu0  ;;  %v4640_v45 = vpop.f32.mrb[10].mxu1  ;;  %v949_v47 = vmax.bf16 %v947_v10, %v655_v35  ;;  %4658 = vmatmul.mubr.msk.bf16.vlgmr.msra.gmra.mrb[16].mxu0 %vm999_vm3, %v5641_v28  ;;  %4666 = vmatmul.mubr.msk.bf16.vlgmr.msra.gmra.mrb[16].mxu1 %vm999_vm3, %v5641_v28 }
 0x10f   : > { %v952_v46 = vmax.bf16 %v950_v34, %v714_v25  ;;  %v764_v48 = vadd.f32 %v4634_v43, %v5618_v33  ;;  %v769_v49 = vmax.f32 %v761_v37, 0.0  ;;  %v822_v50 = vadd.f32 %v4640_v45, %v5618_v33  ;;  %4669 = vmatprep.subr.bf16.mxu0 %v655_v35  ;;  %4677 = vmatprep.subr.bf16.mxu1 %v713_v36  ;;  %v755_v51 = vpop.f32.mrb[11].mxu0  ;;  %v813_v52 = vpop.f32.mrb[11].mxu1 }
 0x110   : > { %v951_v53 = vmax.bf16 %v949_v47, %v713_v36  ;;  %v756_v55 = vadd.f32 %v755_v51, %v5624_v44  ;;  %v814_v56 = vadd.f32 %v813_v52, %v5624_v44  ;;  %4670 = vmatpush3.bf16.msra.mxu0 %v655_v35  ;;  %4678 = vmatpush3.bf16.msra.mxu1 %v713_v36  ;;  %v827_v57 = vmax.f32 %v819_v40, 0.0  ;;  %v5694_v40 = vld [vmem:[%s6875_s5] sm:$0xff]  }
 0x111   : > { %v770_v54 = vmax.f32 %v764_v48, 0.0  ;;  %v767_v58 = vmax.f32 %v753_v41, 0.0  ;;  %v828_v59 = vmax.f32 %v822_v50, 0.0  ;;  %4671 = vmatprep.subr.bf16.mxu0 %v656_v23  ;;  %4679 = vmatprep.subr.bf16.mxu1 %v714_v25  ;;  %v825_v60 = vmax.f32 %v811_v42, 0.0  ;;  %v5702_v41 = vpop.permute.xlu0 %971 }
 0x112   : > { %v768_v62 = vmax.f32 %v756_v55, 0.0  ;;  %v826_v63 = vmax.f32 %v814_v56, 0.0  ;;  %4673 = vmatprep.mubr.msk.bf16.mxu0 %vm999_vm3, %v5590_v24  ;;  %4681 = vmatprep.mubr.msk.bf16.mxu1 %vm999_vm3, %v5590_v24 }
 0x113   : > { %v772_v61 = vpack.c.bf16 %v770_v54, %v769_v49  ;;  %v830_v0 = vpack.c.bf16 %v828_v59, %v827_v57 }
 0x114   : > { %v4645_v1 = vpop.f32.mrb[12].mxu0  ;;  %v4651_v2 = vpop.f32.mrb[12].mxu1  ;;  %v771_v4 = vpack.c.bf16 %v768_v62, %v767_v58  ;;  %v829_v5 = vpack.c.bf16 %v826_v63, %v825_v60  ;;  %4672 = vmatpush3.bf16.msra.mxu0 %v656_v23  ;;  %4680 = vmatpush3.bf16.msra.mxu1 %v714_v25 }
 0x115   : > { %v954_v3 = vmax.bf16 %v952_v46, %v772_v61  ;;  %v868_v6 = vpop.f32.mrb[13].mxu0  ;;  %v926_v7 = vpop.f32.mrb[13].mxu1  ;;  %v877_v8 = vadd.f32 %v4645_v1, %v5614_v31  ;;  %v935_v9 = vadd.f32 %v4651_v2, %v5614_v31 }
 0x116   : > { %v869_v10 = vadd.f32 %v868_v6, %v5616_v32  ;;  %v4646_v11 = vpop.f32.mrb[14].mxu0  ;;  %v4652_v12 = vpop.f32.mrb[14].mxu1  ;;  %v953_v14 = vmax.bf16 %v951_v53, %v771_v4  ;;  %4685 = vmatprep.subr.bf16.mxu0 %v771_v4  ;;  %v927_v19 = vadd.f32 %v926_v7, %v5616_v32  ;;  %4693 = vmatprep.subr.bf16.mxu1 %v829_v5 }
 0x117   : > { %v956_v13 = vmax.bf16 %v954_v3, %v830_v0  ;;  %v880_v15 = vadd.f32 %v4646_v11, %v5618_v33  ;;  %v938_v16 = vadd.f32 %v4652_v12, %v5618_v33  ;;  %v885_v17 = vmax.f32 %v877_v8, 0.0  ;;  %4674 = vmatmul.mubr.msk.bf16.vlgmr.msra.gmra.mrb[20].mxu0 %vm999_vm3, %v5641_v28  ;;  %4682 = vmatmul.mubr.msk.bf16.vlgmr.msra.gmra.mrb[20].mxu1 %vm999_vm3, %v5641_v28  ;;  %v871_v31 = vpop.f32.mrb[15].mxu0  ;;  %v929_v20 = vpop.f32.mrb[15].mxu1 }
 0x118   : > { %v943_v18 = vmax.f32 %v935_v9, 0.0  ;;  %v955_v21 = vmax.bf16 %v953_v14, %v829_v5  ;;  %v872_v25 = vadd.f32 %v871_v31, %v5624_v44  ;;  %4686 = vmatpush3.bf16.msra.mxu0 %v771_v4  ;;  %v930_v33 = vadd.f32 %v929_v20, %v5624_v44  ;;  %4694 = vmatpush3.bf16.msra.mxu1 %v829_v5  ;;  %v5706_v43 = vpop.permute.xlu0 %981 }
 0x119   : > { %v886_v22 = vmax.f32 %v880_v15, 0.0  ;;  %v944_v23 = vmax.f32 %v938_v16, 0.0  ;;  %4687 = vmatprep.subr.bf16.mxu0 %v772_v61  ;;  %v883_v32 = vmax.f32 %v869_v10, 0.0  ;;  %4695 = vmatprep.subr.bf16.mxu1 %v830_v0  ;;  %v941_v30 = vmax.f32 %v927_v19, 0.0 }
 0x11a   : > { %v884_v29 = vmax.f32 %v872_v25, 0.0  ;;  %4689 = vmatprep.mubr.msk.bf16.mxu0 %vm999_vm3, %v5590_v24  ;;  %v942_v34 = vmax.f32 %v930_v33, 0.0  ;;  %4697 = vmatprep.mubr.msk.bf16.mxu1 %vm999_vm3, %v5590_v24 }
 0x11b   : > { %v888_v26 = vpack.c.bf16 %v886_v22, %v885_v17  ;;  %v946_v27 = vpack.c.bf16 %v944_v23, %v943_v18 }
 0x11c   : > { %v887_v36 = vpack.c.bf16 %v884_v29, %v883_v32  ;;  %4688 = vmatpush3.bf16.msra.mxu0 %v772_v61  ;;  %v945_v37 = vpack.c.bf16 %v942_v34, %v941_v30  ;;  %4696 = vmatpush3.bf16.msra.mxu1 %v830_v0  ;;  %v5727_v29 = vld [vmem:[%s6875_s5 + $0x8] sm:$0xff]  }
 0x11d   : > { %v958_v35 = vmax.bf16 %v956_v13, %v888_v26 }
 0x11e   : > { %v957_v44 = vmax.bf16 %v955_v21, %v887_v36  ;;  %4701 = vmatprep.subr.bf16.mxu0 %v887_v36  ;;  %4709 = vmatprep.subr.bf16.mxu1 %v945_v37 }
 0x11f   : > { %v5675_v38 = vmax.bf16 %v958_v35, %v946_v27  ;;  %4690 = vmatmul.mubr.msk.bf16.vlgmr.msra.gmra.mrb[24].mxu0 %vm999_vm3, %v5641_v28  ;;  %4698 = vmatmul.mubr.msk.bf16.vlgmr.msra.gmra.mrb[24].mxu1 %vm999_vm3, %v5641_v28 }
 0x120   : > { %4702 = vmatpush3.bf16.msra.mxu0 %v887_v36  ;;  %v5681_v39 = vmax.bf16 %v957_v44, %v945_v37  ;;  %4710 = vmatpush3.bf16.msra.mxu1 %v945_v37 }
 0x121   : > { %4703 = vmatprep.subr.bf16.mxu0 %v888_v26  ;;  %4711 = vmatprep.subr.bf16.mxu1 %v946_v27 }
 0x122   : > { %4705 = vmatprep.mubr.msk.bf16.mxu0 %vm999_vm3, %v5590_v24  ;;  %4713 = vmatprep.mubr.msk.bf16.mxu1 %vm999_vm3, %v5590_v24  ;;  %v5700_v24 = vpop.permute.xlu1 %976 }
 0x124   : > { %4704 = vmatpush3.bf16.msra.mxu0 %v888_v26  ;;  %4712 = vmatpush3.bf16.msra.mxu1 %v946_v27 }
 0x126   : > { %v5704_v42 = vpop.permute.xlu1 %986 }
 0x127   : > { %4706 = vmatmul.mubr.msk.bf16.vlgmr.msra.gmra.mrb[28].mxu0 %vm999_vm3, %v5641_v28  ;;  %4714 = vmatmul.mubr.msk.bf16.vlgmr.msra.gmra.mrb[28].mxu1 %vm999_vm3, %v5641_v28 }
 0x128   : > { %4721 = vmatprep.mubr.msk.bf16.mxu0 %vm999_vm3, %v5694_v40  ;;  %4733 = vmatprep.mubr.msk.bf16.mxu1 %vm999_vm3, %v5694_v40 }
 0x1e1   : > { %v4659_v28 = vpop.f32.mrb[16].mxu0  ;;  %v4667_v45 = vpop.f32.mrb[16].mxu1 }
 0x1e2   : > { %v1049_v46 = vadd.f32 %v4659_v28, %v5706_v43  ;;  %v1104_v47 = vadd.f32 %v4667_v45, %v5706_v43  ;;  %v1040_v48 = vpop.f32.mrb[17].mxu0  ;;  %v1095_v49 = vpop.f32.mrb[17].mxu1 }
 0x1e3   : > { %v1041_v50 = vadd.f32 %v1040_v48, %v5702_v41  ;;  %v1096_v51 = vadd.f32 %v1095_v49, %v5702_v41  ;;  %v4660_v52 = vpop.f32.mrb[18].mxu0  ;;  %v4668_v53 = vpop.f32.mrb[18].mxu1 }
 0x1e4   : > { %v1052_v54 = vadd.f32 %v4660_v52, %v5704_v42  ;;  %v1107_v55 = vadd.f32 %v4668_v53, %v5704_v42  ;;  %v1043_v56 = vpop.f32.mrb[19].mxu0  ;;  %v1098_v57 = vpop.f32.mrb[19].mxu1  ;;  %v1057_v60 = vmax.f32 %v1049_v46, 0.0  ;;  %v1112_v61 = vmax.f32 %v1104_v47, 0.0 }
 0x1e5   : > { %v1044_v58 = vadd.f32 %v1043_v56, %v5700_v24  ;;  %v1099_v59 = vadd.f32 %v1098_v57, %v5700_v24  ;;  %v1055_v0 = vmax.f32 %v1041_v50, 0.0  ;;  %v1110_v1 = vmax.f32 %v1096_v51, 0.0  ;;  %v5737_v51 = vld [vmem:[%s6875_s5 + $0x10] sm:$0xff]  }
 0x1e6   : > { %v1058_v62 = vmax.f32 %v1052_v54, 0.0  ;;  %v1113_v63 = vmax.f32 %v1107_v55, 0.0 }
 0x1e7   : > { %v1056_v2 = vmax.f32 %v1044_v58, 0.0  ;;  %v1111_v3 = vmax.f32 %v1099_v59, 0.0 }
 0x1e8   : > { %v1060_v4 = vpack.c.bf16 %v1058_v62, %v1057_v60  ;;  %v1115_v5 = vpack.c.bf16 %v1113_v63, %v1112_v61 }
 0x1e9   : > { %v1059_v6 = vpack.c.bf16 %v1056_v2, %v1055_v0  ;;  %v1114_v7 = vpack.c.bf16 %v1111_v3, %v1110_v1 }
 0x1ea   : > { %v1447_v8 = vmax.bf16 %v1115_v5, %v1060_v4  ;;  %v4675_v9 = vpop.f32.mrb[20].mxu0  ;;  %v4683_v10 = vpop.f32.mrb[20].mxu1 }
 0x1eb   : > { %v1446_v11 = vmax.bf16 %v1114_v7, %v1059_v6  ;;  %v1159_v12 = vadd.f32 %v4675_v9, %v5706_v43  ;;  %v1214_v13 = vadd.f32 %v4683_v10, %v5706_v43  ;;  %v1150_v14 = vpop.f32.mrb[21].mxu0  ;;  %v1205_v15 = vpop.f32.mrb[21].mxu1  ;;  %4717 = vmatprep.subr.bf16.mxu0 %v1059_v6  ;;  %4729 = vmatprep.subr.bf16.mxu1 %v1114_v7 }
 0x1ec   : > { %v1151_v16 = vadd.f32 %v1150_v14, %v5702_v41  ;;  %v1206_v17 = vadd.f32 %v1205_v15, %v5702_v41  ;;  %v4676_v18 = vpop.f32.mrb[22].mxu0  ;;  %v4684_v19 = vpop.f32.mrb[22].mxu1  ;;  %4718 = vmatpush3.bf16.msra.mxu0 %v1059_v6  ;;  %4730 = vmatpush3.bf16.msra.mxu1 %v1114_v7 }
 0x1ed   : > { %v1162_v31 = vadd.f32 %v4676_v18, %v5704_v42  ;;  %v1217_v20 = vadd.f32 %v4684_v19, %v5704_v42  ;;  %v1153_v21 = vpop.f32.mrb[23].mxu0  ;;  %v1208_v22 = vpop.f32.mrb[23].mxu1  ;;  %4719 = vmatprep.subr.bf16.mxu0 %v1060_v4  ;;  %4731 = vmatprep.subr.bf16.mxu1 %v1115_v5  ;;  %v1167_v33 = vmax.f32 %v1159_v12, 0.0  ;;  %v1222_v32 = vmax.f32 %v1214_v13, 0.0 }
 0x1ee   : > { %v1154_v23 = vadd.f32 %v1153_v21, %v5700_v24  ;;  %v1209_v25 = vadd.f32 %v1208_v22, %v5700_v24  ;;  %v1165_v30 = vmax.f32 %v1151_v16, 0.0  ;;  %v1220_v34 = vmax.f32 %v1206_v17, 0.0 }
 0x1ef   : > { %v1168_v26 = vmax.f32 %v1162_v31, 0.0  ;;  %v1223_v27 = vmax.f32 %v1217_v20, 0.0 }
 0x1f0   : > { %v1166_v35 = vmax.f32 %v1154_v23, 0.0  ;;  %v1221_v36 = vmax.f32 %v1209_v25, 0.0  ;;  %4720 = vmatpush3.bf16.msra.mxu0 %v1060_v4  ;;  %4732 = vmatpush3.bf16.msra.mxu1 %v1115_v5  ;;  %v5753_v5 = vld [vmem:[%s6875_s5 + $0x18] sm:$0xff]  }
 0x1f1   : > { %v1170_v37 = vpack.c.bf16 %v1168_v26, %v1167_v33  ;;  %v1225_v44 = vpack.c.bf16 %v1223_v27, %v1222_v32 }
 0x1f2   : > { %v1169_v28 = vpack.c.bf16 %v1166_v35, %v1165_v30  ;;  %v1224_v45 = vpack.c.bf16 %v1221_v36, %v1220_v34  ;;  %v4691_v46 = vpop.f32.mrb[24].mxu0  ;;  %v4699_v49 = vpop.f32.mrb[24].mxu1 }
 0x1f3   : > { %v1449_v47 = vmax.bf16 %v1447_v8, %v1170_v37  ;;  %v1269_v48 = vadd.f32 %v4691_v46, %v5706_v43  ;;  %v1260_v50 = vpop.f32.mrb[25].mxu0  ;;  %4722 = vmatmul.mubr.msk.bf16.vlgmr.msra.gmra.mrb[32].mxu0 %vm999_vm3, %v5727_v29  ;;  %4734 = vmatmul.mubr.msk.bf16.vlgmr.msra.gmra.mrb[32].mxu1 %vm999_vm3, %v5727_v29  ;;  %v1324_v53 = vadd.f32 %v4699_v49, %v5706_v43  ;;  %v1315_v55 = vpop.f32.mrb[25].mxu1 }
 0x1f4   : > { %v1448_v52 = vmax.bf16 %v1446_v11, %v1169_v28  ;;  %v1261_v54 = vadd.f32 %v1260_v50, %v5702_v41  ;;  %v4692_v56 = vpop.f32.mrb[26].mxu0  ;;  %4741 = vmatprep.subr.bf16.mxu0 %v1169_v28  ;;  %4753 = vmatprep.subr.bf16.mxu1 %v1224_v45  ;;  %v1316_v58 = vadd.f32 %v1315_v55, %v5702_v41  ;;  %v4700_v60 = vpop.f32.mrb[26].mxu1 }
 0x1f5   : > { %v1451_v57 = vmax.bf16 %v1449_v47, %v1225_v44  ;;  %v1272_v59 = vadd.f32 %v4692_v56, %v5704_v42  ;;  %v1263_v61 = vpop.f32.mrb[27].mxu0  ;;  %4742 = vmatpush3.bf16.msra.mxu0 %v1169_v28  ;;  %4754 = vmatpush3.bf16.msra.mxu1 %v1224_v45  ;;  %v1327_v63 = vadd.f32 %v4700_v60, %v5704_v42  ;;  %v1318_v0 = vpop.f32.mrb[27].mxu1  ;;  %v1277_v1 = vmax.f32 %v1269_v48, 0.0 }
 0x1f6   : > { %v1450_v62 = vmax.bf16 %v1448_v52, %v1224_v45  ;;  %4743 = vmatprep.subr.bf16.mxu0 %v1170_v37  ;;  %4755 = vmatprep.subr.bf16.mxu1 %v1225_v44  ;;  %v1264_v3 = vadd.f32 %v1263_v61, %v5700_v24  ;;  %v1319_v4 = vadd.f32 %v1318_v0, %v5700_v24  ;;  %v1332_v6 = vmax.f32 %v1324_v53, 0.0 }
 0x1f7   : > { %v1278_v2 = vmax.f32 %v1272_v59, 0.0  ;;  %4725 = vmatprep.mubr.msk.bf16.mxu0 %vm999_vm3, %v5737_v51  ;;  %4737 = vmatprep.mubr.msk.bf16.mxu1 %vm999_vm3, %v5737_v51  ;;  %v1275_v7 = vmax.f32 %v1261_v54, 0.0  ;;  %v1333_v8 = vmax.f32 %v1327_v63, 0.0  ;;  %v1330_v9 = vmax.f32 %v1316_v58, 0.0 }
 0x1f8   : > { %v1276_v11 = vmax.f32 %v1264_v3, 0.0  ;;  %v1331_v12 = vmax.f32 %v1319_v4, 0.0 }
 0x1f9   : > { %v1280_v10 = vpack.c.bf16 %v1278_v2, %v1277_v1  ;;  %4744 = vmatpush3.bf16.msra.mxu0 %v1170_v37  ;;  %4756 = vmatpush3.bf16.msra.mxu1 %v1225_v44  ;;  %v1335_v13 = vpack.c.bf16 %v1333_v8, %v1332_v6 }
 0x1fa   : > { %v4707_v14 = vpop.f32.mrb[28].mxu0  ;;  %v1279_v16 = vpack.c.bf16 %v1276_v11, %v1275_v7  ;;  %v1334_v17 = vpack.c.bf16 %v1331_v12, %v1330_v9  ;;  %v4715_v18 = vpop.f32.mrb[28].mxu1 }
 0x1fb   : > { %v1453_v15 = vmax.bf16 %v1451_v57, %v1280_v10  ;;  %v1370_v19 = vpop.f32.mrb[29].mxu0  ;;  %4726 = vmatmul.mubr.msk.bf16.gmra.mrb[36].mxu0 %vm999_vm3, %v5753_v5  ;;  %v1379_v31 = vadd.f32 %v4707_v14, %v5706_v43  ;;  %v1434_v20 = vadd.f32 %v4715_v18, %v5706_v43  ;;  %v1425_v22 = vpop.f32.mrb[29].mxu1  ;;  %4738 = vmatmul.mubr.msk.bf16.gmra.mrb[36].mxu1 %vm999_vm3, %v5753_v5 }
 0x1fc   : > { %v1371_v21 = vadd.f32 %v1370_v19, %v5702_v41  ;;  %v4708_v23 = vpop.f32.mrb[30].mxu0  ;;  %4745 = vmatprep.mubr.msk.bf16.mxu0 %vm999_vm3, %v5694_v40  ;;  %v1452_v33 = vmax.bf16 %v1450_v62, %v1279_v16  ;;  %v1426_v32 = vadd.f32 %v1425_v22, %v5702_v41  ;;  %v4716_v26 = vpop.f32.mrb[30].mxu1  ;;  %4765 = vmatprep.subr.bf16.mxu0 %v1279_v16 }
 0x1fd   : > { %v1455_v25 = vmax.bf16 %v1453_v15, %v1335_v13  ;;  %4777 = vmatprep.subr.bf16.mxu1 %v1334_v17  ;;  %v1373_v27 = vpop.f32.mrb[31].mxu0  ;;  %v1382_v43 = vadd.f32 %v4708_v23, %v5704_v42  ;;  %v1437_v30 = vadd.f32 %v4716_v26, %v5704_v42  ;;  %v1428_v34 = vpop.f32.mrb[31].mxu1  ;;  %4757 = vmatprep.mubr.msk.bf16.mxu1 %vm999_vm3, %v5694_v40  ;;  %v1387_v44 = vmax.f32 %v1379_v31, 0.0 }
 0x1fe   : > { %v1454_v35 = vmax.bf16 %v1452_v33, %v1334_v17  ;;  %v1374_v36 = vadd.f32 %v1373_v27, %v5700_v24  ;;  %v1429_v37 = vadd.f32 %v1428_v34, %v5700_v24  ;;  %v1442_v28 = vmax.f32 %v1434_v20, 0.0 }
 0x1ff   : > { %v1388_v41 = vmax.f32 %v1382_v43, 0.0  ;;  %v1443_v45 = vmax.f32 %v1437_v30, 0.0  ;;  %v1385_v46 = vmax.f32 %v1371_v21, 0.0  ;;  %v1440_v47 = vmax.f32 %v1426_v32, 0.0 }
 0x200   : > { %v1386_v48 = vmax.f32 %v1374_v36, 0.0  ;;  %v1441_v49 = vmax.f32 %v1429_v37, 0.0 }
 0x201   : > { %v1390_v50 = vpack.c.bf16 %v1388_v41, %v1387_v44  ;;  %v1445_v52 = vpack.c.bf16 %v1443_v45, %v1442_v28 }
 0x202   : > { %v1389_v42 = vpack.c.bf16 %v1386_v48, %v1385_v46  ;;  %v1444_v53 = vpack.c.bf16 %v1441_v49, %v1440_v47 }
 0x203   : > { %4746 = vmatmul.mubr.msk.bf16.vlgmr.msra.gmra.mrb[40].mxu0 %vm999_vm3, %v5727_v29  ;;  %v1457_v54 = vmax.bf16 %v1455_v25, %v1390_v50  ;;  %4758 = vmatmul.mubr.msk.bf16.vlgmr.msra.gmra.mrb[40].mxu1 %vm999_vm3, %v5727_v29 }
 0x204   : > { %4766 = vmatpush3.bf16.msra.mxu0 %v1279_v16  ;;  %v1456_v24 = vmax.bf16 %v1454_v35, %v1389_v42  ;;  %4778 = vmatpush3.bf16.msra.mxu1 %v1334_v17 }
 0x205   : > { %4767 = vmatprep.subr.bf16.mxu0 %v1280_v10  ;;  %4779 = vmatprep.subr.bf16.mxu1 %v1335_v13  ;;  %v5777_v55 = vmax.bf16 %v1457_v54, %v1445_v52 }
 0x206   : > { %4749 = vmatprep.mubr.msk.bf16.mxu0 %vm999_vm3, %v5737_v51  ;;  %4761 = vmatprep.mubr.msk.bf16.mxu1 %vm999_vm3, %v5737_v51  ;;  %v5781_v56 = vmax.bf16 %v1456_v24, %v1444_v53 }
 0x208   : > { %4768 = vmatpush3.bf16.msra.mxu0 %v1280_v10  ;;  %4780 = vmatpush3.bf16.msra.mxu1 %v1335_v13 }
 0x209   : > { %4789 = vmatprep.subr.bf16.mxu0 %v1389_v42  ;;  %4801 = vmatprep.subr.bf16.mxu1 %v1444_v53 }
 0x20b   : > { %4750 = vmatmul.mubr.msk.bf16.gmra.mrb[44].mxu0 %vm999_vm3, %v5753_v5  ;;  %4762 = vmatmul.mubr.msk.bf16.gmra.mrb[44].mxu1 %vm999_vm3, %v5753_v5 }
 0x20c   : > { %4769 = vmatprep.mubr.msk.bf16.mxu0 %vm999_vm3, %v5694_v40  ;;  %4781 = vmatprep.mubr.msk.bf16.mxu1 %vm999_vm3, %v5694_v40 }
 0x213   : > { %4770 = vmatmul.mubr.msk.bf16.vlgmr.msra.gmra.mrb[48].mxu0 %vm999_vm3, %v5727_v29  ;;  %4782 = vmatmul.mubr.msk.bf16.vlgmr.msra.gmra.mrb[48].mxu1 %vm999_vm3, %v5727_v29 }
 0x214   : > { %4790 = vmatpush3.bf16.msra.mxu0 %v1389_v42  ;;  %4802 = vmatpush3.bf16.msra.mxu1 %v1444_v53 }
 0x215   : > { %4791 = vmatprep.subr.bf16.mxu0 %v1390_v50  ;;  %4803 = vmatprep.subr.bf16.mxu1 %v1445_v52 }
 0x216   : > { %4773 = vmatprep.mubr.msk.bf16.mxu0 %vm999_vm3, %v5737_v51  ;;  %4785 = vmatprep.mubr.msk.bf16.mxu1 %vm999_vm3, %v5737_v51 }
 0x218   : > { %4792 = vmatpush3.bf16.msra.mxu0 %v1390_v50  ;;  %4804 = vmatpush3.bf16.msra.mxu1 %v1445_v52 }
 0x21b   : > { %4774 = vmatmul.mubr.msk.bf16.gmra.mrb[52].mxu0 %vm999_vm3, %v5753_v5  ;;  %4786 = vmatmul.mubr.msk.bf16.gmra.mrb[52].mxu1 %vm999_vm3, %v5753_v5 }
 0x21c   : > { %4793 = vmatprep.mubr.msk.bf16.mxu0 %vm999_vm3, %v5694_v40  ;;  %4805 = vmatprep.mubr.msk.bf16.mxu1 %vm999_vm3, %v5694_v40  ;;  %v5822_v40 = vld [vmem:[%s6877_s7] sm:$0xff]  }
 0x223   : > { %4794 = vmatmul.mubr.msk.bf16.vlgmr.msra.gmra.mrb[56].mxu0 %vm999_vm3, %v5727_v29  ;;  %4806 = vmatmul.mubr.msk.bf16.vlgmr.msra.gmra.mrb[56].mxu1 %vm999_vm3, %v5727_v29  ;;  %v5828_v29 = vpop.permute.xlu1 %1483 }
 0x224   : > { %4797 = vmatprep.mubr.msk.bf16.mxu0 %vm999_vm3, %v5737_v51  ;;  %4809 = vmatprep.mubr.msk.bf16.mxu1 %vm999_vm3, %v5737_v51  ;;  %v5830_v51 = vpop.permute.xlu0 %1478 }
 0x227   : > { %v5832_v57 = vpop.permute.xlu1 %1493 }
 0x228   : > { %v5834_v58 = vpop.permute.xlu0 %1488 }
 0x22b   : > { %4798 = vmatmul.mubr.msk.bf16.gmra.mrb[60].mxu0 %vm999_vm3, %v5753_v5  ;;  %4810 = vmatmul.mubr.msk.bf16.gmra.mrb[60].mxu1 %vm999_vm3, %v5753_v5  ;;  %v5836_v59 = vpop.permute.xlu1 %1503 }
 0x22c   : > { %4821 = vmatprep.mubr.msk.bf16.mxu0 %vm2344_vm4, %v5822_v40  ;;  %4845 = vmatprep.mubr.msk.bf16.mxu1 %vm2344_vm4, %v5822_v40  ;;  %v5838_v60 = vpop.permute.xlu0 %1498 }
 0x22f   : > { %v5848_v20 = vpop.permute.xlu1 %1513 }
 0x230   : > { %v5854_v23 = vpop.permute.xlu0 %1508 }
 0x2c6   : > { %v4723_v61 = vpop.f32.mrb[32].mxu0  ;;  %v4735_v62 = vpop.f32.mrb[32].mxu1 }
 0x2c7   : > { %v1591_v63 = vadd.f32 %v4723_v61, %v5834_v58  ;;  %v1668_v0 = vadd.f32 %v4735_v62, %v5834_v58  ;;  %v1582_v1 = vpop.f32.mrb[33].mxu0  ;;  %v1659_v2 = vpop.f32.mrb[33].mxu1 }
 0x2c8   : > { %v1583_v3 = vadd.f32 %v1582_v1, %v5830_v51  ;;  %v1660_v4 = vadd.f32 %v1659_v2, %v5830_v51  ;;  %v4724_v5 = vpop.f32.mrb[34].mxu0  ;;  %v4736_v6 = vpop.f32.mrb[34].mxu1 }
 0x2c9   : > { %v1594_v7 = vadd.f32 %v4724_v5, %v5832_v57  ;;  %v1671_v8 = vadd.f32 %v4736_v6, %v5832_v57  ;;  %v1585_v9 = vpop.f32.mrb[35].mxu0  ;;  %v1662_v10 = vpop.f32.mrb[35].mxu1  ;;  %v1615_v13 = vmax.f32 %v1591_v63, 0.0  ;;  %v1692_v14 = vmax.f32 %v1668_v0, 0.0 }
 0x2ca   : > { %v1586_v11 = vadd.f32 %v1585_v9, %v5828_v29  ;;  %v1663_v12 = vadd.f32 %v1662_v10, %v5828_v29  ;;  %v1613_v17 = vmax.f32 %v1583_v3, 0.0  ;;  %v1690_v18 = vmax.f32 %v1660_v4, 0.0 }
 0x2cb   : > { %v1616_v15 = vmax.f32 %v1594_v7, 0.0  ;;  %v1693_v16 = vmax.f32 %v1671_v8, 0.0 }
 0x2cc   : > { %v1614_v19 = vmax.f32 %v1586_v11, 0.0  ;;  %v1691_v31 = vmax.f32 %v1663_v12, 0.0 }
 0x2cd   : > { %v5850_v21 = vpack.c.bf16 %v1616_v15, %v1615_v13  ;;  %v5852_v22 = vpack.c.bf16 %v1693_v16, %v1692_v14 }
 0x2ce   : > { %v5856_v25 = vpack.c.bf16 %v1614_v19, %v1613_v17  ;;  %v5858_v33 = vpack.c.bf16 %v1691_v31, %v1690_v18  ;;  %v4727_v32 = vpop.f32.mrb[36].mxu0  ;;  %v4739_v43 = vpop.f32.mrb[36].mxu1 }
 0x2cf   : > { %v2165_v26 = vmax.bf16 %v5852_v22, %v5850_v21  ;;  %v1607_v27 = vadd.f32 %v4727_v32, %v5854_v23  ;;  %v1598_v30 = vpop.f32.mrb[37].mxu0  ;;  %v1684_v35 = vadd.f32 %v4739_v43, %v5854_v23  ;;  %v1675_v37 = vpop.f32.mrb[37].mxu1 }
 0x2d0   : > { %v2164_v34 = vmax.bf16 %v5858_v33, %v5856_v25  ;;  %v1599_v36 = vadd.f32 %v1598_v30, %v5838_v60  ;;  %v4728_v44 = vpop.f32.mrb[38].mxu0  ;;  %4813 = vmatprep.subr.bf16.mxu0 %v5856_v25  ;;  %4837 = vmatprep.subr.bf16.mxu1 %v5858_v33  ;;  %v1676_v28 = vadd.f32 %v1675_v37, %v5838_v60  ;;  %v4740_v45 = vpop.f32.mrb[38].mxu1 }
 0x2d1   : > { %v1610_v41 = vadd.f32 %v4728_v44, %v5848_v20  ;;  %v1601_v46 = vpop.f32.mrb[39].mxu0  ;;  %4814 = vmatpush3.bf16.msra.mxu0 %v5856_v25  ;;  %4838 = vmatpush3.bf16.msra.mxu1 %v5858_v33  ;;  %v1687_v47 = vadd.f32 %v4740_v45, %v5848_v20  ;;  %v1678_v49 = vpop.f32.mrb[39].mxu1  ;;  %v1619_v50 = vmax.f32 %v1607_v27, 0.0  ;;  %v1696_v53 = vmax.f32 %v1684_v35, 0.0  ;;  %v5909_v44 = vld [vmem:[%s6877_s7 + $0x8] sm:$0xff]  }
 0x2d2   : > { %v1602_v48 = vadd.f32 %v1601_v46, %v5836_v59  ;;  %4815 = vmatprep.subr.bf16.mxu0 %v5850_v21  ;;  %4839 = vmatprep.subr.bf16.mxu1 %v5852_v22  ;;  %v1679_v42 = vadd.f32 %v1678_v49, %v5836_v59  ;;  %v1617_v54 = vmax.f32 %v1599_v36, 0.0  ;;  %v1694_v62 = vmax.f32 %v1676_v28, 0.0 }
 0x2d3   : > { %v1620_v52 = vmax.f32 %v1610_v41, 0.0  ;;  %v1697_v24 = vmax.f32 %v1687_v47, 0.0 }
 0x2d4   : > { %v1618_v61 = vmax.f32 %v1602_v48, 0.0  ;;  %v1695_v0 = vmax.f32 %v1679_v42, 0.0 }
 0x2d5   : > { %v5878_v63 = vpack.c.bf16 %v1620_v52, %v1619_v50  ;;  %4816 = vmatpush3.bf16.msra.mxu0 %v5850_v21  ;;  %4840 = vmatpush3.bf16.msra.mxu1 %v5852_v22  ;;  %v5882_v1 = vpack.c.bf16 %v1697_v24, %v1696_v53  ;;  %v5935_v21 = vld [vmem:[%s6877_s7 + $0x10] sm:$0xff]  }
 0x2d6   : > { %v5884_v2 = vpack.c.bf16 %v1618_v61, %v1617_v54  ;;  %v4747_v3 = vpop.f32.mrb[40].mxu0  ;;  %v5886_v4 = vpack.c.bf16 %v1695_v0, %v1694_v62  ;;  %v4759_v6 = vpop.f32.mrb[40].mxu1 }
 0x2d7   : > { %v1745_v5 = vadd.f32 %v4747_v3, %v5834_v58  ;;  %v1736_v7 = vpop.f32.mrb[41].mxu0  ;;  %v2167_v8 = vmax.bf16 %v5882_v1, %v5878_v63  ;;  %v1822_v9 = vadd.f32 %v4759_v6, %v5834_v58  ;;  %v1813_v11 = vpop.f32.mrb[41].mxu1 }
 0x2d8   : > { %v1737_v10 = vadd.f32 %v1736_v7, %v5830_v51  ;;  %v4748_v12 = vpop.f32.mrb[42].mxu0  ;;  %4817 = vmatprep.subr.bf16.mxu0 %v5884_v2  ;;  %v2166_v13 = vmax.bf16 %v5886_v4, %v5884_v2  ;;  %v1814_v14 = vadd.f32 %v1813_v11, %v5830_v51  ;;  %v4760_v16 = vpop.f32.mrb[42].mxu1  ;;  %4841 = vmatprep.subr.bf16.mxu1 %v5886_v4 }
 0x2d9   : > { %v1748_v15 = vadd.f32 %v4748_v12, %v5832_v57  ;;  %v1739_v17 = vpop.f32.mrb[43].mxu0  ;;  %4818 = vmatpush3.bf16.msra.mxu0 %v5884_v2  ;;  %v1825_v18 = vadd.f32 %v4760_v16, %v5832_v57  ;;  %v1816_v31 = vpop.f32.mrb[43].mxu1  ;;  %4842 = vmatpush3.bf16.msra.mxu1 %v5886_v4  ;;  %v1769_v32 = vmax.f32 %v1745_v5, 0.0  ;;  %v1846_v30 = vmax.f32 %v1822_v9, 0.0  ;;  %v5958_v16 = vld [vmem:[%s6877_s7 + $0x18] sm:$0xff]  }
 0x2da   : > { %v1740_v19 = vadd.f32 %v1739_v17, %v5828_v29  ;;  %4819 = vmatprep.subr.bf16.mxu0 %v5878_v63  ;;  %v1817_v43 = vadd.f32 %v1816_v31, %v5828_v29  ;;  %4843 = vmatprep.subr.bf16.mxu1 %v5882_v1  ;;  %v1767_v35 = vmax.f32 %v1737_v10, 0.0  ;;  %v1844_v28 = vmax.f32 %v1814_v14, 0.0 }
 0x2db   : > { %v1770_v27 = vmax.f32 %v1748_v15, 0.0  ;;  %v1847_v36 = vmax.f32 %v1825_v18, 0.0 }
 0x2dc   : > { %v1768_v37 = vmax.f32 %v1740_v19, 0.0  ;;  %v1845_v45 = vmax.f32 %v1817_v43, 0.0 }
 0x2dd   : > { %v1776_v41 = vpack.c.bf16 %v1770_v27, %v1769_v32  ;;  %4820 = vmatpush3.bf16.msra.mxu0 %v5878_v63  ;;  %v5912_v46 = vpack.c.bf16 %v1847_v36, %v1846_v30  ;;  %4844 = vmatpush3.bf16.msra.mxu1 %v5882_v1  ;;  %v5978_v63 = vld [vmem:[%s6877_s7 + $0x20] sm:$0xff]  }
 0x2de   : > { %v1775_v47 = vpack.c.bf16 %v1768_v37, %v1767_v35  ;;  %v4751_v48 = vpop.f32.mrb[44].mxu0  ;;  %v5920_v50 = vpack.c.bf16 %v1845_v45, %v1844_v28  ;;  %v4763_v42 = vpop.f32.mrb[44].mxu1 }
 0x2df   : > { %v5918_v49 = vmax.bf16 %v2165_v26, %v1776_v41  ;;  %v1761_v52 = vadd.f32 %v4751_v48, %v5854_v23  ;;  %v1752_v53 = vpop.f32.mrb[45].mxu0  ;;  %v1838_v24 = vadd.f32 %v4763_v42, %v5854_v23  ;;  %v1829_v62 = vpop.f32.mrb[45].mxu1 }
 0x2e0   : > { %v5926_v54 = vmax.bf16 %v2164_v34, %v1775_v47  ;;  %v1753_v61 = vadd.f32 %v1752_v53, %v5838_v60  ;;  %v4752_v0 = vpop.f32.mrb[46].mxu0  ;;  %4822 = vmatmul.mubr.msk.bf16.vlgmr.msra.gmra.mrb[64].mxu0 %vm2344_vm4, %v5909_v44  ;;  %4861 = vmatprep.subr.bf16.mxu0 %v1775_v47  ;;  %v1830_v25 = vadd.f32 %v1829_v62, %v5838_v60  ;;  %v4764_v26 = vpop.f32.mrb[46].mxu1 }
 0x2e1   : > { %v2173_v22 = vmax.bf16 %v5918_v49, %v5912_v46  ;;  %v1764_v33 = vadd.f32 %v4752_v0, %v5848_v20  ;;  %4846 = vmatmul.mubr.msk.bf16.vlgmr.msra.gmra.mrb[64].mxu1 %vm2344_vm4, %v5909_v44  ;;  %4885 = vmatprep.subr.bf16.mxu1 %v5920_v50  ;;  %v1755_v34 = vpop.f32.mrb[47].mxu0  ;;  %v1841_v5 = vadd.f32 %v4764_v26, %v5848_v20  ;;  %v1832_v6 = vpop.f32.mrb[47].mxu1  ;;  %v1773_v7 = vmax.f32 %v1761_v52, 0.0 }
 0x2e2   : > { %v2172_v3 = vmax.bf16 %v5926_v54, %v5920_v50  ;;  %4862 = vmatpush3.bf16.msra.mxu0 %v1775_v47  ;;  %4886 = vmatpush3.bf16.msra.mxu1 %v5920_v50  ;;  %v1756_v10 = vadd.f32 %v1755_v34, %v5836_v59  ;;  %v1833_v11 = vadd.f32 %v1832_v6, %v5836_v59  ;;  %v1850_v12 = vmax.f32 %v1838_v24, 0.0  ;;  %v6004_v34 = vld [vmem:[%s6877_s7 + $0x28] sm:$0xff]  }
 0x2e3   : > { %v1774_v9 = vmax.f32 %v1764_v33, 0.0  ;;  %4863 = vmatprep.subr.bf16.mxu0 %v1776_v41  ;;  %4887 = vmatprep.subr.bf16.mxu1 %v5912_v46  ;;  %v1771_v14 = vmax.f32 %v1753_v61, 0.0  ;;  %v1851_v15 = vmax.f32 %v1841_v5, 0.0  ;;  %v1848_v17 = vmax.f32 %v1830_v25, 0.0 }
 0x2e4   : > { %4825 = vmatprep.mubr.msk.bf16.mxu0 %vm2344_vm4, %v5935_v21  ;;  %4849 = vmatprep.mubr.msk.bf16.mxu1 %vm2344_vm4, %v5935_v21  ;;  %v1772_v19 = vmax.f32 %v1756_v10, 0.0  ;;  %v1849_v31 = vmax.f32 %v1833_v11, 0.0 }
 0x2e5   : > { %v1778_v18 = vpack.c.bf16 %v1774_v9, %v1773_v7  ;;  %v5960_v32 = vpack.c.bf16 %v1851_v15, %v1850_v12 }
 0x2e6   : > { %4864 = vmatpush3.bf16.msra.mxu0 %v1776_v41  ;;  %4888 = vmatpush3.bf16.msra.mxu1 %v5912_v46  ;;  %v4771_v27 = vpop.f32.mrb[48].mxu0  ;;  %v1777_v30 = vpack.c.bf16 %v1772_v19, %v1771_v14  ;;  %v5968_v35 = vpack.c.bf16 %v1849_v31, %v1848_v17  ;;  %v4783_v36 = vpop.f32.mrb[48].mxu1  ;;  %v6015_v14 = vld [vmem:[%s6877_s7 + $0x30] sm:$0xff]  }
 0x2e7   : > { %v5966_v43 = vmax.bf16 %v2167_v8, %v1778_v18  ;;  %v1890_v37 = vpop.f32.mrb[49].mxu0  ;;  %v1899_v28 = vadd.f32 %v4771_v27, %v5834_v58  ;;  %v1976_v45 = vadd.f32 %v4783_v36, %v5834_v58  ;;  %v1967_v41 = vpop.f32.mrb[49].mxu1 }
 0x2e8   : > { %v1891_v47 = vadd.f32 %v1890_v37, %v5830_v51  ;;  %v4772_v48 = vpop.f32.mrb[50].mxu0  ;;  %4826 = vmatmul.mubr.msk.bf16.gmra.mrb[68].mxu0 %vm2344_vm4, %v5958_v16  ;;  %v5985_v8 = vmax.bf16 %v2166_v13, %v1777_v30  ;;  %v1968_v52 = vadd.f32 %v1967_v41, %v5830_v51  ;;  %v4784_v42 = vpop.f32.mrb[50].mxu1  ;;  %4865 = vmatprep.subr.bf16.mxu0 %v1777_v30 }
 0x2e9   : > { %v2175_v1 = vmax.bf16 %v5966_v43, %v5960_v32  ;;  %4850 = vmatmul.mubr.msk.bf16.gmra.mrb[68].mxu1 %vm2344_vm4, %v5958_v16  ;;  %v1893_v53 = vpop.f32.mrb[51].mxu0  ;;  %v1902_v24 = vadd.f32 %v4772_v48, %v5832_v57  ;;  %v1979_v61 = vadd.f32 %v4784_v42, %v5832_v57  ;;  %4889 = vmatprep.subr.bf16.mxu1 %v5968_v35  ;;  %v1970_v62 = vpop.f32.mrb[51].mxu1  ;;  %v1923_v0 = vmax.f32 %v1899_v28, 0.0 }
 0x2ea   : > { %4866 = vmatpush3.bf16.msra.mxu0 %v1777_v30  ;;  %v2174_v2 = vmax.bf16 %v5985_v8, %v5968_v35  ;;  %v1894_v4 = vadd.f32 %v1893_v53, %v5828_v29  ;;  %v1971_v13 = vadd.f32 %v1970_v62, %v5828_v29  ;;  %4890 = vmatpush3.bf16.msra.mxu1 %v5968_v35  ;;  %v2000_v25 = vmax.f32 %v1976_v45, 0.0  ;;  %v6059_v62 = vld [vmem:[%s6877_s7 + $0x38] sm:$0xff]  }
 0x2eb   : > { %4867 = vmatprep.subr.bf16.mxu0 %v1778_v18  ;;  %v1924_v33 = vmax.f32 %v1902_v24, 0.0  ;;  %v2001_v26 = vmax.f32 %v1979_v61, 0.0  ;;  %4891 = vmatprep.subr.bf16.mxu1 %v5960_v32  ;;  %v1921_v5 = vmax.f32 %v1891_v47, 0.0  ;;  %v1998_v6 = vmax.f32 %v1968_v52, 0.0 }
 0x2ec   : > { %4829 = vmatprep.mubr.msk.bf16.mxu0 %vm2344_vm4, %v5978_v63  ;;  %v1922_v7 = vmax.f32 %v1894_v4, 0.0  ;;  %v1999_v9 = vmax.f32 %v1971_v13, 0.0  ;;  %4853 = vmatprep.mubr.msk.bf16.mxu1 %vm2344_vm4, %v5978_v63 }
 0x2ed   : > { %v6008_v10 = vpack.c.bf16 %v1924_v33, %v1923_v0  ;;  %v6010_v11 = vpack.c.bf16 %v2001_v26, %v2000_v25 }
 0x2ee   : > { %4868 = vmatpush3.bf16.msra.mxu0 %v1778_v18  ;;  %v4775_v12 = vpop.f32.mrb[52].mxu0  ;;  %v6017_v15 = vpack.c.bf16 %v1922_v7, %v1921_v5  ;;  %v6019_v17 = vpack.c.bf16 %v1999_v9, %v1998_v6  ;;  %4892 = vmatpush3.bf16.msra.mxu1 %v5960_v32  ;;  %v4787_v31 = vpop.f32.mrb[52].mxu1 }
 0x2ef   : > { %v1915_v19 = vadd.f32 %v4775_v12, %v5854_v23  ;;  %v1906_v27 = vpop.f32.mrb[53].mxu0  ;;  %v6027_v18 = vmax.bf16 %v2173_v22, %v6008_v10  ;;  %v1992_v30 = vadd.f32 %v4787_v31, %v5854_v23  ;;  %v1983_v36 = vpop.f32.mrb[53].mxu1 }
 0x2f0   : > { %v4776_v37 = vpop.f32.mrb[54].mxu0  ;;  %4830 = vmatmul.mubr.msk.bf16.gmra.mrb[72].mxu0 %vm2344_vm4, %v6004_v34  ;;  %v6036_v28 = vmax.bf16 %v2172_v3, %v6017_v15  ;;  %v1907_v45 = vadd.f32 %v1906_v27, %v5838_v60  ;;  %v4788_v46 = vpop.f32.mrb[54].mxu1  ;;  %4909 = vmatprep.subr.bf16.mxu0 %v6017_v15  ;;  %v1984_v41 = vadd.f32 %v1983_v36, %v5838_v60 }
 0x2f1   : > { %v1918_v47 = vadd.f32 %v4776_v37, %v5848_v20  ;;  %4854 = vmatmul.mubr.msk.bf16.gmra.mrb[72].mxu1 %vm2344_vm4, %v6004_v34  ;;  %v1909_v49 = vpop.f32.mrb[55].mxu0  ;;  %v2181_v22 = vmax.bf16 %v6027_v18, %v6010_v11  ;;  %v1995_v50 = vadd.f32 %v4788_v46, %v5848_v20  ;;  %4933 = vmatprep.subr.bf16.mxu1 %v6019_v17  ;;  %v1986_v54 = vpop.f32.mrb[55].mxu1  ;;  %v1927_v48 = vmax.f32 %v1915_v19, 0.0 }
 0x2f2   : > { %4833 = vmatprep.mubr.msk.bf16.mxu0 %vm2344_vm4, %v6015_v14  ;;  %v2180_v3 = vmax.bf16 %v6036_v28, %v6019_v17  ;;  %v1910_v42 = vadd.f32 %v1909_v49, %v5836_v59  ;;  %4857 = vmatprep.mubr.msk.bf16.mxu1 %vm2344_vm4, %v6015_v14  ;;  %v2004_v53 = vmax.f32 %v1992_v30, 0.0  ;;  %v1987_v61 = vadd.f32 %v1986_v54, %v5836_v59 }
 0x2f3   : > { %v1928_v52 = vmax.f32 %v1918_v47, 0.0  ;;  %v2005_v24 = vmax.f32 %v1995_v50, 0.0  ;;  %v1925_v4 = vmax.f32 %v1907_v45, 0.0  ;;  %v2002_v25 = vmax.f32 %v1984_v41, 0.0 }
 0x2f4   : > { %v1926_v0 = vmax.f32 %v1910_v42, 0.0  ;;  %v2003_v26 = vmax.f32 %v1987_v61, 0.0 }
 0x2f5   : > { %v6061_v13 = vpack.c.bf16 %v1928_v52, %v1927_v48  ;;  %v6063_v33 = vpack.c.bf16 %v2005_v24, %v2004_v53 }
 0x2f6   : > { %v4795_v5 = vpop.f32.mrb[56].mxu0  ;;  %v6071_v7 = vpack.c.bf16 %v1926_v0, %v1925_v4  ;;  %v4807_v9 = vpop.f32.mrb[56].mxu1  ;;  %v6073_v19 = vpack.c.bf16 %v2003_v26, %v2002_v25 }
 0x2f7   : > { %v6069_v6 = vmax.bf16 %v2175_v1, %v6061_v13  ;;  %v2044_v12 = vpop.f32.mrb[57].mxu0  ;;  %v2053_v31 = vadd.f32 %v4795_v5, %v5834_v58  ;;  %v2130_v27 = vadd.f32 %v4807_v9, %v5834_v58  ;;  %v2121_v36 = vpop.f32.mrb[57].mxu1 }
 0x2f8   : > { %v2045_v30 = vadd.f32 %v2044_v12, %v5830_v51  ;;  %v4796_v37 = vpop.f32.mrb[58].mxu0  ;;  %4834 = vmatmul.mubr.msk.bf16.gmra.mrb[76].mxu0 %vm2344_vm4, %v6059_v62  ;;  %v6086_v43 = vmax.bf16 %v2174_v2, %v6071_v7  ;;  %v2122_v1 = vadd.f32 %v2121_v36, %v5830_v51  ;;  %v4808_v45 = vpop.f32.mrb[58].mxu1 }
 0x2f9   : > { %v2183_v32 = vmax.bf16 %v6069_v6, %v6063_v33  ;;  %4858 = vmatmul.mubr.msk.bf16.gmra.mrb[76].mxu1 %vm2344_vm4, %v6059_v62  ;;  %v2047_v58 = vpop.f32.mrb[59].mxu0  ;;  %4869 = vmatprep.mubr.msk.bf16.mxu0 %vm2344_vm4, %v5822_v40  ;;  %v2056_v47 = vadd.f32 %v4796_v37, %v5832_v57  ;;  %v2133_v46 = vadd.f32 %v4808_v45, %v5832_v57  ;;  %v2124_v49 = vpop.f32.mrb[59].mxu1  ;;  %v2077_v2 = vmax.f32 %v2053_v31, 0.0 }
 0x2fa   : > { %4893 = vmatprep.mubr.msk.bf16.mxu1 %vm2344_vm4, %v5822_v40  ;;  %v2182_v35 = vmax.bf16 %v6086_v43, %v6073_v19  ;;  %v2048_v51 = vadd.f32 %v2047_v58, %v5828_v29  ;;  %v2125_v8 = vadd.f32 %v2124_v49, %v5828_v29  ;;  %v2154_v41 = vmax.f32 %v2130_v27, 0.0 }
 0x2fb   : > { %v2078_v50 = vmax.f32 %v2056_v47, 0.0  ;;  %v2155_v54 = vmax.f32 %v2133_v46, 0.0  ;;  %v2075_v48 = vmax.f32 %v2045_v30, 0.0  ;;  %v2152_v52 = vmax.f32 %v2122_v1, 0.0 }
 0x2fc   : > { %v2076_v42 = vmax.f32 %v2048_v51, 0.0  ;;  %v2153_v53 = vmax.f32 %v2125_v8, 0.0 }
 0x2fd   : > { %v6101_v57 = vpack.c.bf16 %v2078_v50, %v2077_v2  ;;  %v6103_v24 = vpack.c.bf16 %v2155_v54, %v2154_v41 }
 0x2fe   : > { %v4799_v61 = vpop.f32.mrb[60].mxu0  ;;  %v6105_v4 = vpack.c.bf16 %v2076_v42, %v2075_v48  ;;  %v6107_v0 = vpack.c.bf16 %v2153_v53, %v2152_v52  ;;  %v4811_v29 = vpop.f32.mrb[60].mxu1 }
 0x2ff   : > { %v2069_v25 = vadd.f32 %v4799_v61, %v5854_v23  ;;  %v2060_v26 = vpop.f32.mrb[61].mxu0  ;;  %v2185_v5 = vmax.bf16 %v2181_v22, %v6101_v57  ;;  %v2146_v9 = vadd.f32 %v4811_v29, %v5854_v23  ;;  %v2137_v31 = vpop.f32.mrb[61].mxu1 }
 0x300   : > { %v2061_v12 = vadd.f32 %v2060_v26, %v5838_v60  ;;  %v4800_v27 = vpop.f32.mrb[62].mxu0  ;;  %4870 = vmatmul.mubr.msk.bf16.vlgmr.msra.gmra.mrb[80].mxu0 %vm2344_vm4, %v5909_v44  ;;  %v2184_v30 = vmax.bf16 %v2180_v3, %v6105_v4  ;;  %v2138_v36 = vadd.f32 %v2137_v31, %v5838_v60  ;;  %v4812_v18 = vpop.f32.mrb[62].mxu1 }
 0x301   : > { %v2072_v37 = vadd.f32 %v4800_v27, %v5848_v20  ;;  %4894 = vmatmul.mubr.msk.bf16.vlgmr.msra.gmra.mrb[80].mxu1 %vm2344_vm4, %v5909_v44  ;;  %4910 = vmatpush3.bf16.msra.mxu0 %v6017_v15  ;;  %v2063_v23 = vpop.f32.mrb[63].mxu0  ;;  %v2081_v22 = vmax.f32 %v2069_v25, 0.0  ;;  %v2149_v43 = vadd.f32 %v4812_v18, %v5848_v20  ;;  %v2140_v28 = vpop.f32.mrb[63].mxu1  ;;  %v2158_v60 = vmax.f32 %v2146_v9, 0.0 }
 0x302   : > { %4934 = vmatpush3.bf16.msra.mxu1 %v6019_v17  ;;  %v2064_v1 = vadd.f32 %v2063_v23, %v5836_v59  ;;  %4911 = vmatprep.subr.bf16.mxu0 %v6008_v10  ;;  %v2141_v45 = vadd.f32 %v2140_v28, %v5836_v59  ;;  %v6136_v15 = vmax.bf16 %v2184_v30, %v6107_v0  ;;  %v2079_v20 = vmax.f32 %v2061_v12, 0.0 }
 0x303   : > { %v2082_v3 = vmax.f32 %v2072_v37, 0.0  ;;  %4935 = vmatprep.subr.bf16.mxu1 %v6010_v11  ;;  %4873 = vmatprep.mubr.msk.bf16.mxu0 %vm2344_vm4, %v5935_v21  ;;  %v2159_v58 = vmax.f32 %v2149_v43, 0.0  ;;  %v6141_v47 = vmax.bf16 %v2185_v5, %v6103_v24  ;;  %v2156_v46 = vmax.f32 %v2138_v36, 0.0 }
 0x304   : > { %v2080_v17 = vmax.f32 %v2064_v1, 0.0  ;;  %4897 = vmatprep.mubr.msk.bf16.mxu1 %vm2344_vm4, %v5935_v21  ;;  %v2157_v59 = vmax.f32 %v2141_v45, 0.0 }
 0x305   : > { %v2086_v49 = vpack.c.bf16 %v2082_v3, %v2081_v22  ;;  %4912 = vmatpush3.bf16.msra.mxu0 %v6008_v10  ;;  %v2163_v51 = vpack.c.bf16 %v2159_v58, %v2158_v60 }
 0x306   : > { %v2085_v8 = vpack.c.bf16 %v2080_v17, %v2079_v20  ;;  %4936 = vmatpush3.bf16.msra.mxu1 %v6010_v11  ;;  %4913 = vmatprep.subr.bf16.mxu0 %v6071_v7  ;;  %v2162_v41 = vpack.c.bf16 %v2157_v59, %v2156_v46 }
 0x307   : > { %v2187_v2 = vmax.bf16 %v2183_v32, %v2086_v49  ;;  %4937 = vmatprep.subr.bf16.mxu1 %v6073_v19 }
 0x308   : > { %v2186_v50 = vmax.bf16 %v2182_v35, %v2085_v8  ;;  %4874 = vmatmul.mubr.msk.bf16.gmra.mrb[84].mxu0 %vm2344_vm4, %v5958_v16 }
 0x309   : > { %4898 = vmatmul.mubr.msk.bf16.gmra.mrb[84].mxu1 %vm2344_vm4, %v5958_v16  ;;  %4914 = vmatpush3.bf16.msra.mxu0 %v6071_v7  ;;  %v6155_v10 = vmax.bf16 %v2187_v2, %v2163_v51 }
 0x30a   : > { %4938 = vmatpush3.bf16.msra.mxu1 %v6073_v19  ;;  %4915 = vmatprep.subr.bf16.mxu0 %v6061_v13  ;;  %v6159_v11 = vmax.bf16 %v2186_v50, %v2162_v41 }
 0x30b   : > { %6887 = vst [vmem:[#allocation5_spill] sm:$0xff] %v6155_v10  ;;  %4939 = vmatprep.subr.bf16.mxu1 %v6063_v33  ;;  %4877 = vmatprep.mubr.msk.bf16.mxu0 %vm2344_vm4, %v5978_v63 }
 0x30c   : > { %4901 = vmatprep.mubr.msk.bf16.mxu1 %vm2344_vm4, %v5978_v63 }
 0x30d   : > { %4916 = vmatpush3.bf16.msra.mxu0 %v6061_v13 }
 0x30e   : > { %4940 = vmatpush3.bf16.msra.mxu1 %v6063_v33  ;;  %4957 = vmatprep.subr.bf16.mxu0 %v6105_v4 }
 0x30f   : > { %4981 = vmatprep.subr.bf16.mxu1 %v6107_v0 }
 0x310   : > { %4878 = vmatmul.mubr.msk.bf16.gmra.mrb[88].mxu0 %vm2344_vm4, %v6004_v34 }
 0x311   : > { %4902 = vmatmul.mubr.msk.bf16.gmra.mrb[88].mxu1 %vm2344_vm4, %v6004_v34  ;;  %4881 = vmatprep.mubr.msk.bf16.mxu0 %vm2344_vm4, %v6015_v14 }
 0x312   : > { %4905 = vmatprep.mubr.msk.bf16.mxu1 %vm2344_vm4, %v6015_v14 }
 0x318   : > { %4882 = vmatmul.mubr.msk.bf16.gmra.mrb[92].mxu0 %vm2344_vm4, %v6059_v62 }
 0x319   : > { %4906 = vmatmul.mubr.msk.bf16.gmra.mrb[92].mxu1 %vm2344_vm4, %v6059_v62  ;;  %4917 = vmatprep.mubr.msk.bf16.mxu0 %vm2344_vm4, %v5822_v40 }
 0x31a   : > { %4941 = vmatprep.mubr.msk.bf16.mxu1 %vm2344_vm4, %v5822_v40 }
 0x320   : > { %4918 = vmatmul.mubr.msk.bf16.vlgmr.msra.gmra.mrb[96].mxu0 %vm2344_vm4, %v5909_v44 }
 0x321   : > { %4942 = vmatmul.mubr.msk.bf16.vlgmr.msra.gmra.mrb[96].mxu1 %vm2344_vm4, %v5909_v44  ;;  %4958 = vmatpush3.bf16.msra.mxu0 %v6105_v4 }
 0x322   : > { %4982 = vmatpush3.bf16.msra.mxu1 %v6107_v0  ;;  %4959 = vmatprep.subr.bf16.mxu0 %v6101_v57 }
 0x323   : > { %4983 = vmatprep.subr.bf16.mxu1 %v6103_v24  ;;  %4921 = vmatprep.mubr.msk.bf16.mxu0 %vm2344_vm4, %v5935_v21 }
 0x324   : > { %4945 = vmatprep.mubr.msk.bf16.mxu1 %vm2344_vm4, %v5935_v21 }
 0x325   : > { %4960 = vmatpush3.bf16.msra.mxu0 %v6101_v57 }
 0x326   : > { %4984 = vmatpush3.bf16.msra.mxu1 %v6103_v24  ;;  %4961 = vmatprep.subr.bf16.mxu0 %v2085_v8 }
 0x327   : > { %4985 = vmatprep.subr.bf16.mxu1 %v2162_v41 }
 0x328   : > { %4922 = vmatmul.mubr.msk.bf16.gmra.mrb[100].mxu0 %vm2344_vm4, %v5958_v16 }
 0x329   : > { %4946 = vmatmul.mubr.msk.bf16.gmra.mrb[100].mxu1 %vm2344_vm4, %v5958_v16  ;;  %4962 = vmatpush3.bf16.msra.mxu0 %v2085_v8 }
 0x32a   : > { %4986 = vmatpush3.bf16.msra.mxu1 %v2162_v41  ;;  %4963 = vmatprep.subr.bf16.mxu0 %v2086_v49 }
 0x32b   : > { %4987 = vmatprep.subr.bf16.mxu1 %v2163_v51  ;;  %4925 = vmatprep.mubr.msk.bf16.mxu0 %vm2344_vm4, %v5978_v63 }
 0x32c   : > { %4949 = vmatprep.mubr.msk.bf16.mxu1 %vm2344_vm4, %v5978_v63 }
 0x32d   : > { %4964 = vmatpush3.bf16.msra.mxu0 %v2086_v49 }
 0x32e   : > { %4988 = vmatpush3.bf16.msra.mxu1 %v2163_v51 }
 0x330   : > { %4926 = vmatmul.mubr.msk.bf16.gmra.mrb[104].mxu0 %vm2344_vm4, %v6004_v34 }
 0x331   : > { %4950 = vmatmul.mubr.msk.bf16.gmra.mrb[104].mxu1 %vm2344_vm4, %v6004_v34  ;;  %4929 = vmatprep.mubr.msk.bf16.mxu0 %vm2344_vm4, %v6015_v14 }
 0x332   : > { %4953 = vmatprep.mubr.msk.bf16.mxu1 %vm2344_vm4, %v6015_v14 }
 0x338   : > { %4930 = vmatmul.mubr.msk.bf16.gmra.mrb[108].mxu0 %vm2344_vm4, %v6059_v62 }
 0x339   : > { %4954 = vmatmul.mubr.msk.bf16.gmra.mrb[108].mxu1 %vm2344_vm4, %v6059_v62  ;;  %4965 = vmatprep.mubr.msk.bf16.mxu0 %vm2344_vm4, %v5822_v40 }
 0x33a   : > { %4989 = vmatprep.mubr.msk.bf16.mxu1 %vm2344_vm4, %v5822_v40  ;;  %v6252_v40 = vpop.permute.xlu1 %2231 }
 0x340   : > { %4966 = vmatmul.mubr.msk.bf16.vlgmr.msra.gmra.mrb[112].mxu0 %vm2344_vm4, %v5909_v44 }
 0x341   : > { %4990 = vmatmul.mubr.msk.bf16.vlgmr.msra.gmra.mrb[112].mxu1 %vm2344_vm4, %v5909_v44  ;;  %4969 = vmatprep.mubr.msk.bf16.mxu0 %vm2344_vm4, %v5935_v21  ;;  %v6254_v44 = vpop.permute.xlu0 %2226 }
 0x342   : > { %4993 = vmatprep.mubr.msk.bf16.mxu1 %vm2344_vm4, %v5935_v21  ;;  %v6256_v21 = vpop.permute.xlu1 %2241 }
 0x348   : > { %4970 = vmatmul.mubr.msk.bf16.gmra.mrb[116].mxu0 %vm2344_vm4, %v5958_v16 }
 0x349   : > { %4994 = vmatmul.mubr.msk.bf16.gmra.mrb[116].mxu1 %vm2344_vm4, %v5958_v16  ;;  %4973 = vmatprep.mubr.msk.bf16.mxu0 %vm2344_vm4, %v5978_v63  ;;  %v6258_v16 = vpop.permute.xlu0 %2236 }
 0x34a   : > { %4997 = vmatprep.mubr.msk.bf16.mxu1 %vm2344_vm4, %v5978_v63  ;;  %v6260_v63 = vpop.permute.xlu1 %2251 }
 0x34e   : > { %v6264_v13 = vpop.permute.xlu1 %2261 }
 0x350   : > { %4974 = vmatmul.mubr.msk.bf16.gmra.mrb[120].mxu0 %vm2344_vm4, %v6004_v34 }
 0x351   : > { %4998 = vmatmul.mubr.msk.bf16.gmra.mrb[120].mxu1 %vm2344_vm4, %v6004_v34  ;;  %4977 = vmatprep.mubr.msk.bf16.mxu0 %vm2344_vm4, %v6015_v14  ;;  %v6262_v34 = vpop.permute.xlu0 %2246 }
 0x352   : > { %5001 = vmatprep.mubr.msk.bf16.mxu1 %vm2344_vm4, %v6015_v14  ;;  %v6268_v33 = vpop.permute.xlu1 %2271 }
 0x355   : > { %v6266_v14 = vpop.permute.xlu0 %2256 }
 0x356   : > { %v6280_v27 = vpop.permute.xlu1 %2281 }
 0x358   : > { %4978 = vmatmul.mubr.msk.bf16.gmra.mrb[124].mxu0 %vm2344_vm4, %v6059_v62 }
 0x359   : > { %5002 = vmatmul.mubr.msk.bf16.gmra.mrb[124].mxu1 %vm2344_vm4, %v6059_v62  ;;  %v6270_v6 = vpop.permute.xlu0 %2266 }
 0x35d   : > { %v6284_v18 = vpop.permute.xlu0 %2276 }
 0x3b3   : > { %v4823_v62 = vpop.f32.mrb[64].mxu0 }
 0x3b4   : > { %v2412_v7 = vadd.f32 %v4823_v62, %v6258_v16  ;;  %v4847_v19 = vpop.f32.mrb[64].mxu1  ;;  %v2403_v32 = vpop.f32.mrb[65].mxu0 }
 0x3b5   : > { %v2533_v35 = vadd.f32 %v4847_v19, %v6258_v16  ;;  %v2404_v54 = vadd.f32 %v2403_v32, %v6254_v44  ;;  %v2524_v48 = vpop.f32.mrb[65].mxu1  ;;  %v4824_v52 = vpop.f32.mrb[66].mxu0 }
 0x3b6   : > { %v2525_v42 = vadd.f32 %v2524_v48, %v6254_v44  ;;  %v2415_v53 = vadd.f32 %v4824_v52, %v6256_v21  ;;  %v4848_v57 = vpop.f32.mrb[66].mxu1  ;;  %v2406_v24 = vpop.f32.mrb[67].mxu0  ;;  %v2468_v25 = vmax.f32 %v2412_v7, 0.0 }
 0x3b7   : > { %v2536_v61 = vadd.f32 %v4848_v57, %v6256_v21  ;;  %v2407_v4 = vadd.f32 %v2406_v24, %v6252_v40  ;;  %v2527_v0 = vpop.f32.mrb[67].mxu1  ;;  %v2589_v5 = vmax.f32 %v2533_v35, 0.0  ;;  %v2466_v9 = vmax.f32 %v2404_v54, 0.0  ;;  %v5100_v35 = vld [vmem:[%s6879_s9 + $0x4] ss:$8 sps:$4 sm:$0xff]   ;;  %v6310_v57 = vpop.permute.xlu1 %2291 }
 0x3b8   : > { %v2469_v29 = vmax.f32 %v2415_v53, 0.0  ;;  %v2528_v26 = vadd.f32 %v2527_v0, %v6252_v40  ;;  %v2587_v30 = vmax.f32 %v2525_v42, 0.0  ;;  %v5103_v53 = vld [vmem:[%s6879_s9 + $0x84] ss:$8 sps:$4 sm:$0xff]   ;;  %3809 = vmatprep.mubr.bf16.mxu0 %v5100_v35  ;;  %v6314_v0 = vpop.permute.xlu0 %2286 }
 0x3b9   : > { %v2590_v12 = vmax.f32 %v2536_v61, 0.0  ;;  %v2467_v31 = vmax.f32 %v2407_v4, 0.0  ;;  %3873 = vmatprep.mubr.bf16.mxu1 %v5103_v53 }
 0x3ba   : > { %v6282_v36 = vpack.c.bf16 %v2469_v29, %v2468_v25  ;;  %v2588_v37 = vmax.f32 %v2528_v26, 0.0 }
 0x3bb   : > { %v6286_v23 = vpack.c.bf16 %v2590_v12, %v2589_v5  ;;  %v6288_v22 = vpack.c.bf16 %v2467_v31, %v2466_v9  ;;  %v4827_v43 = vpop.f32.mrb[68].mxu0  ;;  %v6334_v35 = vpop.permute.xlu1 %2301 }
 0x3bc   : > { %v6290_v1 = vpack.c.bf16 %v2588_v37, %v2587_v30  ;;  %v2428_v28 = vadd.f32 %v4827_v43, %v6266_v14  ;;  %v4851_v60 = vpop.f32.mrb[68].mxu1  ;;  %v2419_v3 = vpop.f32.mrb[69].mxu0 }
 0x3bd   : > { %v3338_v45 = vmax.bf16 %v6286_v23, %v6282_v36  ;;  %v2549_v20 = vadd.f32 %v4851_v60, %v6266_v14  ;;  %v2420_v58 = vadd.f32 %v2419_v3, %v6262_v34  ;;  %v2540_v17 = vpop.f32.mrb[69].mxu1  ;;  %v4828_v46 = vpop.f32.mrb[70].mxu0 }
 0x3be   : > { %v2541_v59 = vadd.f32 %v2540_v17, %v6262_v34  ;;  %v2431_v51 = vadd.f32 %v4828_v46, %v6264_v13  ;;  %v4852_v8 = vpop.f32.mrb[70].mxu1  ;;  %v2422_v2 = vpop.f32.mrb[71].mxu0  ;;  %v2472_v7 = vmax.f32 %v2428_v28, 0.0 }
 0x3bf   : > { %v2552_v41 = vadd.f32 %v4852_v8, %v6264_v13  ;;  %v2423_v50 = vadd.f32 %v2422_v2, %v6260_v63  ;;  %v2543_v62 = vpop.f32.mrb[71].mxu1  ;;  %v2593_v54 = vmax.f32 %v2549_v20, 0.0  ;;  %v2470_v48 = vmax.f32 %v2420_v58, 0.0 }
 0x3c0   : > { %v2473_v19 = vmax.f32 %v2431_v51, 0.0  ;;  %v2544_v32 = vadd.f32 %v2543_v62, %v6260_v63  ;;  %v2591_v24 = vmax.f32 %v2541_v59, 0.0 }
 0x3c1   : > { %v2594_v52 = vmax.f32 %v2552_v41, 0.0  ;;  %v2471_v42 = vmax.f32 %v2423_v50, 0.0 }
 0x3c2   : > { %v6312_v61 = vpack.c.bf16 %v2473_v19, %v2472_v7  ;;  %v2592_v4 = vmax.f32 %v2544_v32, 0.0 }
 0x3c3   : > { %v6316_v25 = vpack.c.bf16 %v2594_v52, %v2593_v54  ;;  %v6318_v29 = vpack.c.bf16 %v2471_v42, %v2470_v48  ;;  %v4831_v26 = vpop.f32.mrb[72].mxu0  ;;  %v6338_v42 = vpop.permute.xlu0 %2296 }
 0x3c4   : > { %v6320_v5 = vpack.c.bf16 %v2592_v4, %v2591_v24  ;;  %v2444_v9 = vadd.f32 %v4831_v26, %v6284_v18  ;;  %v4855_v12 = vpop.f32.mrb[72].mxu1  ;;  %v2435_v31 = vpop.f32.mrb[73].mxu0 }
 0x3c5   : > { %v2565_v37 = vadd.f32 %v4855_v12, %v6284_v18  ;;  %v2436_v43 = vadd.f32 %v2435_v31, %v6270_v6  ;;  %v2556_v28 = vpop.f32.mrb[73].mxu1  ;;  %v4832_v60 = vpop.f32.mrb[74].mxu0 }
 0x3c6   : > { %v2557_v20 = vadd.f32 %v2556_v28, %v6270_v6  ;;  %v2447_v58 = vadd.f32 %v4832_v60, %v6280_v27  ;;  %v4856_v17 = vpop.f32.mrb[74].mxu1  ;;  %v2438_v46 = vpop.f32.mrb[75].mxu0  ;;  %v2476_v2 = vmax.f32 %v2444_v9, 0.0 }
 0x3c7   : > { %v2568_v59 = vadd.f32 %v4856_v17, %v6280_v27  ;;  %v2439_v51 = vadd.f32 %v2438_v46, %v6268_v33  ;;  %v2559_v8 = vpop.f32.mrb[75].mxu1  ;;  %v2597_v62 = vmax.f32 %v2565_v37, 0.0  ;;  %v2474_v7 = vmax.f32 %v2436_v43, 0.0 }
 0x3c8   : > { %v2477_v41 = vmax.f32 %v2447_v58, 0.0  ;;  %v2560_v50 = vadd.f32 %v2559_v8, %v6268_v33  ;;  %v2595_v54 = vmax.f32 %v2557_v20, 0.0 }
 0x3c9   : > { %v2598_v19 = vmax.f32 %v2568_v59, 0.0  ;;  %v2475_v32 = vmax.f32 %v2439_v51, 0.0 }
 0x3ca   : > { %v6336_v48 = vpack.c.bf16 %v2477_v41, %v2476_v2  ;;  %v2596_v52 = vmax.f32 %v2560_v50, 0.0 }
 0x3cb   : > { %v6340_v53 = vpack.c.bf16 %v2598_v19, %v2597_v62  ;;  %v6342_v24 = vpack.c.bf16 %v2475_v32, %v2474_v7  ;;  %v4835_v4 = vpop.f32.mrb[76].mxu0 }
 0x3cc   : > { %v6344_v26 = vpack.c.bf16 %v2596_v52, %v2595_v54  ;;  %v2460_v9 = vadd.f32 %v4835_v4, %v6338_v42  ;;  %v4859_v12 = vpop.f32.mrb[76].mxu1  ;;  %v2451_v31 = vpop.f32.mrb[77].mxu0 }
 0x3cd   : > { %v2581_v43 = vadd.f32 %v4859_v12, %v6338_v42  ;;  %v2452_v28 = vadd.f32 %v2451_v31, %v6314_v0  ;;  %v2572_v60 = vpop.f32.mrb[77].mxu1  ;;  %v4836_v20 = vpop.f32.mrb[78].mxu0 }
 0x3ce   : > { %v2573_v17 = vadd.f32 %v2572_v60, %v6314_v0  ;;  %v2463_v46 = vadd.f32 %v4836_v20, %v6334_v35  ;;  %v4860_v59 = vpop.f32.mrb[78].mxu1  ;;  %v2454_v51 = vpop.f32.mrb[79].mxu0  ;;  %v2480_v50 = vmax.f32 %v2460_v9, 0.0 }
 0x3cf   : > { %v2584_v8 = vadd.f32 %v4860_v59, %v6334_v35  ;;  %v2455_v2 = vadd.f32 %v2454_v51, %v6310_v57  ;;  %v2575_v41 = vpop.f32.mrb[79].mxu1  ;;  %v2601_v19 = vmax.f32 %v2581_v43, 0.0  ;;  %v2478_v32 = vmax.f32 %v2452_v28, 0.0 }
 0x3d0   : > { %v2481_v62 = vmax.f32 %v2463_v46, 0.0  ;;  %v2576_v7 = vadd.f32 %v2575_v41, %v6310_v57  ;;  %v2599_v4 = vmax.f32 %v2573_v17, 0.0 }
 0x3d1   : > { %v2602_v54 = vmax.f32 %v2584_v8, 0.0  ;;  %v2479_v52 = vmax.f32 %v2455_v2, 0.0 }
 0x3d2   : > { %v6358_v12 = vpack.c.bf16 %v2481_v62, %v2480_v50  ;;  %v2600_v31 = vmax.f32 %v2576_v7, 0.0 }
 0x3d3   : > { %v6360_v60 = vpack.c.bf16 %v2602_v54, %v2601_v19  ;;  %v6362_v20 = vpack.c.bf16 %v2479_v52, %v2478_v32  ;;  %v4871_v59 = vpop.f32.mrb[80].mxu0 }
 0x3d4   : > { %v6364_v58 = vpack.c.bf16 %v2600_v31, %v2599_v4  ;;  %v2654_v9 = vadd.f32 %v4871_v59, %v6258_v16  ;;  %v4895_v46 = vpop.f32.mrb[80].mxu1  ;;  %v2645_v51 = vpop.f32.mrb[81].mxu0 }
 0x3d5   : > { %v2775_v28 = vadd.f32 %v4895_v46, %v6258_v16  ;;  %v2646_v17 = vadd.f32 %v2645_v51, %v6254_v44  ;;  %v2766_v8 = vpop.f32.mrb[81].mxu1  ;;  %v4872_v2 = vpop.f32.mrb[82].mxu0 }
 0x3d6   : > { %v2767_v50 = vadd.f32 %v2766_v8, %v6254_v44  ;;  %v2657_v62 = vadd.f32 %v4872_v2, %v6256_v21  ;;  %v4896_v7 = vpop.f32.mrb[82].mxu1  ;;  %v2648_v19 = vpop.f32.mrb[83].mxu0  ;;  %v2710_v4 = vmax.f32 %v2654_v9, 0.0 }
 0x3d7   : > { %v2778_v32 = vadd.f32 %v4896_v7, %v6256_v21  ;;  %v2649_v54 = vadd.f32 %v2648_v19, %v6252_v40  ;;  %v2769_v52 = vpop.f32.mrb[83].mxu1  ;;  %v2831_v46 = vmax.f32 %v2775_v28, 0.0  ;;  %v2708_v51 = vmax.f32 %v2646_v17, 0.0 }
 0x3d8   : > { %v2711_v31 = vmax.f32 %v2657_v62, 0.0  ;;  %v2770_v59 = vadd.f32 %v2769_v52, %v6252_v40  ;;  %v2829_v41 = vmax.f32 %v2767_v50, 0.0  ;;  %v6888_v50 = vmax.bf16 %v6290_v1, %v6288_v22 }
 0x3d9   : > { %v2832_v43 = vmax.f32 %v2778_v32, 0.0  ;;  %v2709_v37 = vmax.f32 %v2649_v54, 0.0 }
 0x3da   : > { %v2725_v3 = vpack.c.bf16 %v2711_v31, %v2710_v4  ;;  %v2830_v8 = vmax.f32 %v2770_v59, 0.0 }
 0x3db   : > { %v6378_v30 = vpack.c.bf16 %v2832_v43, %v2831_v46  ;;  %v2724_v2 = vpack.c.bf16 %v2709_v37, %v2708_v51  ;;  %v4875_v49 = vpop.f32.mrb[84].mxu0 }
 0x3dc   : > { %v6383_v7 = vmax.bf16 %v3338_v45, %v2725_v3  ;;  %v6385_v9 = vpack.c.bf16 %v2830_v8, %v2829_v41  ;;  %v2670_v62 = vadd.f32 %v4875_v49, %v6266_v14  ;;  %v4899_v28 = vpop.f32.mrb[84].mxu1  ;;  %v2661_v17 = vpop.f32.mrb[85].mxu0 }
 0x3dd   : > { %v6391_v19 = vmax.bf16 %v6888_v50, %v2724_v2  ;;  %v2791_v43 = vadd.f32 %v4899_v28, %v6266_v14  ;;  %v2662_v37 = vadd.f32 %v2661_v17, %v6262_v34  ;;  %v2782_v32 = vpop.f32.mrb[85].mxu1  ;;  %v4876_v54 = vpop.f32.mrb[86].mxu0 }
 0x3de   : > { %v2783_v23 = vadd.f32 %v2782_v32, %v6262_v34  ;;  %v2673_v45 = vadd.f32 %v4876_v54, %v6264_v13  ;;  %v4900_v49 = vpop.f32.mrb[86].mxu1  ;;  %v2664_v3 = vpop.f32.mrb[87].mxu0  ;;  %v2714_v52 = vmax.f32 %v2670_v62, 0.0 }
 0x3df   : > { %v2794_v1 = vadd.f32 %v4900_v49, %v6264_v13  ;;  %v2785_v41 = vpop.f32.mrb[87].mxu1  ;;  %v2665_v31 = vadd.f32 %v2664_v3, %v6260_v63  ;;  %v2835_v46 = vmax.f32 %v2791_v43, 0.0  ;;  %v2712_v51 = vmax.f32 %v2662_v37, 0.0 }
 0x3e0   : > { %v2715_v4 = vmax.f32 %v2673_v45, 0.0  ;;  %v2786_v59 = vadd.f32 %v2785_v41, %v6260_v63  ;;  %v2833_v2 = vmax.f32 %v2783_v23, 0.0  ;;  %v6889_v49 = vmax.bf16 %v6316_v25, %v6312_v61 }
 0x3e1   : > { %v2836_v8 = vmax.f32 %v2794_v1, 0.0  ;;  %v2713_v17 = vmax.f32 %v2665_v31, 0.0 }
 0x3e2   : > { %v2727_v28 = vpack.c.bf16 %v2715_v4, %v2714_v52  ;;  %v2834_v50 = vmax.f32 %v2786_v59, 0.0  ;;  %v6890_v4 = vmax.bf16 %v6320_v5, %v6318_v29 }
 0x3e3   : > { %v6404_v32 = vpack.c.bf16 %v2836_v8, %v2835_v46  ;;  %v4879_v54 = vpop.f32.mrb[88].mxu0  ;;  %v2726_v62 = vpack.c.bf16 %v2713_v17, %v2712_v51 }
 0x3e4   : > { %v6409_v22 = vmax.bf16 %v6889_v49, %v2727_v28  ;;  %v6411_v45 = vpack.c.bf16 %v2834_v50, %v2833_v2  ;;  %v4903_v3 = vpop.f32.mrb[88].mxu1  ;;  %v2677_v41 = vpop.f32.mrb[89].mxu0  ;;  %v2686_v43 = vadd.f32 %v4879_v54, %v6284_v18 }
 0x3e5   : > { %v2807_v37 = vadd.f32 %v4903_v3, %v6284_v18  ;;  %v2798_v23 = vpop.f32.mrb[89].mxu1  ;;  %v4880_v1 = vpop.f32.mrb[90].mxu0  ;;  %v6420_v61 = vmax.bf16 %v6890_v4, %v2726_v62  ;;  %v2678_v25 = vadd.f32 %v2677_v41, %v6270_v6 }
 0x3e6   : > { %v2799_v31 = vadd.f32 %v2798_v23, %v6270_v6  ;;  %v4904_v59 = vpop.f32.mrb[90].mxu1  ;;  %v2680_v46 = vpop.f32.mrb[91].mxu0  ;;  %v2689_v51 = vadd.f32 %v4880_v1, %v6280_v27  ;;  %v2718_v5 = vmax.f32 %v2686_v43, 0.0  ;;  %v6891_v43 = vmax.bf16 %v6340_v53, %v6336_v48 }
 0x3e7   : > { %v2810_v8 = vadd.f32 %v4904_v59, %v6280_v27  ;;  %v2801_v2 = vpop.f32.mrb[91].mxu1  ;;  %v2681_v17 = vadd.f32 %v2680_v46, %v6268_v33  ;;  %v2839_v50 = vmax.f32 %v2807_v37, 0.0  ;;  %v2716_v62 = vmax.f32 %v2678_v25, 0.0 }
 0x3e8   : > { %v2802_v29 = vadd.f32 %v2801_v2, %v6268_v33  ;;  %v2719_v54 = vmax.f32 %v2689_v51, 0.0  ;;  %v2837_v3 = vmax.f32 %v2799_v31, 0.0 }
 0x3e9   : > { %v2840_v49 = vmax.f32 %v2810_v8, 0.0  ;;  %v2717_v41 = vmax.f32 %v2681_v17, 0.0  ;;  %v6892_v8 = vmax.bf16 %v6344_v26, %v6342_v24 }
 0x3ea   : > { %v2838_v23 = vmax.f32 %v2802_v29, 0.0  ;;  %v2729_v4 = vpack.c.bf16 %v2719_v54, %v2718_v5 }
 0x3eb   : > { %v6430_v1 = vpack.c.bf16 %v2840_v49, %v2839_v50  ;;  %v4883_v59 = vpop.f32.mrb[92].mxu0  ;;  %v2728_v52 = vpack.c.bf16 %v2717_v41, %v2716_v62 }
 0x3ec   : > { %v6432_v36 = vpack.c.bf16 %v2838_v23, %v2837_v3  ;;  %v2702_v28 = vadd.f32 %v4883_v59, %v6338_v42  ;;  %v4907_v46 = vpop.f32.mrb[92].mxu1  ;;  %v2693_v10 = vpop.f32.mrb[93].mxu0  ;;  %v6438_v37 = vmax.bf16 %v6891_v43, %v2729_v4 }
 0x3ed   : > { %v2823_v25 = vadd.f32 %v4907_v46, %v6338_v42  ;;  %v2814_v31 = vpop.f32.mrb[93].mxu1  ;;  %v4884_v51 = vpop.f32.mrb[94].mxu0  ;;  %v6444_v2 = vmax.bf16 %v6892_v8, %v2728_v52  ;;  %v2694_v17 = vadd.f32 %v2693_v10, %v6314_v0  ;;  %v6893_v8 = vmax.bf16 %v6360_v60, %v6358_v12 }
 0x3ee   : > { %v2705_v29 = vadd.f32 %v4884_v51, %v6334_v35  ;;  %v4908_v5 = vpop.f32.mrb[94].mxu1  ;;  %v2696_v50 = vpop.f32.mrb[95].mxu0  ;;  %v2815_v53 = vadd.f32 %v2814_v31, %v6314_v0  ;;  %v2722_v24 = vmax.f32 %v2702_v28, 0.0 }
 0x3ef   : > { %v2826_v54 = vadd.f32 %v4908_v5, %v6334_v35  ;;  %v2817_v49 = vpop.f32.mrb[95].mxu1  ;;  %v2697_v52 = vadd.f32 %v2696_v50, %v6310_v57  ;;  %v2843_v10 = vmax.f32 %v2823_v25, 0.0  ;;  %v2720_v23 = vmax.f32 %v2694_v17, 0.0 }
 0x3f0   : > { %v2723_v26 = vmax.f32 %v2705_v29, 0.0  ;;  %v2818_v41 = vadd.f32 %v2817_v49, %v6310_v57  ;;  %v2841_v46 = vmax.f32 %v2815_v53, 0.0 }
 0x3f1   : > { %v2844_v3 = vmax.f32 %v2826_v54, 0.0  ;;  %v2721_v59 = vmax.f32 %v2697_v52, 0.0 }
 0x3f2   : > { %v2731_v4 = vpack.c.bf16 %v2723_v26, %v2722_v24  ;;  %v2842_v31 = vmax.f32 %v2818_v41, 0.0  ;;  %v6894_v26 = vmax.bf16 %v6364_v58, %v6362_v20 }
 0x3f3   : > { %v6456_v43 = vpack.c.bf16 %v2844_v3, %v2843_v10  ;;  %v4919_v51 = vpop.f32.mrb[96].mxu0  ;;  %v2730_v28 = vpack.c.bf16 %v2721_v59, %v2720_v23 }
 0x3f4   : > { %v6461_v5 = vmax.bf16 %v6893_v8, %v2731_v4  ;;  %v4943_v29 = vpop.f32.mrb[96].mxu1  ;;  %v2887_v50 = vpop.f32.mrb[97].mxu0  ;;  %v6463_v25 = vpack.c.bf16 %v2842_v31, %v2841_v46  ;;  %v2896_v54 = vadd.f32 %v4919_v51, %v6258_v16 }
 0x3f5   : > { %v3017_v17 = vadd.f32 %v4943_v29, %v6258_v16  ;;  %v3008_v49 = vpop.f32.mrb[97].mxu1  ;;  %v4920_v53 = vpop.f32.mrb[98].mxu0  ;;  %v6472_v12 = vmax.bf16 %v6894_v26, %v2730_v28  ;;  %v2888_v60 = vadd.f32 %v2887_v50, %v6254_v44 }
 0x3f6   : > { %v3009_v52 = vadd.f32 %v3008_v49, %v6254_v44  ;;  %v4944_v10 = vpop.f32.mrb[98].mxu1  ;;  %v2890_v3 = vpop.f32.mrb[99].mxu0  ;;  %v2899_v41 = vadd.f32 %v4920_v53, %v6256_v21  ;;  %v2952_v20 = vmax.f32 %v2896_v54, 0.0  ;;  %v6895_v54 = vmax.bf16 %v6383_v7, %v6378_v30 }
 0x3f7   : > { %v3020_v23 = vadd.f32 %v4944_v10, %v6256_v21  ;;  %v3011_v4 = vpop.f32.mrb[99].mxu1  ;;  %v2891_v46 = vadd.f32 %v2890_v3, %v6252_v40  ;;  %v3073_v31 = vmax.f32 %v3017_v17, 0.0  ;;  %v2950_v28 = vmax.f32 %v2888_v60, 0.0 }
 0x3f8   : > { %v3012_v58 = vadd.f32 %v3011_v4, %v6252_v40  ;;  %v2953_v51 = vmax.f32 %v2899_v41, 0.0  ;;  %v3071_v29 = vmax.f32 %v3009_v52, 0.0 }
 0x3f9   : > { %v3074_v8 = vmax.f32 %v3020_v23, 0.0  ;;  %v2951_v50 = vmax.f32 %v2891_v46, 0.0  ;;  %v6896_v23 = vmax.bf16 %v6391_v19, %v6385_v9 }
 0x3fa   : > { %v3072_v49 = vmax.f32 %v3012_v58, 0.0  ;;  %v2967_v26 = vpack.c.bf16 %v2953_v51, %v2952_v20 }
 0x3fb   : > { %v6482_v53 = vpack.c.bf16 %v3074_v8, %v3073_v31  ;;  %v4923_v10 = vpop.f32.mrb[100].mxu0  ;;  %v2966_v24 = vpack.c.bf16 %v2951_v50, %v2950_v28 }
 0x3fc   : > { %v6484_v62 = vpack.c.bf16 %v3072_v49, %v3071_v29  ;;  %v2912_v59 = vadd.f32 %v4923_v10, %v6266_v14  ;;  %v4947_v3 = vpop.f32.mrb[100].mxu1  ;;  %v2903_v48 = vpop.f32.mrb[101].mxu0  ;;  %v6490_v17 = vmax.bf16 %v6895_v54, %v2967_v26 }
 0x3fd   : > { %v3033_v60 = vadd.f32 %v4947_v3, %v6266_v14  ;;  %v3024_v52 = vpop.f32.mrb[101].mxu1  ;;  %v4924_v41 = vpop.f32.mrb[102].mxu0  ;;  %v6496_v4 = vmax.bf16 %v6896_v23, %v2966_v24  ;;  %v2904_v46 = vadd.f32 %v2903_v48, %v6262_v34  ;;  %v6897_v23 = vmax.bf16 %v6409_v22, %v6404_v32 }
 0x3fe   : > { %v2915_v58 = vadd.f32 %v4924_v41, %v6264_v13  ;;  %v4948_v20 = vpop.f32.mrb[102].mxu1  ;;  %v2906_v31 = vpop.f32.mrb[103].mxu0  ;;  %v3025_v7 = vadd.f32 %v3024_v52, %v6262_v34  ;;  %v2956_v9 = vmax.f32 %v2912_v59, 0.0 }
 0x3ff   : > { %v3036_v51 = vadd.f32 %v4948_v20, %v6264_v13  ;;  %v3027_v8 = vpop.f32.mrb[103].mxu1  ;;  %v2907_v24 = vadd.f32 %v2906_v31, %v6260_v63  ;;  %v3077_v48 = vmax.f32 %v3033_v60, 0.0  ;;  %v2954_v49 = vmax.f32 %v2904_v46, 0.0 }
 0x400   : > { %v2957_v19 = vmax.f32 %v2915_v58, 0.0  ;;  %v3028_v50 = vadd.f32 %v3027_v8, %v6260_v63  ;;  %v3075_v3 = vmax.f32 %v3025_v7, 0.0 }
 0x401   : > { %v3078_v29 = vmax.f32 %v3036_v51, 0.0  ;;  %v2955_v10 = vmax.f32 %v2907_v24, 0.0 }
 0x402   : > { %v2969_v26 = vpack.c.bf16 %v2957_v19, %v2956_v9  ;;  %v3076_v52 = vmax.f32 %v3028_v50, 0.0  ;;  %v6898_v19 = vmax.bf16 %v6420_v61, %v6411_v45 }
 0x403   : > { %v6508_v54 = vpack.c.bf16 %v3078_v29, %v3077_v48  ;;  %v4927_v41 = vpop.f32.mrb[104].mxu0  ;;  %v2968_v59 = vpack.c.bf16 %v2955_v10, %v2954_v49 }
 0x404   : > { %v6513_v20 = vmax.bf16 %v6897_v23, %v2969_v26  ;;  %v4951_v58 = vpop.f32.mrb[104].mxu1  ;;  %v2919_v31 = vpop.f32.mrb[105].mxu0  ;;  %v6515_v60 = vpack.c.bf16 %v3076_v52, %v3075_v3  ;;  %v2928_v51 = vadd.f32 %v4927_v41, %v6284_v18 }
 0x405   : > { %v3049_v46 = vadd.f32 %v4951_v58, %v6284_v18  ;;  %v3040_v8 = vpop.f32.mrb[105].mxu1  ;;  %v4928_v7 = vpop.f32.mrb[106].mxu0  ;;  %v6524_v22 = vmax.bf16 %v6898_v19, %v2968_v59  ;;  %v2920_v32 = vadd.f32 %v2919_v31, %v6270_v6 }
 0x406   : > { %v3041_v24 = vadd.f32 %v3040_v8, %v6270_v6  ;;  %v4952_v48 = vpop.f32.mrb[106].mxu1  ;;  %v2922_v29 = vpop.f32.mrb[107].mxu0  ;;  %v2931_v50 = vadd.f32 %v4928_v7, %v6280_v27  ;;  %v2960_v61 = vmax.f32 %v2928_v51, 0.0  ;;  %v6899_v51 = vmax.bf16 %v6438_v37, %v6430_v1 }
 0x407   : > { %v3052_v49 = vadd.f32 %v4952_v48, %v6280_v27  ;;  %v3043_v26 = vpop.f32.mrb[107].mxu1  ;;  %v2923_v3 = vadd.f32 %v2922_v29, %v6268_v33  ;;  %v3081_v52 = vmax.f32 %v3049_v46, 0.0  ;;  %v2958_v59 = vmax.f32 %v2920_v32, 0.0 }
 0x408   : > { %v3044_v45 = vadd.f32 %v3043_v26, %v6268_v33  ;;  %v2961_v41 = vmax.f32 %v2931_v50, 0.0  ;;  %v3079_v58 = vmax.f32 %v3041_v24, 0.0 }
 0x409   : > { %v3082_v23 = vmax.f32 %v3052_v49, 0.0  ;;  %v2959_v31 = vmax.f32 %v2923_v3, 0.0  ;;  %v6900_v49 = vmax.bf16 %v6444_v2, %v6432_v36 }
 0x40a   : > { %v3080_v8 = vmax.f32 %v3044_v45, 0.0  ;;  %v2971_v19 = vpack.c.bf16 %v2961_v41, %v2960_v61 }
 0x40b   : > { %v6534_v7 = vpack.c.bf16 %v3082_v23, %v3081_v52  ;;  %v4931_v48 = vpop.f32.mrb[108].mxu0  ;;  %v2970_v9 = vpack.c.bf16 %v2959_v31, %v2958_v59 }
 0x40c   : > { %v6536_v28 = vpack.c.bf16 %v3080_v8, %v3079_v58  ;;  %v2944_v10 = vadd.f32 %v4931_v48, %v6338_v42  ;;  %v4955_v29 = vpop.f32.mrb[108].mxu1  ;;  %v2935_v30 = vpop.f32.mrb[109].mxu0  ;;  %v6542_v46 = vmax.bf16 %v6899_v51, %v2971_v19 }
 0x40d   : > { %v3065_v32 = vadd.f32 %v4955_v29, %v6338_v42  ;;  %v3056_v24 = vpop.f32.mrb[109].mxu1  ;;  %v4932_v50 = vpop.f32.mrb[110].mxu0  ;;  %v6548_v26 = vmax.bf16 %v6900_v49, %v2970_v9  ;;  %v2936_v3 = vadd.f32 %v2935_v30, %v6314_v0  ;;  %v6901_v49 = vmax.bf16 %v6461_v5, %v6456_v43 }
 0x40e   : > { %v2947_v45 = vadd.f32 %v4932_v50, %v6334_v35  ;;  %v4956_v61 = vpop.f32.mrb[110].mxu1  ;;  %v2938_v52 = vpop.f32.mrb[111].mxu0  ;;  %v3374_v1 = vmax.bf16 %v6542_v46, %v6534_v7  ;;  %v3057_v37 = vadd.f32 %v3056_v24, %v6314_v0  ;;  %v2964_v36 = vmax.f32 %v2944_v10, 0.0 }
 0x40f   : > { %v3068_v41 = vadd.f32 %v4956_v61, %v6334_v35  ;;  %v3059_v23 = vpop.f32.mrb[111].mxu1  ;;  %v3373_v59 = vmax.bf16 %v6548_v26, %v6536_v28  ;;  %v2939_v9 = vadd.f32 %v2938_v52, %v6310_v57  ;;  %v3085_v30 = vmax.f32 %v3065_v32, 0.0 }
 0x410   : > { %v2965_v2 = vmax.f32 %v2947_v45, 0.0  ;;  %v3060_v31 = vadd.f32 %v3059_v23, %v6310_v57  ;;  %v2962_v8 = vmax.f32 %v2936_v3, 0.0  ;;  %v3083_v29 = vmax.f32 %v3057_v37, 0.0 }
 0x411   : > { %v3086_v58 = vmax.f32 %v3068_v41, 0.0  ;;  %v2963_v48 = vmax.f32 %v2939_v9, 0.0 }
 0x412   : > { %v2973_v19 = vpack.c.bf16 %v2965_v2, %v2964_v36  ;;  %v3084_v24 = vmax.f32 %v3060_v31, 0.0  ;;  %v6902_v2 = vmax.bf16 %v6472_v12, %v6463_v25 }
 0x413   : > { %v6560_v51 = vpack.c.bf16 %v3086_v58, %v3085_v30  ;;  %v4967_v50 = vpop.f32.mrb[112].mxu0  ;;  %v2972_v10 = vpack.c.bf16 %v2963_v48, %v2962_v8 }
 0x414   : > { %v6565_v61 = vmax.bf16 %v6901_v49, %v2973_v19  ;;  %v4991_v45 = vpop.f32.mrb[112].mxu1  ;;  %v3129_v52 = vpop.f32.mrb[113].mxu0  ;;  %v6567_v32 = vpack.c.bf16 %v3084_v24, %v3083_v29  ;;  %v3138_v41 = vadd.f32 %v4967_v50, %v6258_v16 }
 0x415   : > { %v3259_v3 = vadd.f32 %v4991_v45, %v6258_v16  ;;  %v3250_v23 = vpop.f32.mrb[113].mxu1  ;;  %v4968_v37 = vpop.f32.mrb[114].mxu0  ;;  %v6576_v43 = vmax.bf16 %v6902_v2, %v2972_v10  ;;  %v3130_v5 = vadd.f32 %v3129_v52, %v6254_v44 }
 0x416   : > { %v3251_v9 = vadd.f32 %v3250_v23, %v6254_v44  ;;  %v4992_v30 = vpop.f32.mrb[114].mxu1  ;;  %v3132_v58 = vpop.f32.mrb[115].mxu0  ;;  %v3141_v31 = vadd.f32 %v4968_v37, %v6256_v21  ;;  %v3194_v12 = vmax.f32 %v3138_v41, 0.0 }
 0x417   : > { %v3262_v16 = vadd.f32 %v4992_v30, %v6256_v21  ;;  %v3253_v8 = vpop.f32.mrb[115].mxu1  ;;  %v3133_v48 = vadd.f32 %v3132_v58, %v6252_v40  ;;  %v3315_v29 = vmax.f32 %v3259_v3, 0.0  ;;  %v3192_v49 = vmax.f32 %v3130_v5, 0.0 }
 0x418   : > { %v3254_v25 = vadd.f32 %v3253_v8, %v6252_v40  ;;  %v3195_v24 = vmax.f32 %v3141_v31, 0.0  ;;  %v3313_v44 = vmax.f32 %v3251_v9, 0.0  ;;  %v6903_v40 = vmax.bf16 %v6490_v17, %v6482_v53 }
 0x419   : > { %v3316_v50 = vmax.f32 %v3262_v16, 0.0  ;;  %v3193_v10 = vmax.f32 %v3133_v48, 0.0  ;;  %v6904_v31 = vmax.bf16 %v6496_v4, %v6484_v62 }
 0x41a   : > { %v3314_v45 = vmax.f32 %v3254_v25, 0.0  ;;  %v3209_v52 = vpack.c.bf16 %v3195_v24, %v3194_v12 }
 0x41b   : > { %v3330_v23 = vpack.c.bf16 %v3316_v50, %v3315_v29  ;;  %v4971_v37 = vpop.f32.mrb[116].mxu0  ;;  %v3208_v21 = vpack.c.bf16 %v3193_v10, %v3192_v49 }
 0x41c   : > { %v3329_v2 = vpack.c.bf16 %v3314_v45, %v3313_v44  ;;  %v3154_v30 = vadd.f32 %v4971_v37, %v6266_v14  ;;  %v4995_v19 = vpop.f32.mrb[116].mxu1  ;;  %v3145_v36 = vpop.f32.mrb[117].mxu0  ;;  %v3378_v41 = vmax.bf16 %v6903_v40, %v3209_v52 }
 0x41d   : > { %v3275_v3 = vadd.f32 %v4995_v19, %v6266_v14  ;;  %v3146_v5 = vadd.f32 %v3145_v36, %v6262_v34  ;;  %v3266_v9 = vpop.f32.mrb[117].mxu1  ;;  %v4972_v58 = vpop.f32.mrb[118].mxu0  ;;  %v3377_v16 = vmax.bf16 %v6904_v31, %v3208_v21 }
 0x41e   : > { %v3267_v8 = vadd.f32 %v3266_v9, %v6262_v34  ;;  %v3157_v48 = vadd.f32 %v4972_v58, %v6264_v13  ;;  %v4996_v25 = vpop.f32.mrb[118].mxu1  ;;  %v3148_v12 = vpop.f32.mrb[119].mxu0  ;;  %v3198_v29 = vmax.f32 %v3154_v30, 0.0  ;;  %v3386_v44 = vmax.bf16 %v3378_v41, %v3330_v23 }
 0x41f   : > { %v3278_v53 = vadd.f32 %v4996_v25, %v6264_v13  ;;  %v3149_v17 = vadd.f32 %v3148_v12, %v6260_v63  ;;  %v3269_v14 = vpop.f32.mrb[119].mxu1  ;;  %v3319_v19 = vmax.f32 %v3275_v3, 0.0  ;;  %v3385_v50 = vmax.bf16 %v3377_v16, %v3329_v2 }
 0x420   : > { %v3199_v36 = vmax.f32 %v3157_v48, 0.0  ;;  %v3270_v24 = vadd.f32 %v3269_v14, %v6260_v63  ;;  %v3196_v49 = vmax.f32 %v3146_v5, 0.0  ;;  %v3317_v34 = vmax.f32 %v3267_v8, 0.0 }
 0x421   : > { %v3320_v62 = vmax.f32 %v3278_v53, 0.0  ;;  %v3197_v4 = vmax.f32 %v3149_v17, 0.0  ;;  %4493 = vmatprep.subr.bf16.mxu0 %v3385_v50  ;;  %5005 = vmatprep.subr.bf16.mxu1 %v3385_v50  ;;  %v6905_v63 = vmax.bf16 %v6513_v20, %v6508_v54  ;;  %v6906_v41 = vmax.bf16 %v6524_v22, %v6515_v60 }
 0x422   : > { %v3211_v10 = vpack.c.bf16 %v3199_v36, %v3198_v29  ;;  %v3318_v45 = vmax.f32 %v3270_v24, 0.0  ;;  %4494 = vmatpush3.bf16.msra.mxu0 %v5681_v39  ;;  %5013 = vmatpush3.bf16.msra.mxu1 %v5681_v39 }
 0x423   : > { %v3332_v52 = vpack.c.bf16 %v3320_v62, %v3319_v19  ;;  %v3210_v37 = vpack.c.bf16 %v3197_v4, %v3196_v49  ;;  %v4975_v13 = vpop.f32.mrb[120].mxu0  ;;  %4495 = vmatprep.subr.bf16.mxu0 %v3386_v44  ;;  %5006 = vmatprep.subr.bf16.mxu1 %v3386_v44 }
 0x424   : > { %v3380_v21 = vmax.bf16 %v6905_v63, %v3211_v10  ;;  %v3331_v2 = vpack.c.bf16 %v3318_v45, %v3317_v34  ;;  %v3170_v30 = vadd.f32 %v4975_v13, %v6284_v18  ;;  %v4999_v23 = vpop.f32.mrb[120].mxu1  ;;  %v3161_v40 = vpop.f32.mrb[121].mxu0 }
 0x425   : > { %v3379_v3 = vmax.bf16 %v6906_v41, %v3210_v37  ;;  %v3291_v5 = vadd.f32 %v4999_v23, %v6284_v18  ;;  %v3162_v39 = vadd.f32 %v3161_v40, %v6270_v6  ;;  %v3282_v9 = vpop.f32.mrb[121].mxu1  ;;  %v4976_v58 = vpop.f32.mrb[122].mxu0 }
 0x426   : > { %v3283_v54 = vadd.f32 %v3282_v9, %v6270_v6  ;;  %v3173_v20 = vadd.f32 %v4976_v58, %v6280_v27  ;;  %v5000_v31 = vpop.f32.mrb[122].mxu1  ;;  %v3164_v16 = vpop.f32.mrb[123].mxu0  ;;  %v3388_v8 = vmax.bf16 %v3380_v21, %v3332_v52  ;;  %4496 = vmatpush3.bf16.msra.mxu0 %v5675_v38  ;;  %5014 = vmatpush3.bf16.msra.mxu1 %v5675_v38  ;;  %v3202_v18 = vmax.f32 %v3170_v30, 0.0 }
 0x427   : > { %v3294_v48 = vadd.f32 %v5000_v31, %v6280_v27  ;;  %v3165_v25 = vadd.f32 %v3164_v16, %v6268_v33  ;;  %v3285_v12 = vpop.f32.mrb[123].mxu1  ;;  %v3387_v29 = vmax.bf16 %v3379_v3, %v3331_v2  ;;  %v3323_v6 = vmax.f32 %v3291_v5, 0.0  ;;  %v5110_v16 = vld [vmem:[%s6879_s9 + $0x24] ss:$8 sps:$4 sm:$0xff]  }
 0x428   : > { %v3203_v60 = vmax.f32 %v3173_v20, 0.0  ;;  %v3286_v22 = vadd.f32 %v3285_v12, %v6268_v33  ;;  %v3200_v53 = vmax.f32 %v3162_v39, 0.0  ;;  %v3321_v19 = vmax.f32 %v3283_v54, 0.0  ;;  %v5116_v12 = vld [vmem:[%s6879_s9 + $0x34] ss:$8 sps:$4 sm:$0xff]  }
 0x429   : > { %v3324_v17 = vmax.f32 %v3294_v48, 0.0  ;;  %v3201_v14 = vmax.f32 %v3165_v25, 0.0  ;;  %4497 = vmatprep.subr.bf16.mxu0 %v3387_v29  ;;  %5007 = vmatprep.subr.bf16.mxu1 %v3387_v29  ;;  %v6908_v58 = vmax.bf16 %v6576_v43, %v6567_v32  ;;  %v5108_v32 = vld [vmem:[%s6879_s9 + $0x10] ss:$8 sps:$4 sm:$0xff]   ;;  %v5114_v48 = vld [vmem:[%s6879_s9 + $0x20] ss:$8 sps:$4 sm:$0xff]  }
 0x42a   : > { %v3213_v36 = vpack.c.bf16 %v3203_v60, %v3202_v18  ;;  %v3322_v24 = vmax.f32 %v3286_v22, 0.0  ;;  %4498 = vmatpush3.bf16.msra.mxu0 %v5781_v56  ;;  %5015 = vmatpush3.bf16.msra.mxu1 %v5781_v56  ;;  %v5109_v43 = vld [vmem:[%s6879_s9 + $0x90] ss:$8 sps:$4 sm:$0xff]   ;;  %v5115_v25 = vld [vmem:[%s6879_s9 + $0xa0] ss:$8 sps:$4 sm:$0xff]  }
 0x42b   : > { %v3334_v27 = vpack.c.bf16 %v3324_v17, %v3323_v6  ;;  %v3212_v50 = vpack.c.bf16 %v3201_v14, %v3200_v53  ;;  %v4979_v38 = vpop.f32.mrb[124].mxu0  ;;  %4499 = vmatprep.subr.bf16.mxu0 %v3388_v8  ;;  %5008 = vmatprep.subr.bf16.mxu1 %v3388_v8  ;;  %v5112_v8 = vld [vmem:[%s6879_s9 + $0xa4] ss:$8 sps:$4 sm:$0xff]   ;;  %v5118_v18 = vld [vmem:[%s6879_s9 + $0xb4] ss:$8 sps:$4 sm:$0xff]  }
 0x42c   : > { %v3382_v33 = vmax.bf16 %v3374_v1, %v3213_v36  ;;  %v3333_v49 = vpack.c.bf16 %v3322_v24, %v3321_v19  ;;  %v3186_v62 = vadd.f32 %v4979_v38, %v6338_v42  ;;  %v5003_v4 = vpop.f32.mrb[124].mxu1  ;;  %v3177_v44 = vpop.f32.mrb[125].mxu0  ;;  %v5120_v60 = vld [vmem:[%s6879_s9 + $0x30] ss:$8 sps:$4 sm:$0xff]   ;;  %v5122_v29 = vld [vmem:[%s6879_s9 + $0x44] ss:$8 sps:$4 sm:$0xff]  }
 0x42d   : > { %v3381_v34 = vmax.bf16 %v3373_v59, %v3212_v50  ;;  %v3307_v10 = vadd.f32 %v5003_v4, %v6338_v42  ;;  %v3178_v56 = vadd.f32 %v3177_v44, %v6314_v0  ;;  %v3298_v45 = vpop.f32.mrb[125].mxu1  ;;  %v4980_v52 = vpop.f32.mrb[126].mxu0  ;;  %v5121_v22 = vld [vmem:[%s6879_s9 + $0xb0] ss:$8 sps:$4 sm:$0xff]   ;;  %v5124_v6 = vld [vmem:[%s6879_s9 + $0xc4] ss:$8 sps:$4 sm:$0xff]  }
 0x42e   : > { %v3299_v7 = vadd.f32 %v3298_v45, %v6314_v0  ;;  %v3189_v46 = vadd.f32 %v4980_v52, %v6334_v35  ;;  %v5004_v1 = vpop.f32.mrb[126].mxu1  ;;  %v3180_v37 = vpop.f32.mrb[127].mxu0  ;;  %v3390_v13 = vmax.bf16 %v3382_v33, %v3334_v27  ;;  %4500 = vmatpush3.bf16.msra.mxu0 %v5777_v55  ;;  %5016 = vmatpush3.bf16.msra.mxu1 %v5777_v55  ;;  %v3206_v42 = vmax.f32 %v3186_v62, 0.0  ;;  %v5126_v53 = vld [vmem:[%s6879_s9 + $0x40] ss:$8 sps:$4 sm:$0xff]  }
 0x42f   : > { %v3310_v63 = vadd.f32 %v5004_v1, %v6334_v35  ;;  %v3181_v21 = vadd.f32 %v3180_v37, %v6310_v57  ;;  %v3301_v2 = vpop.f32.mrb[127].mxu1  ;;  %v3389_v59 = vmax.bf16 %v3381_v34, %v3333_v49  ;;  %v3327_v0 = vmax.f32 %v3307_v10, 0.0  ;;  %v5127_v17 = vld [vmem:[%s6879_s9 + $0xc0] ss:$8 sps:$4 sm:$0xff]   ;;  %v5128_v14 = vld [vmem:[%s6879_s9 + $0x54] ss:$8 sps:$4 sm:$0xff]   ;;  %v3460_v34 = vpop.permute.xlu0 %3459 }
 0x430   : > { %v3207_v28 = vmax.f32 %v3189_v46, 0.0  ;;  %v3302_v26 = vadd.f32 %v3301_v2, %v6310_v57  ;;  %v3204_v30 = vmax.f32 %v3178_v56, 0.0  ;;  %v3325_v41 = vmax.f32 %v3299_v7, 0.0  ;;  %v5130_v19 = vld [vmem:[%s6879_s9 + $0xd4] ss:$8 sps:$4 sm:$0xff]   ;;  %v3465_v10 = vpop.permute.xlu1 %3464 }
 0x431   : > { %v3328_v23 = vmax.f32 %v3310_v63, 0.0  ;;  %v3205_v40 = vmax.f32 %v3181_v21, 0.0  ;;  %4501 = vmatprep.subr.bf16.mxu0 %v3389_v59  ;;  %5009 = vmatprep.subr.bf16.mxu1 %v3389_v59  ;;  %v6907_v55 = vmax.bf16 %v6565_v61, %v6560_v51  ;;  %v5101_v51 = vld [vmem:[%s6879_s9 + $0x80] ss:$8 sps:$4 sm:$0xff]   ;;  %v5132_v36 = vld [vmem:[%s6879_s9 + $0x50] ss:$8 sps:$4 sm:$0xff]  }
 0x432   : > { %v3215_v3 = vpack.c.bf16 %v3207_v28, %v3206_v42  ;;  %v3326_v5 = vmax.f32 %v3302_v26, 0.0  ;;  %4502 = vmatpush3.bf16.msra.mxu0 %v6136_v15  ;;  %5017 = vmatpush3.bf16.msra.mxu1 %v6136_v15  ;;  %v5098_v15 = vld [vmem:[%s6879_s9] ss:$8 sps:$4 sm:$0xff]   ;;  %v5133_v24 = vld [vmem:[%s6879_s9 + $0xd0] ss:$8 sps:$4 sm:$0xff]  }
 0x433   : > { %v3336_v35 = vpack.c.bf16 %v3328_v23, %v3327_v0  ;;  %v3214_v39 = vpack.c.bf16 %v3205_v40, %v3204_v30  ;;  %4503 = vmatprep.subr.bf16.mxu0 %v3390_v13  ;;  %5010 = vmatprep.subr.bf16.mxu1 %v3390_v13  ;;  %v6909_v61 = vld [vmem:[#allocation5_spill] sm:$0xff]  ;;  %v5140_v49 = vld [vmem:[%s6879_s9 + $0x74] ss:$8 sps:$4 sm:$0xff]   ;;  %v5144_v4 = vld [vmem:[%s6879_s9 + $0x70] ss:$8 sps:$4 sm:$0xff]   ;;  %v3470_v56 = vpop.permute.xlu0 %3469 }
 0x434   : > { %v3384_v57 = vmax.bf16 %v6907_v55, %v3215_v3  ;;  %v3335_v9 = vpack.c.bf16 %v3326_v5, %v3325_v41  ;;  %v5134_v27 = vld [vmem:[%s6879_s9 + $0x64] ss:$8 sps:$4 sm:$0xff]   ;;  %v5138_v38 = vld [vmem:[%s6879_s9 + $0x60] ss:$8 sps:$4 sm:$0xff]   ;;  %v5142_v62 = vld [vmem:[%s6879_s9 + $0xf4] ss:$8 sps:$4 sm:$0xff]   ;;  %v3475_v45 = vpop.permute.xlu1 %3474 }
 0x435   : > { %v3383_v54 = vmax.bf16 %v6908_v58, %v3214_v39  ;;  %v5136_v50 = vld [vmem:[%s6879_s9 + $0xe4] ss:$8 sps:$4 sm:$0xff]   ;;  %v5139_v33 = vld [vmem:[%s6879_s9 + $0xe0] ss:$8 sps:$4 sm:$0xff]   ;;  %v5145_v44 = vld [vmem:[%s6879_s9 + $0xf0] ss:$8 sps:$4 sm:$0xff]  }
 0x436   : > { %v3392_v20 = vmax.bf16 %v3384_v57, %v3336_v35  ;;  %4504 = vmatpush3.bf16.msra.mxu0 %v6141_v47  ;;  %5018 = vmatpush3.bf16.msra.mxu1 %v6141_v47  ;;  %v5104_v47 = vld [vmem:[%s6879_s9 + $0x14] ss:$8 sps:$4 sm:$0xff]  }
 0x437   : > { %v3391_v31 = vmax.bf16 %v3383_v54, %v3335_v9  ;;  %v6740_v52 = vpop.permute.xlu0 %3479 }
 0x438   : > { %v6742_v7 = vpop.permute.xlu1 %3484 }
 0x439   : > { %4505 = vmatprep.subr.bf16.mxu0 %v3391_v31  ;;  %5011 = vmatprep.subr.bf16.mxu1 %v3391_v31 }
 0x43a   : > { %4506 = vmatpush3.bf16.msra.mxu0 %v6159_v11  ;;  %5019 = vmatpush3.bf16.msra.mxu1 %v6159_v11  ;;  %v5106_v11 = vld [vmem:[%s6879_s9 + $0x94] ss:$8 sps:$4 sm:$0xff]  }
 0x43b   : > { %4507 = vmatprep.subr.bf16.mxu0 %v3392_v20  ;;  %5012 = vmatprep.subr.bf16.mxu1 %v3392_v20  ;;  %v6744_v46 = vpop.permute.xlu0 %3489 }
 0x43c   : > { %v6746_v1 = vpop.permute.xlu1 %3494 }
 0x43e   : > { %4508 = vmatpush3.bf16.msra.mxu0 %v6909_v61  ;;  %5020 = vmatpush3.bf16.msra.mxu1 %v6909_v61 }
 0x43f   : > { %v6748_v37 = vpop.permute.xlu0 %3499 }
 0x440   : > { %v6750_v13 = vpop.permute.xlu1 %3504 }
 0x441   : > { %3810 = vmatmul.mubr.bf16.vlgmr.msra.gmra.mrb[128].mxu0 %v5098_v15  ;;  %3874 = vmatmul.mubr.bf16.vlgmr.msra.gmra.mrb[128].mxu1 %v5101_v51 }
 0x442   : > { %3817 = vmatprep.mubr.bf16.mxu0 %v5104_v47  ;;  %3881 = vmatprep.mubr.bf16.mxu1 %v5106_v11 }
 0x443   : > { %v6752_v63 = vpop.permute.xlu0 %3509 }
 0x444   : > { %v6754_v21 = vpop.permute.xlu1 %3514 }
 0x447   : > { %v6756_v2 = vpop.permute.xlu0 %3519 }
 0x448   : > { %v6758_v42 = vpop.permute.xlu1 %3524 }
 0x449   : > { %3818 = vmatmul.mubr.bf16.gmra.mrb[132].mxu0 %v5108_v32  ;;  %3882 = vmatmul.mubr.bf16.gmra.mrb[132].mxu1 %v5109_v43 }
 0x44a   : > { %3825 = vmatprep.mubr.bf16.mxu0 %v5110_v16  ;;  %3889 = vmatprep.mubr.bf16.mxu1 %v5112_v8 }
 0x44b   : > { %v6760_v28 = vpop.permute.xlu0 %3529 }
 0x44c   : > { %v6762_v26 = vpop.permute.xlu1 %3534 }
 0x44f   : > { %v3540_v59 = vpop.permute.xlu0 %3539 }
 0x450   : > { %v3545_v20 = vpop.permute.xlu1 %3544 }
 0x451   : > { %3826 = vmatmul.mubr.bf16.gmra.mrb[136].mxu0 %v5114_v48  ;;  %3890 = vmatmul.mubr.bf16.gmra.mrb[136].mxu1 %v5115_v25 }
 0x452   : > { %3833 = vmatprep.mubr.bf16.mxu0 %v5116_v12  ;;  %3897 = vmatprep.mubr.bf16.mxu1 %v5118_v18 }
 0x453   : > { %v3550_v47 = vpop.permute.xlu0 %3549 }
 0x459   : > { %3834 = vmatmul.mubr.bf16.gmra.mrb[140].mxu0 %v5120_v60  ;;  %3898 = vmatmul.mubr.bf16.gmra.mrb[140].mxu1 %v5121_v22 }
 0x45a   : > { %3841 = vmatprep.mubr.bf16.mxu0 %v5122_v29  ;;  %3905 = vmatprep.mubr.bf16.mxu1 %v5124_v6 }
 0x461   : > { %3842 = vmatmul.mubr.bf16.gmra.mrb[144].mxu0 %v5126_v53  ;;  %3906 = vmatmul.mubr.bf16.gmra.mrb[144].mxu1 %v5127_v17 }
 0x462   : > { %3849 = vmatprep.mubr.bf16.mxu0 %v5128_v14  ;;  %3913 = vmatprep.mubr.bf16.mxu1 %v5130_v19  ;;  %v3555_v19 = vpop.permute.xlu1 %3554 }
 0x469   : > { %3850 = vmatmul.mubr.bf16.gmra.mrb[148].mxu0 %v5132_v36  ;;  %3914 = vmatmul.mubr.bf16.gmra.mrb[148].mxu1 %v5133_v24 }
 0x46a   : > { %3857 = vmatprep.mubr.bf16.mxu0 %v5134_v27  ;;  %3921 = vmatprep.mubr.bf16.mxu1 %v5136_v50 }
 0x471   : > { %3858 = vmatmul.mubr.bf16.gmra.mrb[152].mxu0 %v5138_v38  ;;  %3922 = vmatmul.mubr.bf16.gmra.mrb[152].mxu1 %v5139_v33  ;;  %v3560_v38 = vpop.permute.xlu0 %3559 }
 0x472   : > { %3865 = vmatprep.mubr.bf16.mxu0 %v5140_v49  ;;  %3929 = vmatprep.mubr.bf16.mxu1 %v5142_v62 }
 0x479   : > { %3866 = vmatmul.mubr.bf16.gmra.mrb[156].mxu0 %v5144_v4  ;;  %3930 = vmatmul.mubr.bf16.gmra.mrb[156].mxu1 %v5145_v44 }
 0x514   : > { %v4509_v0 = vpop.f32.mrb[128].mxu0  ;;  %v4557_v30 = vpop.f32.mrb[128].mxu1 }
 0x515   : > { %v4510_v23 = vpop.f32.mrb[129].mxu0  ;;  %v4558_v40 = vpop.f32.mrb[129].mxu1 }
 0x516   : > { %v4511_v41 = vadd.f32 %v4510_v23, %v4509_v0  ;;  %v4559_v3 = vadd.f32 %v4558_v40, %v4557_v30  ;;  %v4512_v5 = vpop.f32.mrb[130].mxu0  ;;  %v4560_v35 = vpop.f32.mrb[130].mxu1 }
 0x517   : > { %v4513_v39 = vpop.f32.mrb[131].mxu0  ;;  %v4561_v55 = vpop.f32.mrb[131].mxu1 }
 0x518   : > { %v3812_v57 = vadd.f32 %v4511_v41, %v3460_v34  ;;  %v3876_v9 = vadd.f32 %v4559_v3, %v3540_v59  ;;  %v4514_v58 = vadd.f32 %v4513_v39, %v4512_v5  ;;  %v4562_v54 = vadd.f32 %v4561_v55, %v4560_v35  ;;  %v3565_v5 = vpop.permute.xlu1 %3564 }
 0x51a   : > { %v3938_v31 = vmax.f32 %v3812_v57, 0.0  ;;  %v3954_v15 = vmax.f32 %v3876_v9, 0.0  ;;  %v3815_v51 = vadd.f32 %v4514_v58, %v3465_v10  ;;  %v3879_v61 = vadd.f32 %v4562_v54, %v3545_v20  ;;  %v3570_v9 = vpop.permute.xlu0 %3569 }
 0x51c   : > { %3970 = vst [vmem:[%s6767_s28] sm:$0xff] %v3938_v31  ;;  %3986 = vst [vmem:[%s6767_s28 + $0x80] sm:$0xff] %v3954_v15  ;;  %v3939_v11 = vmax.f32 %v3815_v51, 0.0  ;;  %v3955_v32 = vmax.f32 %v3879_v61, 0.0  ;;  %v4515_v43 = vpop.f32.mrb[132].mxu0  ;;  %v4563_v16 = vpop.f32.mrb[132].mxu1 }
 0x51d   : > { %v4516_v8 = vpop.f32.mrb[133].mxu0  ;;  %v4564_v48 = vpop.f32.mrb[133].mxu1 }
 0x51e   : > { %3971 = vst [vmem:[%s6767_s28 + $0x8] sm:$0xff] %v3939_v11  ;;  %3987 = vst [vmem:[%s6767_s28 + $0x88] sm:$0xff] %v3955_v32  ;;  %v4517_v25 = vadd.f32 %v4516_v8, %v4515_v43  ;;  %v4565_v12 = vadd.f32 %v4564_v48, %v4563_v16  ;;  %v4518_v18 = vpop.f32.mrb[134].mxu0  ;;  %v4566_v60 = vpop.f32.mrb[134].mxu1 }
 0x51f   : > { %v4519_v22 = vpop.f32.mrb[135].mxu0  ;;  %v4567_v29 = vpop.f32.mrb[135].mxu1 }
 0x520   : > { %v3820_v6 = vadd.f32 %v4517_v25, %v3470_v56  ;;  %v3884_v53 = vadd.f32 %v4565_v12, %v3550_v47  ;;  %v4520_v17 = vadd.f32 %v4519_v22, %v4518_v18  ;;  %v4568_v14 = vadd.f32 %v4567_v29, %v4566_v60  ;;  %v3575_v25 = vpop.permute.xlu1 %3574  ;;  %v3580_v29 = vpop.permute.xlu0 %3579 }
 0x522   : > { %v3940_v36 = vmax.f32 %v3820_v6, 0.0  ;;  %v3956_v24 = vmax.f32 %v3884_v53, 0.0  ;;  %v3823_v27 = vadd.f32 %v4520_v17, %v3475_v45  ;;  %v3887_v50 = vadd.f32 %v4568_v14, %v3555_v19 }
 0x524   : > { %3972 = vst [vmem:[%s6767_s28 + $0x10] sm:$0xff] %v3940_v36  ;;  %3988 = vst [vmem:[%s6767_s28 + $0x90] sm:$0xff] %v3956_v24  ;;  %v3941_v33 = vmax.f32 %v3823_v27, 0.0  ;;  %v3957_v49 = vmax.f32 %v3887_v50, 0.0  ;;  %v4521_v62 = vpop.f32.mrb[136].mxu0  ;;  %v4569_v4 = vpop.f32.mrb[136].mxu1 }
 0x525   : > { %v4522_v44 = vpop.f32.mrb[137].mxu0  ;;  %v4570_v34 = vpop.f32.mrb[137].mxu1 }
 0x526   : > { %3973 = vst [vmem:[%s6767_s28 + $0x18] sm:$0xff] %v3941_v33  ;;  %3989 = vst [vmem:[%s6767_s28 + $0x98] sm:$0xff] %v3957_v49  ;;  %v4523_v10 = vadd.f32 %v4522_v44, %v4521_v62  ;;  %v4571_v56 = vadd.f32 %v4570_v34, %v4569_v4  ;;  %v4524_v59 = vpop.f32.mrb[138].mxu0  ;;  %v4572_v0 = vpop.f32.mrb[138].mxu1 }
 0x527   : > { %v4525_v30 = vpop.f32.mrb[139].mxu0  ;;  %v4573_v45 = vpop.f32.mrb[139].mxu1 }
 0x528   : > { %v3828_v23 = vadd.f32 %v4523_v10, %v6740_v52  ;;  %v3892_v40 = vadd.f32 %v4571_v56, %v3560_v38  ;;  %v4526_v41 = vadd.f32 %v4525_v30, %v4524_v59  ;;  %v4574_v3 = vadd.f32 %v4573_v45, %v4572_v0  ;;  %v3585_v44 = vpop.permute.xlu1 %3584  ;;  %v3590_v0 = vpop.permute.xlu0 %3589 }
 0x52a   : > { %v3942_v35 = vmax.f32 %v3828_v23, 0.0  ;;  %v3958_v39 = vmax.f32 %v3892_v40, 0.0  ;;  %v3831_v55 = vadd.f32 %v4526_v41, %v6742_v7  ;;  %v3895_v57 = vadd.f32 %v4574_v3, %v3565_v5 }
 0x52c   : > { %3974 = vst [vmem:[%s6767_s28 + $0x20] sm:$0xff] %v3942_v35  ;;  %3990 = vst [vmem:[%s6767_s28 + $0xa0] sm:$0xff] %v3958_v39  ;;  %v3943_v58 = vmax.f32 %v3831_v55, 0.0  ;;  %v3959_v54 = vmax.f32 %v3895_v57, 0.0  ;;  %v4527_v20 = vpop.f32.mrb[140].mxu0  ;;  %v4575_v31 = vpop.f32.mrb[140].mxu1 }
 0x52d   : > { %v4528_v15 = vpop.f32.mrb[141].mxu0  ;;  %v4576_v52 = vpop.f32.mrb[141].mxu1 }
 0x52e   : > { %3975 = vst [vmem:[%s6767_s28 + $0x28] sm:$0xff] %v3943_v58  ;;  %3991 = vst [vmem:[%s6767_s28 + $0xa8] sm:$0xff] %v3959_v54  ;;  %v4529_v51 = vadd.f32 %v4528_v15, %v4527_v20  ;;  %v4577_v61 = vadd.f32 %v4576_v52, %v4575_v31  ;;  %v4530_v47 = vpop.f32.mrb[142].mxu0  ;;  %v4578_v11 = vpop.f32.mrb[142].mxu1 }
 0x52f   : > { %v4531_v32 = vpop.f32.mrb[143].mxu0  ;;  %v4579_v7 = vpop.f32.mrb[143].mxu1 }
 0x530   : > { %v3836_v43 = vadd.f32 %v4529_v51, %v6744_v46  ;;  %v3900_v16 = vadd.f32 %v4577_v61, %v3570_v9  ;;  %v4532_v8 = vadd.f32 %v4531_v32, %v4530_v47  ;;  %v4580_v48 = vadd.f32 %v4579_v7, %v4578_v11  ;;  %v3595_v20 = vpop.permute.xlu1 %3594  ;;  %v3600_v61 = vpop.permute.xlu0 %3599 }
 0x532   : > { %v3944_v12 = vmax.f32 %v3836_v43, 0.0  ;;  %v3960_v18 = vmax.f32 %v3900_v16, 0.0  ;;  %v3839_v60 = vadd.f32 %v4532_v8, %v6746_v1  ;;  %v3903_v22 = vadd.f32 %v4580_v48, %v3575_v25 }
 0x534   : > { %3976 = vst [vmem:[%s6767_s28 + $0x30] sm:$0xff] %v3944_v12  ;;  %3992 = vst [vmem:[%s6767_s28 + $0xb0] sm:$0xff] %v3960_v18  ;;  %v3945_v6 = vmax.f32 %v3839_v60, 0.0  ;;  %v3961_v53 = vmax.f32 %v3903_v22, 0.0  ;;  %v4533_v17 = vpop.f32.mrb[144].mxu0  ;;  %v4581_v14 = vpop.f32.mrb[144].mxu1 }
 0x535   : > { %v4534_v19 = vpop.f32.mrb[145].mxu0  ;;  %v4582_v46 = vpop.f32.mrb[145].mxu1 }
 0x536   : > { %3977 = vst [vmem:[%s6767_s28 + $0x38] sm:$0xff] %v3945_v6  ;;  %3993 = vst [vmem:[%s6767_s28 + $0xb8] sm:$0xff] %v3961_v53  ;;  %v4535_v36 = vadd.f32 %v4534_v19, %v4533_v17  ;;  %v4583_v24 = vadd.f32 %v4582_v46, %v4581_v14  ;;  %v4536_v27 = vpop.f32.mrb[146].mxu0  ;;  %v4584_v50 = vpop.f32.mrb[146].mxu1 }
 0x537   : > { %v4537_v38 = vpop.f32.mrb[147].mxu0  ;;  %v4585_v1 = vpop.f32.mrb[147].mxu1 }
 0x538   : > { %v3844_v33 = vadd.f32 %v4535_v36, %v6748_v37  ;;  %v3908_v49 = vadd.f32 %v4583_v24, %v3580_v29  ;;  %v4538_v62 = vadd.f32 %v4537_v38, %v4536_v27  ;;  %v4586_v4 = vadd.f32 %v4585_v1, %v4584_v50  ;;  %v3605_v6 = vpop.permute.xlu1 %3604  ;;  %v3610_v46 = vpop.permute.xlu0 %3609 }
 0x53a   : > { %v3946_v34 = vmax.f32 %v3844_v33, 0.0  ;;  %v3962_v10 = vmax.f32 %v3908_v49, 0.0  ;;  %v3847_v56 = vadd.f32 %v4538_v62, %v6750_v13  ;;  %v3911_v59 = vadd.f32 %v4586_v4, %v3585_v44 }
 0x53c   : > { %3978 = vst [vmem:[%s6767_s28 + $0x40] sm:$0xff] %v3946_v34  ;;  %3994 = vst [vmem:[%s6767_s28 + $0xc0] sm:$0xff] %v3962_v10  ;;  %v3947_v30 = vmax.f32 %v3847_v56, 0.0  ;;  %v3963_v45 = vmax.f32 %v3911_v59, 0.0  ;;  %v4539_v23 = vpop.f32.mrb[148].mxu0  ;;  %v4587_v40 = vpop.f32.mrb[148].mxu1 }
 0x53d   : > { %v4540_v41 = vpop.f32.mrb[149].mxu0  ;;  %v4588_v37 = vpop.f32.mrb[149].mxu1 }
 0x53e   : > { %3979 = vst [vmem:[%s6767_s28 + $0x48] sm:$0xff] %v3947_v30  ;;  %3995 = vst [vmem:[%s6767_s28 + $0xc8] sm:$0xff] %v3963_v45  ;;  %v4541_v3 = vadd.f32 %v4540_v41, %v4539_v23  ;;  %v4589_v5 = vadd.f32 %v4588_v37, %v4587_v40  ;;  %v4542_v35 = vpop.f32.mrb[150].mxu0  ;;  %v4590_v39 = vpop.f32.mrb[150].mxu1 }
 0x53f   : > { %v4543_v55 = vpop.f32.mrb[151].mxu0  ;;  %v4591_v13 = vpop.f32.mrb[151].mxu1 }
 0x540   : > { %v3852_v57 = vadd.f32 %v4541_v3, %v6752_v63  ;;  %v3916_v9 = vadd.f32 %v4589_v5, %v3590_v0  ;;  %v4544_v58 = vadd.f32 %v4543_v55, %v4542_v35  ;;  %v4592_v54 = vadd.f32 %v4591_v13, %v4590_v39  ;;  %v3615_v59 = vpop.permute.xlu1 %3614 }
 0x542   : > { %v3948_v31 = vmax.f32 %v3852_v57, 0.0  ;;  %v3964_v15 = vmax.f32 %v3916_v9, 0.0  ;;  %v3855_v52 = vadd.f32 %v4544_v58, %v6754_v21  ;;  %v3919_v51 = vadd.f32 %v4592_v54, %v3595_v20 }
 0x544   : > { %3980 = vst [vmem:[%s6767_s28 + $0x50] sm:$0xff] %v3948_v31  ;;  %3996 = vst [vmem:[%s6767_s28 + $0xd0] sm:$0xff] %v3964_v15  ;;  %v3949_v47 = vmax.f32 %v3855_v52, 0.0  ;;  %v3965_v11 = vmax.f32 %v3919_v51, 0.0  ;;  %v4545_v32 = vpop.f32.mrb[152].mxu0  ;;  %v4593_v7 = vpop.f32.mrb[152].mxu1 }
 0x545   : > { %v4546_v43 = vpop.f32.mrb[153].mxu0  ;;  %v4594_v63 = vpop.f32.mrb[153].mxu1 }
 0x546   : > { %3981 = vst [vmem:[%s6767_s28 + $0x58] sm:$0xff] %v3949_v47  ;;  %3997 = vst [vmem:[%s6767_s28 + $0xd8] sm:$0xff] %v3965_v11  ;;  %v4547_v16 = vadd.f32 %v4546_v43, %v4545_v32  ;;  %v4595_v8 = vadd.f32 %v4594_v63, %v4593_v7  ;;  %v4548_v48 = vpop.f32.mrb[154].mxu0  ;;  %v4596_v25 = vpop.f32.mrb[154].mxu1 }
 0x547   : > { %v4549_v12 = vpop.f32.mrb[155].mxu0  ;;  %v4597_v21 = vpop.f32.mrb[155].mxu1 }
 0x548   : > { %v3860_v18 = vadd.f32 %v4547_v16, %v6756_v2  ;;  %v3924_v60 = vadd.f32 %v4595_v8, %v3600_v61  ;;  %v4550_v22 = vadd.f32 %v4549_v12, %v4548_v48  ;;  %v4598_v29 = vadd.f32 %v4597_v21, %v4596_v25 }
 0x54a   : > { %v3950_v53 = vmax.f32 %v3860_v18, 0.0  ;;  %v3966_v17 = vmax.f32 %v3924_v60, 0.0  ;;  %v3863_v14 = vadd.f32 %v4550_v22, %v6758_v42  ;;  %v3927_v19 = vadd.f32 %v4598_v29, %v3605_v6 }
 0x54c   : > { %3982 = vst [vmem:[%s6767_s28 + $0x60] sm:$0xff] %v3950_v53  ;;  %3998 = vst [vmem:[%s6767_s28 + $0xe0] sm:$0xff] %v3966_v17  ;;  %v3951_v36 = vmax.f32 %v3863_v14, 0.0  ;;  %v3967_v24 = vmax.f32 %v3927_v19, 0.0  ;;  %v4551_v27 = vpop.f32.mrb[156].mxu0  ;;  %v4599_v50 = vpop.f32.mrb[156].mxu1 }
 0x54d   : > { %v4552_v2 = vpop.f32.mrb[157].mxu0  ;;  %v4600_v38 = vpop.f32.mrb[157].mxu1 }
 0x54e   : > { %3983 = vst [vmem:[%s6767_s28 + $0x68] sm:$0xff] %v3951_v36  ;;  %3999 = vst [vmem:[%s6767_s28 + $0xe8] sm:$0xff] %v3967_v24  ;;  %v4553_v1 = vadd.f32 %v4552_v2, %v4551_v27  ;;  %v4601_v33 = vadd.f32 %v4600_v38, %v4599_v50  ;;  %v4554_v49 = vpop.f32.mrb[158].mxu0  ;;  %v4602_v62 = vpop.f32.mrb[158].mxu1 }
 0x54f   : > { %v4555_v42 = vpop.f32.mrb[159].mxu0  ;;  %v4603_v4 = vpop.f32.mrb[159].mxu1 }
 0x550   : > { %v3868_v44 = vadd.f32 %v4553_v1, %v6760_v28  ;;  %v3932_v34 = vadd.f32 %v4601_v33, %v3610_v46  ;;  %v4556_v10 = vadd.f32 %v4555_v42, %v4554_v49  ;;  %v4604_v56 = vadd.f32 %v4603_v4, %v4602_v62 }
 0x552   : > { %v3952_v0 = vmax.f32 %v3868_v44, 0.0  ;;  %v3968_v30 = vmax.f32 %v3932_v34, 0.0  ;;  %v3871_v45 = vadd.f32 %v4556_v10, %v6762_v26  ;;  %v3935_v23 = vadd.f32 %v4604_v56, %v3615_v59 }
 0x554   : > { %3984 = vst [vmem:[%s6767_s28 + $0x70] sm:$0xff] %v3952_v0  ;;  %4000 = vst [vmem:[%s6767_s28 + $0xf0] sm:$0xff] %v3968_v30  ;;  %v3953_v28 = vmax.f32 %v3871_v45, 0.0  ;;  %v3969_v40 = vmax.f32 %v3935_v23, 0.0 }
 0x556   : > { %3985 = vst [vmem:[%s6767_s28 + $0x78] sm:$0xff] %v3953_v28  ;;  %4001 = vst [vmem:[%s6767_s28 + $0xf8] sm:$0xff] %v3969_v40 }
 0x557   : > { %5159 = shalt.err (!%p5156_p5)
}
 0x558   : > { %s5160_s26 = scalar_lea.hbm %s6814_s15, 4096  ;;  %s5164_s0 = scalar_lea.hbm %s6881_s11, 8192 }
 0x559   : > { %p5161_p6 = scmp.ne.s32.totalorder %s6814_s15, %s5160_s26  ;;  %p5165_p10 = scmp.lt.u32.totalorder %s6814_s15, %s6881_s11 }
 0x55a   : > { %p5166_p11 = scmp.lt.u32.totalorder %s5164_s0, %s5160_s26  ;;  %p5168_p13 = scmp.lt.u32.totalorder %s5160_s26, %s6814_s15 }
 0x55b   : > { %p5162_p7 = pnand %p5161_p6, %p5331_p4 }
 0x55c   : > { %p5167_p12 = por %p5166_p11, %p5165_p10 }
 0x55d   : > { %p5163_p9 = pneg %p5162_p7 }
 0x55e   : > { %p5169_p0 = por %p5168_p13, %p5167_p12 }
 0x560   : > { %p5170_p1 = pnand %p5169_p0, %p5163_p9 }
 0x562   : > { %5173 = shalt.err (!%p5170_p1)
}
 0x563   : > { %s5229_s16 = smov 128   ;;  %s5230_s12 = smov 8  }
 0x564   : > { %5021 = dma.vmem_to_hbm [thread:$0]  (%p5331_p4), %s6816_s13, 4096, %s6814_s15, %s6824_s20, %s5229_s16, %s5229_s16, %s5230_s12  }
 0x565 PF: > { %p5027_p2 = scmp.ge.s32.totalorder %s5224_s22, 2  ;;  %s4032_s28 = sand.u32 1, %s5204_s17  }
 0x566   : > { %s4033_s26 = scalar_lea.sflag [#allocation3], %s4032_s28 }
 0x567   : > { %p5024_p3 = pnand %p5027_p2, %p5338_p8 }
 0x569   : > { %5199 = dma.done.wait (!%p5024_p3), %s4033_s26, 4096  }
 0x56a   : > { %5201 = vsyncadd (!%p5024_p3), %s4033_s26, 4294963200  ;;  %s24_s22 = sadd.s32 1, %s5224_s22   ;;  %s6910_s17 = smov %s5208_s18 }
 0x56b   : > { %p21_p5 = scmp.ge.s32.totalorder %s24_s22, 4   ;;  %s6911_s18 = smov %s5212_s19 }
 0x56c   : > { %s6912_s19 = smov %s5344_s30  ;;  %s6913_s20 = smov %s5220_s21 }
 0x56d   : > { %s6914_s21 = smov %s6916_s25  ;;  %23 = sbr.rel (!%p21_p5) target bundleno = 6 (0x6), region = 106 }
 0x574   :  { %4038 = vsyncpa [#allocation3], 1 }
 0x575   :  { %4040 = vsyncpa [#allocation3 + $0x1], 1 }

</bundles_post_ra>
